<compile_context>
chip_gen: v5e
topology: v5e:2x2
jax: 0.10.0
libtpu: 0.0.40
codegen_flags: <defaults>
</compile_context>

<pallas_src>
import functools

import jax
import jax.numpy as jnp
from jax.experimental import pallas as pl
from jax.experimental.pallas import tpu as pltpu


def _round_up(x, m):
    return (x + m - 1) // m * m


def _cdiv(a, b):
    return -(-a // b)


# ----------------------------- Pallas kernel ------------------------------ #
def _cat_linear_q_kernel(num_actions, num_atoms, n_pad, bf16_exp,
                         x_ref,
                         w1_ref, b1_ref,
                         w2_ref, b2_ref,
                         w3_ref, b3_ref,
                         w4_ref, b4_ref,
                         out_ref):
    """MLP (D -> 128 -> 128 -> 512 -> A*n_pad) + per-action softmax.

    Matmul operands are bf16 (MXU-native); accumulation, bias-add, ReLU and
    softmax math stay in f32.  Each action's atom block starts on a 128-lane
    boundary, so all slices below are lane-aligned.  Only the `num_atoms`
    useful lanes per action are written back (bf16), at lane offset 0 of
    out_ref[a] -> a plain masked vst on the last partial vreg.
    """
    x = x_ref[...].astype(jnp.bfloat16)                  # cast in-kernel (VPU)

    h = jnp.dot(x, w1_ref[...], preferred_element_type=jnp.float32) + b1_ref[...]
    h = jnp.maximum(h, 0.0)

    h = jnp.dot(h.astype(jnp.bfloat16), w2_ref[...],
                preferred_element_type=jnp.float32) + b2_ref[...]
    h = jnp.maximum(h, 0.0)

    h = jnp.dot(h.astype(jnp.bfloat16), w3_ref[...],
                preferred_element_type=jnp.float32) + b3_ref[...]
    h = jnp.maximum(h, 0.0)

    # Single aligned matmul for the final layer (every action's atom block is
    # 128-lane aligned; padded columns are zero weights and never read below).
    logits = jnp.dot(h.astype(jnp.bfloat16), w4_ref[...],
                     preferred_element_type=jnp.float32) + b4_ref[...]

    for a in range(num_actions):
        lo = a * n_pad                                   # 128-aligned start
        lg = logits[:, lo:lo + num_atoms]                # real atoms only
        m = jnp.max(lg, axis=-1, keepdims=True)
        z = lg - m
        if bf16_exp:                                     # native bf16 EUP path
            e = jnp.exp(z.astype(jnp.bfloat16)).astype(jnp.float32)
        else:
            e = jnp.exp(z)
        denom = jnp.sum(e, axis=-1, keepdims=True)
        p = e * (1.0 / denom)                            # exact normalization
        out_ref[a, :, :] = p.astype(out_ref.dtype)


# --------------------------- arch-aware tuning ----------------------------- #
def _arch_config():
    """(max_tile_b, vmem_limit_bytes, bf16_exp, prefer_multi_tile)."""
    try:
        kind = jax.devices()[0].device_kind.lower()
    except Exception:
        kind = ""
    if "v7" in kind or "7x" in kind:
        # 2 TCs / 64 MiB VMEM per TC: smaller tiles, make sure grid splits.
        return 1024, 44 * 1024 * 1024, True, True
    if "v6" in kind:
        return 2048, 64 * 1024 * 1024, True, False
    if "v5" in kind:
        return 2048, 64 * 1024 * 1024, False, False
    # Unknown chip: conservative VMEM, but still allow a 2-way split.
    return 1024, 32 * 1024 * 1024, False, True


def _pick_batch_tiling(B, max_tile, prefer_multi):
    """Balanced batch tiles: minimal padding, >=2 steps when it helps (v7x)."""
    n_tiles = _cdiv(B, max_tile)
    if prefer_multi and B >= 32:
        n_tiles = max(n_tiles, 2)
    if n_tiles <= 1:
        return B, 1                                      # block == full array
    tile_b = _round_up(_cdiv(B, n_tiles), 16)
    return tile_b, _cdiv(B, tile_b)


_SINGLE_BUF_STATE = {"ok": None}                         # pl.Buffered(1) support


def _const_spec(shape, single_buffer):
    ndim = len(shape)
    index_map = lambda i: (0,) * ndim
    if single_buffer:
        # Constant blocks never change -> no need for double buffering.
        return pl.BlockSpec(shape, index_map, pipeline_mode=pl.Buffered(1))
    return pl.BlockSpec(shape, index_map)


# ------------------------------- wrapper ----------------------------------- #
def prepare_params(params, num_actions, num_atoms):
    """One-time kernel-layout prep (cache the result and reuse every call)."""
    (w1, b1), (w2, b2), (w3, b3), (w4, b4) = params
    n_pad = _round_up(num_atoms, 128)
    d4 = w4.shape[0]
    w1b, w2b, w3b = (w.astype(jnp.bfloat16) for w in (w1, w2, w3))
    w4p = jnp.pad(w4.reshape(d4, num_actions, num_atoms),
                  ((0, 0), (0, 0), (0, n_pad - num_atoms))
                  ).reshape(d4, num_actions * n_pad).astype(jnp.bfloat16)
    b4p = jnp.pad(b4.reshape(1, num_actions, num_atoms),
                  ((0, 0), (0, 0), (0, n_pad - num_atoms))
                  ).reshape(1, num_actions * n_pad).astype(jnp.float32)
    prepped = (w1b, b1.astype(jnp.float32), w2b, b2.astype(jnp.float32),
               w3b, b3.astype(jnp.float32), w4p, b4p)
    return jax.block_until_ready(prepped)


def cat_linear_q_forward(x, prepped, num_actions, num_atoms):
    """x: (B, D) f32 -> (B, num_actions, num_atoms) bf16 softmax probabilities."""
    B, D = x.shape
    w1b, b1, w2b, b2, w3b, b3, w4p, b4p = prepped
    n_pad = w4p.shape[1] // num_actions

    max_tile, vmem_limit, bf16_exp, prefer_multi = _arch_config()
    tile_b, grid_n = _pick_batch_tiling(B, max_tile, prefer_multi)

    flops = 2 * tile_b * grid_n * (D * 128 + 128 * 128 + 128 * 512
                                   + 512 * num_actions * n_pad)
    bytes_acc = (x.size * x.dtype.itemsize
                 + sum(int(a.size) * a.dtype.itemsize
                       for a in (w1b, b1, w2b, b2, w3b, b3, w4p, b4p))
                 + num_actions * B * num_atoms * 2)
    transcend = tile_b * grid_n * num_actions * num_atoms

    kernel = functools.partial(_cat_linear_q_kernel,
                               num_actions, num_atoms, n_pad, bf16_exp)

    def _run(single_buffer_weights):
        in_specs = [pl.BlockSpec((tile_b, D), lambda i: (i, 0))]  # x: batch tiles
        in_specs += [_const_spec(a.shape, single_buffer_weights)
                     for a in (w1b, b1, w2b, b2, w3b, b3, w4p, b4p)]
        return pl.pallas_call(
            kernel,
            out_shape=jax.ShapeDtypeStruct((num_actions, B, num_atoms),
                                           jnp.bfloat16),
            grid_spec=pltpu.PrefetchScalarGridSpec(
                num_scalar_prefetch=0,
                grid=(grid_n,),
                in_specs=in_specs,
                out_specs=pl.BlockSpec((num_actions, tile_b, num_atoms),
                                       lambda i: (0, i, 0)),
            ),
            compiler_params=pltpu.CompilerParams(
                dimension_semantics=("parallel",),
                vmem_limit_bytes=vmem_limit),
            cost_estimate=pl.CostEstimate(flops=flops,
                                          transcendentals=transcend,
                                          bytes_accessed=bytes_acc),
        )(x, w1b, b1, w2b, b2, w3b, b3, w4p, b4p)

    if _SINGLE_BUF_STATE["ok"] is False:
        out3 = _run(False)
    else:
        try:
            out3 = _run(True)
            if _SINGLE_BUF_STATE["ok"] is None:
                jax.block_until_ready(out3)              # surface failures once
                _SINGLE_BUF_STATE["ok"] = True
        except Exception:
            _SINGLE_BUF_STATE["ok"] = False
            out3 = _run(False)

    # (A, B, atoms) -> (B, A, atoms): major-dim transpose over useful bf16
    # bytes only (no padded lanes, no f32 writeback, no minor-dim slice copy).
    return jnp.transpose(out3, (1, 0, 2))


# --------------------------- parameter helpers ----------------------------- #
def _orthogonal(key, out_dim, in_dim, scale=1.0):
    """Orthogonal init matching nn.init.orthogonal_; returns (out_dim, in_dim)."""
    rows, cols = out_dim, in_dim
    flat = jax.random.normal(key, (max(rows, cols), min(rows, cols)), jnp.float32)
    q, r = jnp.linalg.qr(flat)
    q = q * jnp.sign(jnp.diag(r))
    if rows < cols:
        q = q.T
    return (scale * q[:rows, :cols]).astype(jnp.float32)


def init_params(key, input_dim, num_actions, num_atoms):
    """Returns [(W, b), ...] with W stored as (in, out) and b as (1, out)."""
    dims = [(input_dim, 128), (128, 128), (128, 512),
            (512, num_actions * num_atoms)]
    keys = jax.random.split(key, len(dims))
    params = []
    for k, (din, dout) in zip(keys, dims):
        w_torch = _orthogonal(k, dout, din)      # (out, in) like nn.Linear
        w = w_torch.T                            # (in, out) for x @ W
        b = jnp.zeros((1, dout), jnp.float32)    # bias init = 0
        params.append((w, b))
    return params


# --------------------------- pure-JAX reference ----------------------------- #
def _reference_forward(x, params, num_actions, num_atoms):
    # Mirrors the kernel's bf16 matmul / f32 accumulate numerics.
    (w1, b1), (w2, b2), (w3, b3), (w4, b4) = params
    h = x
    for w, b in ((w1, b1), (w2, b2), (w3, b3)):
        h = jnp.maximum(
            jnp.dot(h.astype(jnp.bfloat16), w.astype(jnp.bfloat16),
                    preferred_element_type=jnp.float32) + b, 0.0)
    logits = jnp.dot(h.astype(jnp.bfloat16), w4.astype(jnp.bfloat16),
                     preferred_element_type=jnp.float32) + b4
    p = jax.nn.softmax(logits.reshape(-1, num_atoms), axis=-1)
    return p.reshape(x.shape[0], num_actions, num_atoms)


# --------------------------------- main ------------------------------------ #
if __name__ == "__main__":
    INPUT_DIM = 8          # input_shape[0]
    NUM_ACTIONS = 4
    NUM_ATOMS = 51         # C51-style atoms
    BATCH = 4

    key = jax.random.PRNGKey(0)
    k_x, k_p = jax.random.split(key)
    x = jax.random.normal(k_x, (BATCH, INPUT_DIM), jnp.float32)
    params = init_params(k_p, INPUT_DIM, NUM_ACTIONS, NUM_ATOMS)

    # One-time, cached parameter layout prep (not repeated per forward call).
    prepped = prepare_params(params, NUM_ACTIONS, NUM_ATOMS)

    out = cat_linear_q_forward(x, prepped, NUM_ACTIONS, NUM_ATOMS)
    out = jax.block_until_ready(out)

    assert out.shape == (BATCH, NUM_ACTIONS, NUM_ATOMS)
    # Exact f32 normalization in-kernel; tolerance covers the bf16 output cast.
    sums = jnp.sum(out.astype(jnp.float32), axis=-1)
    assert jnp.allclose(sums, 1.0, atol=5e-3)

    ref = _reference_forward(x, params, NUM_ACTIONS, NUM_ATOMS)
    assert jnp.allclose(out.astype(jnp.float32), ref, atol=2e-2)

    print("KERNEL_OK")
</pallas_src>

<mosaic_0001>
module attributes {stable_mosaic.version = 11 : i64} {
  func.func @_cat_linear_q_kernel(%arg0: i32, %arg1: memref<4x8xf32, #tpu.memory_space<vmem>>, %arg2: memref<8x128xbf16, #tpu.memory_space<vmem>>, %arg3: memref<1x128xf32, #tpu.memory_space<vmem>>, %arg4: memref<128x128xbf16, #tpu.memory_space<vmem>>, %arg5: memref<1x128xf32, #tpu.memory_space<vmem>>, %arg6: memref<128x512xbf16, #tpu.memory_space<vmem>>, %arg7: memref<1x512xf32, #tpu.memory_space<vmem>>, %arg8: memref<512x512xbf16, #tpu.memory_space<vmem>>, %arg9: memref<1x512xf32, #tpu.memory_space<vmem>>, %arg10: memref<4x4x51xbf16, #tpu.memory_space<vmem>>) attributes {dimension_semantics = [#tpu.dimension_semantics<parallel>], iteration_bounds = array<i64: 1>, scalar_prefetch = 0 : i64, scratch_operands = 0 : i64, tpu.core_type = #tpu.core_type<tc>, window_params = [{transform_indices = @transform_0, window_bounds = array<i64: 4, 8>}, {pipeline_mode = #tpu.pipeline_mode<synchronous>, transform_indices = @transform_1, window_bounds = array<i64: 8, 128>}, {pipeline_mode = #tpu.pipeline_mode<synchronous>, transform_indices = @transform_2, window_bounds = array<i64: 1, 128>}, {pipeline_mode = #tpu.pipeline_mode<synchronous>, transform_indices = @transform_3, window_bounds = array<i64: 128, 128>}, {pipeline_mode = #tpu.pipeline_mode<synchronous>, transform_indices = @transform_4, window_bounds = array<i64: 1, 128>}, {pipeline_mode = #tpu.pipeline_mode<synchronous>, transform_indices = @transform_5, window_bounds = array<i64: 128, 512>}, {pipeline_mode = #tpu.pipeline_mode<synchronous>, transform_indices = @transform_6, window_bounds = array<i64: 1, 512>}, {pipeline_mode = #tpu.pipeline_mode<synchronous>, transform_indices = @transform_7, window_bounds = array<i64: 512, 512>}, {pipeline_mode = #tpu.pipeline_mode<synchronous>, transform_indices = @transform_8, window_bounds = array<i64: 1, 512>}, {transform_indices = @transform_9, window_bounds = array<i64: 4, 4, 51>}]} {
    %c0 = arith.constant 0 : index
    %c0_0 = arith.constant 0 : index
    %0 = vector.load %arg1[%c0, %c0_0] : memref<4x8xf32, #tpu.memory_space<vmem>>, vector<4x8xf32>
    %1 = arith.truncf %0 : vector<4x8xf32> to vector<4x8xbf16>
    %c0_1 = arith.constant 0 : index
    %c0_2 = arith.constant 0 : index
    %2 = vector.load %arg2[%c0_1, %c0_2] : memref<8x128xbf16, #tpu.memory_space<vmem>>, vector<8x128xbf16>
    %cst = arith.constant dense<0.000000e+00> : vector<4x128xf32>
    %3 = tpu.matmul %1, %2, %cst {dimension_numbers = #tpu.dot_dimension_numbers<[1], [0], [0], [1], [0, 0, 1, 1], [], []>} : vector<4x8xbf16>, vector<8x128xbf16>, vector<4x128xf32> -> vector<4x128xf32>
    %c0_3 = arith.constant 0 : index
    %c0_4 = arith.constant 0 : index
    %4 = vector.load %arg3[%c0_3, %c0_4] : memref<1x128xf32, #tpu.memory_space<vmem>>, vector<1x128xf32>
    %5 = vector.broadcast %4 : vector<1x128xf32> to vector<4x128xf32>
    %6 = arith.addf %3, %5 : vector<4x128xf32>
    %cst_5 = arith.constant 0.000000e+00 : f32
    %7 = vector.broadcast %cst_5 : f32 to vector<4x128xf32>
    %8 = arith.maximumf %6, %7 : vector<4x128xf32>
    %9 = arith.truncf %8 : vector<4x128xf32> to vector<4x128xbf16>
    %c0_6 = arith.constant 0 : index
    %c0_7 = arith.constant 0 : index
    %10 = vector.load %arg4[%c0_6, %c0_7] : memref<128x128xbf16, #tpu.memory_space<vmem>>, vector<128x128xbf16>
    %cst_8 = arith.constant dense<0.000000e+00> : vector<4x128xf32>
    %11 = tpu.matmul %9, %10, %cst_8 {dimension_numbers = #tpu.dot_dimension_numbers<[1], [0], [0], [1], [0, 0, 1, 1], [], []>} : vector<4x128xbf16>, vector<128x128xbf16>, vector<4x128xf32> -> vector<4x128xf32>
    %c0_9 = arith.constant 0 : index
    %c0_10 = arith.constant 0 : index
    %12 = vector.load %arg5[%c0_9, %c0_10] : memref<1x128xf32, #tpu.memory_space<vmem>>, vector<1x128xf32>
    %13 = vector.broadcast %12 : vector<1x128xf32> to vector<4x128xf32>
    %14 = arith.addf %11, %13 : vector<4x128xf32>
    %cst_11 = arith.constant 0.000000e+00 : f32
    %15 = vector.broadcast %cst_11 : f32 to vector<4x128xf32>
    %16 = arith.maximumf %14, %15 : vector<4x128xf32>
    %17 = arith.truncf %16 : vector<4x128xf32> to vector<4x128xbf16>
    %c0_12 = arith.constant 0 : index
    %c0_13 = arith.constant 0 : index
    %18 = vector.load %arg6[%c0_12, %c0_13] : memref<128x512xbf16, #tpu.memory_space<vmem>>, vector<128x512xbf16>
    %cst_14 = arith.constant dense<0.000000e+00> : vector<4x512xf32>
    %19 = tpu.matmul %17, %18, %cst_14 {dimension_numbers = #tpu.dot_dimension_numbers<[1], [0], [0], [1], [0, 0, 1, 1], [], []>} : vector<4x128xbf16>, vector<128x512xbf16>, vector<4x512xf32> -> vector<4x512xf32>
    %c0_15 = arith.constant 0 : index
    %c0_16 = arith.constant 0 : index
    %20 = vector.load %arg7[%c0_15, %c0_16] : memref<1x512xf32, #tpu.memory_space<vmem>>, vector<1x512xf32>
    %21 = vector.broadcast %20 : vector<1x512xf32> to vector<4x512xf32>
    %22 = arith.addf %19, %21 : vector<4x512xf32>
    %cst_17 = arith.constant 0.000000e+00 : f32
    %23 = vector.broadcast %cst_17 : f32 to vector<4x512xf32>
    %24 = arith.maximumf %22, %23 : vector<4x512xf32>
    %25 = arith.truncf %24 : vector<4x512xf32> to vector<4x512xbf16>
    %c0_18 = arith.constant 0 : index
    %c0_19 = arith.constant 0 : index
    %26 = vector.load %arg8[%c0_18, %c0_19] : memref<512x512xbf16, #tpu.memory_space<vmem>>, vector<512x512xbf16>
    %cst_20 = arith.constant dense<0.000000e+00> : vector<4x512xf32>
    %27 = tpu.matmul %25, %26, %cst_20 {dimension_numbers = #tpu.dot_dimension_numbers<[1], [0], [0], [1], [0, 0, 1, 1], [], []>} : vector<4x512xbf16>, vector<512x512xbf16>, vector<4x512xf32> -> vector<4x512xf32>
    %c0_21 = arith.constant 0 : index
    %c0_22 = arith.constant 0 : index
    %28 = vector.load %arg9[%c0_21, %c0_22] : memref<1x512xf32, #tpu.memory_space<vmem>>, vector<1x512xf32>
    %29 = vector.broadcast %28 : vector<1x512xf32> to vector<4x512xf32>
    %30 = arith.addf %27, %29 : vector<4x512xf32>
    %31 = vector.extract_strided_slice %30 {offsets = [0, 0], sizes = [4, 51], strides = [1, 1]} : vector<4x512xf32> to vector<4x51xf32>
    %cst_23 = arith.constant dense<0xFF800000> : vector<4xf32>
    %32 = vector.multi_reduction <maximumf>, %31, %cst_23 [1] : vector<4x51xf32> to vector<4xf32>
    %33 = vector.shape_cast %32 : vector<4xf32> to vector<4x1xf32>
    %34 = vector.broadcast %33 : vector<4x1xf32> to vector<4x51xf32>
    %35 = arith.subf %31, %34 : vector<4x51xf32>
    %36 = math.exp %35 : vector<4x51xf32>
    %cst_24 = arith.constant dense<0.000000e+00> : vector<4xf32>
    %37 = vector.multi_reduction <add>, %36, %cst_24 [1] : vector<4x51xf32> to vector<4xf32>
    %38 = vector.shape_cast %37 : vector<4xf32> to vector<4x1xf32>
    %cst_25 = arith.constant 1.000000e+00 : f32
    %39 = vector.broadcast %cst_25 : f32 to vector<4x1xf32>
    %40 = arith.divf %39, %38 : vector<4x1xf32>
    %41 = vector.broadcast %40 : vector<4x1xf32> to vector<4x51xf32>
    %42 = arith.mulf %36, %41 : vector<4x51xf32>
    %43 = arith.truncf %42 : vector<4x51xf32> to vector<4x51xbf16>
    %c0_26 = arith.constant 0 : index
    %c0_27 = arith.constant 0 : index
    %c0_28 = arith.constant 0 : index
    %44 = vector.load %arg10[%c0_26, %c0_27, %c0_28] : memref<4x4x51xbf16, #tpu.memory_space<vmem>>, vector<1x4x51xbf16>
    %45 = vector.shape_cast %44 : vector<1x4x51xbf16> to vector<4x51xbf16>
    %46 = vector.shape_cast %43 : vector<4x51xbf16> to vector<1x4x51xbf16>
    tpu.vector_store %arg10[%c0_26, %c0_27, %c0_28], %46 {strides = array<i32>} : memref<4x4x51xbf16, #tpu.memory_space<vmem>>, vector<1x4x51xbf16>,
    %47 = vector.extract_strided_slice %30 {offsets = [0, 128], sizes = [4, 51], strides = [1, 1]} : vector<4x512xf32> to vector<4x51xf32>
    %cst_29 = arith.constant dense<0xFF800000> : vector<4xf32>
    %48 = vector.multi_reduction <maximumf>, %47, %cst_29 [1] : vector<4x51xf32> to vector<4xf32>
    %49 = vector.shape_cast %48 : vector<4xf32> to vector<4x1xf32>
    %50 = vector.broadcast %49 : vector<4x1xf32> to vector<4x51xf32>
    %51 = arith.subf %47, %50 : vector<4x51xf32>
    %52 = math.exp %51 : vector<4x51xf32>
    %cst_30 = arith.constant dense<0.000000e+00> : vector<4xf32>
    %53 = vector.multi_reduction <add>, %52, %cst_30 [1] : vector<4x51xf32> to vector<4xf32>
    %54 = vector.shape_cast %53 : vector<4xf32> to vector<4x1xf32>
    %cst_31 = arith.constant 1.000000e+00 : f32
    %55 = vector.broadcast %cst_31 : f32 to vector<4x1xf32>
    %56 = arith.divf %55, %54 : vector<4x1xf32>
    %57 = vector.broadcast %56 : vector<4x1xf32> to vector<4x51xf32>
    %58 = arith.mulf %52, %57 : vector<4x51xf32>
    %59 = arith.truncf %58 : vector<4x51xf32> to vector<4x51xbf16>
    %c1 = arith.constant 1 : index
    %c0_32 = arith.constant 0 : index
    %c0_33 = arith.constant 0 : index
    %60 = vector.load %arg10[%c1, %c0_32, %c0_33] : memref<4x4x51xbf16, #tpu.memory_space<vmem>>, vector<1x4x51xbf16>
    %61 = vector.shape_cast %60 : vector<1x4x51xbf16> to vector<4x51xbf16>
    %62 = vector.shape_cast %59 : vector<4x51xbf16> to vector<1x4x51xbf16>
    tpu.vector_store %arg10[%c1, %c0_32, %c0_33], %62 {strides = array<i32>} : memref<4x4x51xbf16, #tpu.memory_space<vmem>>, vector<1x4x51xbf16>,
    %63 = vector.extract_strided_slice %30 {offsets = [0, 256], sizes = [4, 51], strides = [1, 1]} : vector<4x512xf32> to vector<4x51xf32>
    %cst_34 = arith.constant dense<0xFF800000> : vector<4xf32>
    %64 = vector.multi_reduction <maximumf>, %63, %cst_34 [1] : vector<4x51xf32> to vector<4xf32>
    %65 = vector.shape_cast %64 : vector<4xf32> to vector<4x1xf32>
    %66 = vector.broadcast %65 : vector<4x1xf32> to vector<4x51xf32>
    %67 = arith.subf %63, %66 : vector<4x51xf32>
    %68 = math.exp %67 : vector<4x51xf32>
    %cst_35 = arith.constant dense<0.000000e+00> : vector<4xf32>
    %69 = vector.multi_reduction <add>, %68, %cst_35 [1] : vector<4x51xf32> to vector<4xf32>
    %70 = vector.shape_cast %69 : vector<4xf32> to vector<4x1xf32>
    %cst_36 = arith.constant 1.000000e+00 : f32
    %71 = vector.broadcast %cst_36 : f32 to vector<4x1xf32>
    %72 = arith.divf %71, %70 : vector<4x1xf32>
    %73 = vector.broadcast %72 : vector<4x1xf32> to vector<4x51xf32>
    %74 = arith.mulf %68, %73 : vector<4x51xf32>
    %75 = arith.truncf %74 : vector<4x51xf32> to vector<4x51xbf16>
    %c2 = arith.constant 2 : index
    %c0_37 = arith.constant 0 : index
    %c0_38 = arith.constant 0 : index
    %76 = vector.load %arg10[%c2, %c0_37, %c0_38] : memref<4x4x51xbf16, #tpu.memory_space<vmem>>, vector<1x4x51xbf16>
    %77 = vector.shape_cast %76 : vector<1x4x51xbf16> to vector<4x51xbf16>
    %78 = vector.shape_cast %75 : vector<4x51xbf16> to vector<1x4x51xbf16>
    tpu.vector_store %arg10[%c2, %c0_37, %c0_38], %78 {strides = array<i32>} : memref<4x4x51xbf16, #tpu.memory_space<vmem>>, vector<1x4x51xbf16>,
    %79 = vector.extract_strided_slice %30 {offsets = [0, 384], sizes = [4, 51], strides = [1, 1]} : vector<4x512xf32> to vector<4x51xf32>
    %cst_39 = arith.constant dense<0xFF800000> : vector<4xf32>
    %80 = vector.multi_reduction <maximumf>, %79, %cst_39 [1] : vector<4x51xf32> to vector<4xf32>
    %81 = vector.shape_cast %80 : vector<4xf32> to vector<4x1xf32>
    %82 = vector.broadcast %81 : vector<4x1xf32> to vector<4x51xf32>
    %83 = arith.subf %79, %82 : vector<4x51xf32>
    %84 = math.exp %83 : vector<4x51xf32>
    %cst_40 = arith.constant dense<0.000000e+00> : vector<4xf32>
    %85 = vector.multi_reduction <add>, %84, %cst_40 [1] : vector<4x51xf32> to vector<4xf32>
    %86 = vector.shape_cast %85 : vector<4xf32> to vector<4x1xf32>
    %cst_41 = arith.constant 1.000000e+00 : f32
    %87 = vector.broadcast %cst_41 : f32 to vector<4x1xf32>
    %88 = arith.divf %87, %86 : vector<4x1xf32>
    %89 = vector.broadcast %88 : vector<4x1xf32> to vector<4x51xf32>
    %90 = arith.mulf %84, %89 : vector<4x51xf32>
    %91 = arith.truncf %90 : vector<4x51xf32> to vector<4x51xbf16>
    %c3 = arith.constant 3 : index
    %c0_42 = arith.constant 0 : index
    %c0_43 = arith.constant 0 : index
    %92 = vector.load %arg10[%c3, %c0_42, %c0_43] : memref<4x4x51xbf16, #tpu.memory_space<vmem>>, vector<1x4x51xbf16>
    %93 = vector.shape_cast %92 : vector<1x4x51xbf16> to vector<4x51xbf16>
    %94 = vector.shape_cast %91 : vector<4x51xbf16> to vector<1x4x51xbf16>
    tpu.vector_store %arg10[%c3, %c0_42, %c0_43], %94 {strides = array<i32>} : memref<4x4x51xbf16, #tpu.memory_space<vmem>>, vector<1x4x51xbf16>,
    return
  }
  func.func @transform_0(%arg0: i32) -> (i32, i32) {
    %c0_i32 = arith.constant 0 : i32
    %c0_i32_0 = arith.constant 0 : i32
    return %arg0, %c0_i32 : i32, i32
  }
  func.func @transform_1(%arg0: i32) -> (i32, i32) {
    %c0_i32 = arith.constant 0 : i32
    %c0_i32_0 = arith.constant 0 : i32
    %c0_i32_1 = arith.constant 0 : i32
    return %c0_i32, %c0_i32_0 : i32, i32
  }
  func.func @transform_2(%arg0: i32) -> (i32, i32) {
    %c0_i32 = arith.constant 0 : i32
    %c0_i32_0 = arith.constant 0 : i32
    %c0_i32_1 = arith.constant 0 : i32
    return %c0_i32, %c0_i32_0 : i32, i32
  }
  func.func @transform_3(%arg0: i32) -> (i32, i32) {
    %c0_i32 = arith.constant 0 : i32
    %c0_i32_0 = arith.constant 0 : i32
    %c0_i32_1 = arith.constant 0 : i32
    return %c0_i32, %c0_i32_0 : i32, i32
  }
  func.func @transform_4(%arg0: i32) -> (i32, i32) {
    %c0_i32 = arith.constant 0 : i32
    %c0_i32_0 = arith.constant 0 : i32
    %c0_i32_1 = arith.constant 0 : i32
    return %c0_i32, %c0_i32_0 : i32, i32
  }
  func.func @transform_5(%arg0: i32) -> (i32, i32) {
    %c0_i32 = arith.constant 0 : i32
    %c0_i32_0 = arith.constant 0 : i32
    %c0_i32_1 = arith.constant 0 : i32
    return %c0_i32, %c0_i32_0 : i32, i32
  }
  func.func @transform_6(%arg0: i32) -> (i32, i32) {
    %c0_i32 = arith.constant 0 : i32
    %c0_i32_0 = arith.constant 0 : i32
    %c0_i32_1 = arith.constant 0 : i32
    return %c0_i32, %c0_i32_0 : i32, i32
  }
  func.func @transform_7(%arg0: i32) -> (i32, i32) {
    %c0_i32 = arith.constant 0 : i32
    %c0_i32_0 = arith.constant 0 : i32
    %c0_i32_1 = arith.constant 0 : i32
    return %c0_i32, %c0_i32_0 : i32, i32
  }
  func.func @transform_8(%arg0: i32) -> (i32, i32) {
    %c0_i32 = arith.constant 0 : i32
    %c0_i32_0 = arith.constant 0 : i32
    %c0_i32_1 = arith.constant 0 : i32
    return %c0_i32, %c0_i32_0 : i32, i32
  }
  func.func @transform_9(%arg0: i32) -> (i32, i32, i32) {
    %c0_i32 = arith.constant 0 : i32
    %c0_i32_0 = arith.constant 0 : i32
    %c0_i32_1 = arith.constant 0 : i32
    return %c0_i32, %arg0, %c0_i32_0 : i32, i32, i32
  }
}

module attributes {stable_mosaic.version = 11 : i64} {
  func.func @_cat_linear_q_kernel(%arg0: i32, %arg1: memref<4x8xf32, #tpu.memory_space<vmem>>, %arg2: memref<8x128xbf16, #tpu.memory_space<vmem>>, %arg3: memref<1x128xf32, #tpu.memory_space<vmem>>, %arg4: memref<128x128xbf16, #tpu.memory_space<vmem>>, %arg5: memref<1x128xf32, #tpu.memory_space<vmem>>, %arg6: memref<128x512xbf16, #tpu.memory_space<vmem>>, %arg7: memref<1x512xf32, #tpu.memory_space<vmem>>, %arg8: memref<512x512xbf16, #tpu.memory_space<vmem>>, %arg9: memref<1x512xf32, #tpu.memory_space<vmem>>, %arg10: memref<4x4x51xbf16, #tpu.memory_space<vmem>>) attributes {dimension_semantics = [#tpu.dimension_semantics<parallel>], iteration_bounds = array<i64: 1>, scalar_prefetch = 0 : i64, scratch_operands = 0 : i64, tpu.core_type = #tpu.core_type<tc>, window_params = [{transform_indices = @transform_0, window_bounds = array<i64: 4, 8>}, {pipeline_mode = #tpu.pipeline_mode<synchronous>, transform_indices = @transform_1, window_bounds = array<i64: 8, 128>}, {pipeline_mode = #tpu.pipeline_mode<synchronous>, transform_indices = @transform_2, window_bounds = array<i64: 1, 128>}, {pipeline_mode = #tpu.pipeline_mode<synchronous>, transform_indices = @transform_3, window_bounds = array<i64: 128, 128>}, {pipeline_mode = #tpu.pipeline_mode<synchronous>, transform_indices = @transform_4, window_bounds = array<i64: 1, 128>}, {pipeline_mode = #tpu.pipeline_mode<synchronous>, transform_indices = @transform_5, window_bounds = array<i64: 128, 512>}, {pipeline_mode = #tpu.pipeline_mode<synchronous>, transform_indices = @transform_6, window_bounds = array<i64: 1, 512>}, {pipeline_mode = #tpu.pipeline_mode<synchronous>, transform_indices = @transform_7, window_bounds = array<i64: 512, 512>}, {pipeline_mode = #tpu.pipeline_mode<synchronous>, transform_indices = @transform_8, window_bounds = array<i64: 1, 512>}, {transform_indices = @transform_9, window_bounds = array<i64: 4, 4, 51>}]} {
    %c0 = arith.constant 0 : index
    %c0_0 = arith.constant 0 : index
    %0 = vector.load %arg1[%c0, %c0_0] : memref<4x8xf32, #tpu.memory_space<vmem>>, vector<4x8xf32>
    %1 = arith.truncf %0 : vector<4x8xf32> to vector<4x8xbf16>
    %c0_1 = arith.constant 0 : index
    %c0_2 = arith.constant 0 : index
    %2 = vector.load %arg2[%c0_1, %c0_2] : memref<8x128xbf16, #tpu.memory_space<vmem>>, vector<8x128xbf16>
    %cst = arith.constant dense<0.000000e+00> : vector<4x128xf32>
    %3 = tpu.matmul %1, %2, %cst {dimension_numbers = #tpu.dot_dimension_numbers<[1], [0], [0], [1], [0, 0, 1, 1], [], []>} : vector<4x8xbf16>, vector<8x128xbf16>, vector<4x128xf32> -> vector<4x128xf32>
    %c0_3 = arith.constant 0 : index
    %c0_4 = arith.constant 0 : index
    %4 = vector.load %arg3[%c0_3, %c0_4] : memref<1x128xf32, #tpu.memory_space<vmem>>, vector<1x128xf32>
    %5 = vector.broadcast %4 : vector<1x128xf32> to vector<4x128xf32>
    %6 = arith.addf %3, %5 : vector<4x128xf32>
    %cst_5 = arith.constant 0.000000e+00 : f32
    %7 = vector.broadcast %cst_5 : f32 to vector<4x128xf32>
    %8 = arith.maximumf %6, %7 : vector<4x128xf32>
    %9 = arith.truncf %8 : vector<4x128xf32> to vector<4x128xbf16>
    %c0_6 = arith.constant 0 : index
    %c0_7 = arith.constant 0 : index
    %10 = vector.load %arg4[%c0_6, %c0_7] : memref<128x128xbf16, #tpu.memory_space<vmem>>, vector<128x128xbf16>
    %cst_8 = arith.constant dense<0.000000e+00> : vector<4x128xf32>
    %11 = tpu.matmul %9, %10, %cst_8 {dimension_numbers = #tpu.dot_dimension_numbers<[1], [0], [0], [1], [0, 0, 1, 1], [], []>} : vector<4x128xbf16>, vector<128x128xbf16>, vector<4x128xf32> -> vector<4x128xf32>
    %c0_9 = arith.constant 0 : index
    %c0_10 = arith.constant 0 : index
    %12 = vector.load %arg5[%c0_9, %c0_10] : memref<1x128xf32, #tpu.memory_space<vmem>>, vector<1x128xf32>
    %13 = vector.broadcast %12 : vector<1x128xf32> to vector<4x128xf32>
    %14 = arith.addf %11, %13 : vector<4x128xf32>
    %cst_11 = arith.constant 0.000000e+00 : f32
    %15 = vector.broadcast %cst_11 : f32 to vector<4x128xf32>
    %16 = arith.maximumf %14, %15 : vector<4x128xf32>
    %17 = arith.truncf %16 : vector<4x128xf32> to vector<4x128xbf16>
    %c0_12 = arith.constant 0 : index
    %c0_13 = arith.constant 0 : index
    %18 = vector.load %arg6[%c0_12, %c0_13] : memref<128x512xbf16, #tpu.memory_space<vmem>>, vector<128x512xbf16>
    %cst_14 = arith.constant dense<0.000000e+00> : vector<4x512xf32>
    %19 = tpu.matmul %17, %18, %cst_14 {dimension_numbers = #tpu.dot_dimension_numbers<[1], [0], [0], [1], [0, 0, 1, 1], [], []>} : vector<4x128xbf16>, vector<128x512xbf16>, vector<4x512xf32> -> vector<4x512xf32>
    %c0_15 = arith.constant 0 : index
    %c0_16 = arith.constant 0 : index
    %20 = vector.load %arg7[%c0_15, %c0_16] : memref<1x512xf32, #tpu.memory_space<vmem>>, vector<1x512xf32>
    %21 = vector.broadcast %20 : vector<1x512xf32> to vector<4x512xf32>
    %22 = arith.addf %19, %21 : vector<4x512xf32>
    %cst_17 = arith.constant 0.000000e+00 : f32
    %23 = vector.broadcast %cst_17 : f32 to vector<4x512xf32>
    %24 = arith.maximumf %22, %23 : vector<4x512xf32>
    %25 = arith.truncf %24 : vector<4x512xf32> to vector<4x512xbf16>
    %c0_18 = arith.constant 0 : index
    %c0_19 = arith.constant 0 : index
    %26 = vector.load %arg8[%c0_18, %c0_19] : memref<512x512xbf16, #tpu.memory_space<vmem>>, vector<512x512xbf16>
    %cst_20 = arith.constant dense<0.000000e+00> : vector<4x512xf32>
    %27 = tpu.matmul %25, %26, %cst_20 {dimension_numbers = #tpu.dot_dimension_numbers<[1], [0], [0], [1], [0, 0, 1, 1], [], []>} : vector<4x512xbf16>, vector<512x512xbf16>, vector<4x512xf32> -> vector<4x512xf32>
    %c0_21 = arith.constant 0 : index
    %c0_22 = arith.constant 0 : index
    %28 = vector.load %arg9[%c0_21, %c0_22] : memref<1x512xf32, #tpu.memory_space<vmem>>, vector<1x512xf32>
    %29 = vector.broadcast %28 : vector<1x512xf32> to vector<4x512xf32>
    %30 = arith.addf %27, %29 : vector<4x512xf32>
    %31 = vector.extract_strided_slice %30 {offsets = [0, 0], sizes = [4, 51], strides = [1, 1]} : vector<4x512xf32> to vector<4x51xf32>
    %cst_23 = arith.constant dense<0xFF800000> : vector<4xf32>
    %32 = vector.multi_reduction <maximumf>, %31, %cst_23 [1] : vector<4x51xf32> to vector<4xf32>
    %33 = vector.shape_cast %32 : vector<4xf32> to vector<4x1xf32>
    %34 = vector.broadcast %33 : vector<4x1xf32> to vector<4x51xf32>
    %35 = arith.subf %31, %34 : vector<4x51xf32>
    %36 = math.exp %35 : vector<4x51xf32>
    %cst_24 = arith.constant dense<0.000000e+00> : vector<4xf32>
    %37 = vector.multi_reduction <add>, %36, %cst_24 [1] : vector<4x51xf32> to vector<4xf32>
    %38 = vector.shape_cast %37 : vector<4xf32> to vector<4x1xf32>
    %cst_25 = arith.constant 1.000000e+00 : f32
    %39 = vector.broadcast %cst_25 : f32 to vector<4x1xf32>
    %40 = arith.divf %39, %38 : vector<4x1xf32>
    %41 = vector.broadcast %40 : vector<4x1xf32> to vector<4x51xf32>
    %42 = arith.mulf %36, %41 : vector<4x51xf32>
    %43 = arith.truncf %42 : vector<4x51xf32> to vector<4x51xbf16>
    %c0_26 = arith.constant 0 : index
    %c0_27 = arith.constant 0 : index
    %c0_28 = arith.constant 0 : index
    %44 = vector.load %arg10[%c0_26, %c0_27, %c0_28] : memref<4x4x51xbf16, #tpu.memory_space<vmem>>, vector<1x4x51xbf16>
    %45 = vector.shape_cast %44 : vector<1x4x51xbf16> to vector<4x51xbf16>
    %46 = vector.shape_cast %43 : vector<4x51xbf16> to vector<1x4x51xbf16>
    tpu.vector_store %arg10[%c0_26, %c0_27, %c0_28], %46 {strides = array<i32>} : memref<4x4x51xbf16, #tpu.memory_space<vmem>>, vector<1x4x51xbf16>,
    %47 = vector.extract_strided_slice %30 {offsets = [0, 128], sizes = [4, 51], strides = [1, 1]} : vector<4x512xf32> to vector<4x51xf32>
    %cst_29 = arith.constant dense<0xFF800000> : vector<4xf32>
    %48 = vector.multi_reduction <maximumf>, %47, %cst_29 [1] : vector<4x51xf32> to vector<4xf32>
    %49 = vector.shape_cast %48 : vector<4xf32> to vector<4x1xf32>
    %50 = vector.broadcast %49 : vector<4x1xf32> to vector<4x51xf32>
    %51 = arith.subf %47, %50 : vector<4x51xf32>
    %52 = math.exp %51 : vector<4x51xf32>
    %cst_30 = arith.constant dense<0.000000e+00> : vector<4xf32>
    %53 = vector.multi_reduction <add>, %52, %cst_30 [1] : vector<4x51xf32> to vector<4xf32>
    %54 = vector.shape_cast %53 : vector<4xf32> to vector<4x1xf32>
    %cst_31 = arith.constant 1.000000e+00 : f32
    %55 = vector.broadcast %cst_31 : f32 to vector<4x1xf32>
    %56 = arith.divf %55, %54 : vector<4x1xf32>
    %57 = vector.broadcast %56 : vector<4x1xf32> to vector<4x51xf32>
    %58 = arith.mulf %52, %57 : vector<4x51xf32>
    %59 = arith.truncf %58 : vector<4x51xf32> to vector<4x51xbf16>
    %c1 = arith.constant 1 : index
    %c0_32 = arith.constant 0 : index
    %c0_33 = arith.constant 0 : index
    %60 = vector.load %arg10[%c1, %c0_32, %c0_33] : memref<4x4x51xbf16, #tpu.memory_space<vmem>>, vector<1x4x51xbf16>
    %61 = vector.shape_cast %60 : vector<1x4x51xbf16> to vector<4x51xbf16>
    %62 = vector.shape_cast %59 : vector<4x51xbf16> to vector<1x4x51xbf16>
    tpu.vector_store %arg10[%c1, %c0_32, %c0_33], %62 {strides = array<i32>} : memref<4x4x51xbf16, #tpu.memory_space<vmem>>, vector<1x4x51xbf16>,
    %63 = vector.extract_strided_slice %30 {offsets = [0, 256], sizes = [4, 51], strides = [1, 1]} : vector<4x512xf32> to vector<4x51xf32>
    %cst_34 = arith.constant dense<0xFF800000> : vector<4xf32>
    %64 = vector.multi_reduction <maximumf>, %63, %cst_34 [1] : vector<4x51xf32> to vector<4xf32>
    %65 = vector.shape_cast %64 : vector<4xf32> to vector<4x1xf32>
    %66 = vector.broadcast %65 : vector<4x1xf32> to vector<4x51xf32>
    %67 = arith.subf %63, %66 : vector<4x51xf32>
    %68 = math.exp %67 : vector<4x51xf32>
    %cst_35 = arith.constant dense<0.000000e+00> : vector<4xf32>
    %69 = vector.multi_reduction <add>, %68, %cst_35 [1] : vector<4x51xf32> to vector<4xf32>
    %70 = vector.shape_cast %69 : vector<4xf32> to vector<4x1xf32>
    %cst_36 = arith.constant 1.000000e+00 : f32
    %71 = vector.broadcast %cst_36 : f32 to vector<4x1xf32>
    %72 = arith.divf %71, %70 : vector<4x1xf32>
    %73 = vector.broadcast %72 : vector<4x1xf32> to vector<4x51xf32>
    %74 = arith.mulf %68, %73 : vector<4x51xf32>
    %75 = arith.truncf %74 : vector<4x51xf32> to vector<4x51xbf16>
    %c2 = arith.constant 2 : index
    %c0_37 = arith.constant 0 : index
    %c0_38 = arith.constant 0 : index
    %76 = vector.load %arg10[%c2, %c0_37, %c0_38] : memref<4x4x51xbf16, #tpu.memory_space<vmem>>, vector<1x4x51xbf16>
    %77 = vector.shape_cast %76 : vector<1x4x51xbf16> to vector<4x51xbf16>
    %78 = vector.shape_cast %75 : vector<4x51xbf16> to vector<1x4x51xbf16>
    tpu.vector_store %arg10[%c2, %c0_37, %c0_38], %78 {strides = array<i32>} : memref<4x4x51xbf16, #tpu.memory_space<vmem>>, vector<1x4x51xbf16>,
    %79 = vector.extract_strided_slice %30 {offsets = [0, 384], sizes = [4, 51], strides = [1, 1]} : vector<4x512xf32> to vector<4x51xf32>
    %cst_39 = arith.constant dense<0xFF800000> : vector<4xf32>
    %80 = vector.multi_reduction <maximumf>, %79, %cst_39 [1] : vector<4x51xf32> to vector<4xf32>
    %81 = vector.shape_cast %80 : vector<4xf32> to vector<4x1xf32>
    %82 = vector.broadcast %81 : vector<4x1xf32> to vector<4x51xf32>
    %83 = arith.subf %79, %82 : vector<4x51xf32>
    %84 = math.exp %83 : vector<4x51xf32>
    %cst_40 = arith.constant dense<0.000000e+00> : vector<4xf32>
    %85 = vector.multi_reduction <add>, %84, %cst_40 [1] : vector<4x51xf32> to vector<4xf32>
    %86 = vector.shape_cast %85 : vector<4xf32> to vector<4x1xf32>
    %cst_41 = arith.constant 1.000000e+00 : f32
    %87 = vector.broadcast %cst_41 : f32 to vector<4x1xf32>
    %88 = arith.divf %87, %86 : vector<4x1xf32>
    %89 = vector.broadcast %88 : vector<4x1xf32> to vector<4x51xf32>
    %90 = arith.mulf %84, %89 : vector<4x51xf32>
    %91 = arith.truncf %90 : vector<4x51xf32> to vector<4x51xbf16>
    %c3 = arith.constant 3 : index
    %c0_42 = arith.constant 0 : index
    %c0_43 = arith.constant 0 : index
    %92 = vector.load %arg10[%c3, %c0_42, %c0_43] : memref<4x4x51xbf16, #tpu.memory_space<vmem>>, vector<1x4x51xbf16>
    %93 = vector.shape_cast %92 : vector<1x4x51xbf16> to vector<4x51xbf16>
    %94 = vector.shape_cast %91 : vector<4x51xbf16> to vector<1x4x51xbf16>
    tpu.vector_store %arg10[%c3, %c0_42, %c0_43], %94 {strides = array<i32>} : memref<4x4x51xbf16, #tpu.memory_space<vmem>>, vector<1x4x51xbf16>,
    return
  }
  func.func @transform_0(%arg0: i32) -> (i32, i32) {
    %c0_i32 = arith.constant 0 : i32
    %c0_i32_0 = arith.constant 0 : i32
    return %arg0, %c0_i32 : i32, i32
  }
  func.func @transform_1(%arg0: i32) -> (i32, i32) {
    %c0_i32 = arith.constant 0 : i32
    %c0_i32_0 = arith.constant 0 : i32
    %c0_i32_1 = arith.constant 0 : i32
    return %c0_i32, %c0_i32_0 : i32, i32
  }
  func.func @transform_2(%arg0: i32) -> (i32, i32) {
    %c0_i32 = arith.constant 0 : i32
    %c0_i32_0 = arith.constant 0 : i32
    %c0_i32_1 = arith.constant 0 : i32
    return %c0_i32, %c0_i32_0 : i32, i32
  }
  func.func @transform_3(%arg0: i32) -> (i32, i32) {
    %c0_i32 = arith.constant 0 : i32
    %c0_i32_0 = arith.constant 0 : i32
    %c0_i32_1 = arith.constant 0 : i32
    return %c0_i32, %c0_i32_0 : i32, i32
  }
  func.func @transform_4(%arg0: i32) -> (i32, i32) {
    %c0_i32 = arith.constant 0 : i32
    %c0_i32_0 = arith.constant 0 : i32
    %c0_i32_1 = arith.constant 0 : i32
    return %c0_i32, %c0_i32_0 : i32, i32
  }
  func.func @transform_5(%arg0: i32) -> (i32, i32) {
    %c0_i32 = arith.constant 0 : i32
    %c0_i32_0 = arith.constant 0 : i32
    %c0_i32_1 = arith.constant 0 : i32
    return %c0_i32, %c0_i32_0 : i32, i32
  }
  func.func @transform_6(%arg0: i32) -> (i32, i32) {
    %c0_i32 = arith.constant 0 : i32
    %c0_i32_0 = arith.constant 0 : i32
    %c0_i32_1 = arith.constant 0 : i32
    return %c0_i32, %c0_i32_0 : i32, i32
  }
  func.func @transform_7(%arg0: i32) -> (i32, i32) {
    %c0_i32 = arith.constant 0 : i32
    %c0_i32_0 = arith.constant 0 : i32
    %c0_i32_1 = arith.constant 0 : i32
    return %c0_i32, %c0_i32_0 : i32, i32
  }
  func.func @transform_8(%arg0: i32) -> (i32, i32) {
    %c0_i32 = arith.constant 0 : i32
    %c0_i32_0 = arith.constant 0 : i32
    %c0_i32_1 = arith.constant 0 : i32
    return %c0_i32, %c0_i32_0 : i32, i32
  }
  func.func @transform_9(%arg0: i32) -> (i32, i32, i32) {
    %c0_i32 = arith.constant 0 : i32
    %c0_i32_0 = arith.constant 0 : i32
    %c0_i32_1 = arith.constant 0 : i32
    return %c0_i32, %arg0, %c0_i32_0 : i32, i32, i32
  }
}

</mosaic_0001>

<bundles_post_ra>
// kernel: tpu_custom_call.1
= control target key start
LH: loop header
LB: loop body
LE: loop exit
PB: predicated region body
PF: predicated region fallthrough
CT: control target
= control target key end

     0   :  { %14 = vsyncpa [#allocation3], 0  ;;  %s2844_s0 = inlined_call_operand.hbm [shape: f32[4,8], index: 0, kind: input, shape index: {}]   ;;  %s2845_s1 = inlined_call_operand.hbm [shape: bf16[8,128], index: 1, kind: input, shape index: {}]   ;;  %s2846_s2 = inlined_call_operand.vmem [shape: f32[1,128], index: 2, kind: input, shape index: {}]   ;;  %s2847_s3 = inlined_call_operand.hbm [shape: bf16[128,128], index: 3, kind: input, shape index: {}]   ;;  %s2848_s4 = inlined_call_operand.hbm [shape: f32[1,128], index: 4, kind: input, shape index: {}]   ;;  %s2849_s5 = inlined_call_operand.hbm [shape: bf16[128,512], index: 5, kind: input, shape index: {}]   ;;  %s2850_s6 = inlined_call_operand.vmem [shape: f32[1,512], index: 6, kind: input, shape index: {}]   ;;  %s2851_s7 = inlined_call_operand.hbm [shape: bf16[512,512], index: 7, kind: input, shape index: {}]   ;;  %s2852_s8 = inlined_call_operand.hbm [shape: f32[1,512], index: 8, kind: input, shape index: {}]   ;;  %s2853_s9 = inlined_call_operand.hbm [shape: bf16[4,4,51], index: 9, kind: output, shape index: {}]  }
   0x1   :  { %15 = vsyncpa [#allocation6], 0 }
   0x2   :  { %16 = vsyncpa [#allocation9], 0 }
   0x3   :  { %17 = vsyncpa [#allocation12], 0  ;;  %s35_s11 = sshll.u32 %s2845_s1, 4  ;;  %s36_s11 = int_to_ptr.hbm [resolvable:$true] %s35_s11 }
   0x4   :  { %18 = vsyncpa [#allocation4], 0  ;;  %s2706_s12 = smov [#allocation5]   ;;  %s61_s16 = sshll.u32 %s2848_s4, 4  ;;  %s62_s16 = int_to_ptr.hbm [resolvable:$true] %s61_s16 }
   0x5   :  { %s37_s13 = sshll.u32 %s2706_s12, 4  ;;  %s2707_s17 = smov [#allocation8]   ;;  %s38_s13 = int_to_ptr.vmem [resolvable:$true] %s37_s13 }
   0x6   :  { %40 = dma.hbm_to_vmem [thread:$0]  %s36_s11, 64, %s38_s13, [#allocation6]  }
   0x7   :  { %s63_s18 = sshll.u32 %s2707_s17, 4  ;;  %s86_s21 = sshll.u32 %s2851_s7, 4  ;;  %s64_s18 = int_to_ptr.vmem [resolvable:$true] %s63_s18  ;;  %s87_s21 = int_to_ptr.hbm [resolvable:$true] %s86_s21 }
   0x8   :  { %66 = dma.hbm_to_vmem [thread:$0]  %s62_s16, 16, %s64_s18, [#allocation9]  }
   0x9   :  { %s2708_s1 = smov [#allocation11]   ;;  %s24_s25 = sshll.u32 %s2844_s0, 4  ;;  %s25_s25 = int_to_ptr.hbm [resolvable:$true] %s24_s25 }
   0xa   :  { %s88_s22 = sshll.u32 %s2708_s1, 4  ;;  %s2709_s26 = smov 256   ;;  %s89_s22 = int_to_ptr.vmem [resolvable:$true] %s88_s22 }
   0xb   :  { %s2710_s4 = smov 16   ;;  %s2711_s27 = smov [#allocation2]  }
   0xc   :  { %94 = dma.hbm_to_vmem [thread:$0]  %s87_s21, 16384, %s89_s22, [#allocation12], %s2709_s26, %s2709_s26, %s2710_s4  }
   0xd   :  { %s26_s28 = sshll.u32 %s2711_s27, 4  ;;  %s47_s10 = sshll.u32 %s2847_s3, 4  ;;  %s27_s28 = int_to_ptr.vmem [resolvable:$true] %s26_s28  ;;  %s48_s10 = int_to_ptr.hbm [resolvable:$true] %s47_s10 }
   0xe   :  { %29 = dma.hbm_to_vmem [thread:$0]  %s25_s25, 64, %s27_s28, [#allocation3]  }
   0xf   :  { %s2712_s7 = smov [#allocation7]   ;;  %s71_s0 = sshll.u32 %s2849_s5, 4  ;;  %s72_s0 = int_to_ptr.hbm [resolvable:$true] %s71_s0 }
  0x10   :  { %s49_s11 = sshll.u32 %s2712_s7, 4  ;;  %s2713_s14 = smov 64   ;;  %s50_s11 = int_to_ptr.vmem [resolvable:$true] %s49_s11 }
  0x11   :  { %s2714_s15 = smov 4   ;;  %s2715_s16 = smov [#allocation10]  }
  0x12   :  { %55 = dma.hbm_to_vmem [thread:$0]  %s48_s10, 1024, %s50_s11, [#allocation6], %s2713_s14, %s2713_s14, %s2714_s15  }
  0x13   :  { %s73_s17 = sshll.u32 %s2715_s16, 4  ;;  %s100_s3 = sshll.u32 %s2852_s8, 4  ;;  %s74_s17 = int_to_ptr.vmem [resolvable:$true] %s73_s17  ;;  %s101_s3 = int_to_ptr.hbm [resolvable:$true] %s100_s3 }
  0x14   :  { %79 = dma.hbm_to_vmem [thread:$0]  %s72_s0, 4096, %s74_s17, [#allocation9], %s2709_s26, %s2709_s26, %s2710_s4  }
  0x15   :  { %s2716_s20 = smov [#allocation13]  }
  0x16   :  { %s102_s21 = sshll.u32 %s2716_s20, 4  ;;  %s103_s21 = int_to_ptr.vmem [resolvable:$true] %s102_s21 }
  0x17   :  { %105 = dma.hbm_to_vmem [thread:$0]  %s101_s3, 64, %s103_s21, [#allocation12]  }
  0x18   :  { %2696 = dma.done.wait [#allocation3], 64  }
  0x19   :  { %2697 = vsyncadd [#allocation3], 4294967232 }
  0x1a   :  { %2698 = dma.done.wait [#allocation6], 1088  }
  0x1b   :  { %2699 = vsyncadd [#allocation6], 4294966208 }
  0x1c   :  { %2700 = dma.done.wait [#allocation9], 4112  }
  0x1d   :  { %2701 = vsyncadd [#allocation9], 4294963184 }
  0x1e   :  { %2702 = dma.done.wait [#allocation12], 16448  }
  0x1f   :  { %2703 = vsyncadd [#allocation12], 4294950848  ;;  %vm146_vm0 = vcmask 1043456   ;;  %v137_v0 = vld [vmem:[#allocation5] sm:$0xf]  ;;  %vm142_vm1 = vcmask 64512  }
  0x20   :  { %v135_v1 = vld [vmem:[#allocation2] sm:$0xf]  ;;  %v148_v3 = vsel %vm146_vm0, %v137_v0, 0  ;;  %v2310_v5 = vld [vmem:[#allocation7 + $0x30] sm:$0xff]  ;;  %v2309_v6 = vld [vmem:[#allocation7 + $0x28] sm:$0xff]  ;;  %vm1496_vm2 = vcmask 412672  }
  0x21   :  { %v2311_v2 = vld [vmem:[#allocation7 + $0x38] sm:$0xff]  ;;  %v136_v4 = vpack.c.bf16 %v135_v1, %v135_v1  ;;  %157 = vmatpush.bf16.msra.mxu0 %v148_v3  ;;  %v2308_v7 = vld [vmem:[#allocation7 + $0x20] sm:$0xff]  ;;  %v2306_v9 = vld [vmem:[#allocation7 + $0x10] sm:$0xff]  ;;  %vm1523_vm7 = vcmask 410624   ;;  %s1615_s25 = sshll.u32 %s2853_s9, 4  ;;  %s2718_s26 = smov 32   ;;  %s1616_s25 = int_to_ptr.hbm [resolvable:$true] %s1615_s25 }
  0x22   :  { %233 = vmatpush.bf16.msra.mxu1 %v2311_v2  ;;  %v2307_v8 = vld [vmem:[#allocation7 + $0x18] sm:$0xff]  ;;  %v2305_v10 = vld [vmem:[#allocation7 + $0x8] sm:$0xff]  ;;  %v2304_v11 = vld [vmem:[#allocation7] sm:$0xff]  ;;  %s2719_s4 = smov 2  }
  0x23   :  { %v1778_v12 = vld [vmem:[#allocation10 + $0xe0] sm:$0xf]  ;;  %v2342_v13 = vld [vmem:[#allocation10 + $0xec] sm:$0xf0]  ;;  %v2340_v14 = vld [vmem:[#allocation10 + $0xe4] sm:$0xf] }
  0x24   :  { %1631 = vmatmul.msk.bf16.vlgmr.msra.gmra.mxu0 %vm142_vm1, %v136_v4  ;;  %v1779_v15 = vor.u32 %v2342_v13, %v1778_v12  ;;  %v1780_v16 = vld [vmem:[#allocation10 + $0xf0] sm:$0xf0]  ;;  %v1786_v17 = vld [vmem:[#allocation10 + $0xe8] sm:$0xf]  ;;  %v2343_v18 = vld [vmem:[#allocation10 + $0xf4] sm:$0xf0] }
  0x25   :  { %v1783_v19 = vor.u32 %v2340_v14, %v1780_v16  ;;  %v1787_v20 = vor.u32 %v2343_v18, %v1786_v17  ;;  %v2341_v21 = vld [vmem:[#allocation10 + $0xec] sm:$0xf]  ;;  %v1788_v22 = vld [vmem:[#allocation10 + $0xf8] sm:$0xf0]  ;;  %v1762_v23 = vld [vmem:[#allocation10 + $0xc0] sm:$0xf] }
  0x26   :  { %234 = vmatpush.bf16.msra.mxu1 %v2310_v5  ;;  %450 = vmatpush.bf16.msra.mxu2 %v1779_v15  ;;  %v1791_v24 = vor.u32 %v2341_v21, %v1788_v22  ;;  %v2338_v25 = vld [vmem:[#allocation10 + $0xcc] sm:$0xf0]  ;;  %v2336_v26 = vld [vmem:[#allocation10 + $0xc4] sm:$0xf]  ;;  %v1764_v27 = vld [vmem:[#allocation10 + $0xd0] sm:$0xf0] }
  0x27   :  { %463 = vmatpush.bf16.msra.mxu3 %v1783_v19  ;;  %476 = vmatpush.bf16.msrb.mxu0 %v1787_v20  ;;  %v1763_v28 = vor.u32 %v2338_v25, %v1762_v23  ;;  %v1767_v29 = vor.u32 %v2336_v26, %v1764_v27  ;;  %v1770_v30 = vld [vmem:[#allocation10 + $0xc8] sm:$0xf]  ;;  %v2339_v31 = vld [vmem:[#allocation10 + $0xd4] sm:$0xf0]  ;;  %v2337_v32 = vld [vmem:[#allocation10 + $0xcc] sm:$0xf] }
  0x28   :  { %v1771_v33 = vor.u32 %v2339_v31, %v1770_v30  ;;  %v1772_v34 = vld [vmem:[#allocation10 + $0xd8] sm:$0xf0]  ;;  %v1746_v35 = vld [vmem:[#allocation10 + $0xa0] sm:$0xf]  ;;  %v2334_v36 = vld [vmem:[#allocation10 + $0xac] sm:$0xf0] }
  0x29   :  { %v1775_v37 = vor.u32 %v2337_v32, %v1772_v34  ;;  %v2332_v38 = vld [vmem:[#allocation10 + $0xa4] sm:$0xf]  ;;  %v1748_v39 = vld [vmem:[#allocation10 + $0xb0] sm:$0xf0]  ;;  %v1754_v40 = vld [vmem:[#allocation10 + $0xa8] sm:$0xf]  ;;  %v1747_v41 = vor.u32 %v2334_v36, %v1746_v35 }
  0x2a   :  { %235 = vmatpush.bf16.msra.mxu1 %v2309_v6  ;;  %451 = vmatpush.bf16.msra.mxu2 %v1763_v28  ;;  %v2335_v42 = vld [vmem:[#allocation10 + $0xb4] sm:$0xf0]  ;;  %v2333_v43 = vld [vmem:[#allocation10 + $0xac] sm:$0xf]  ;;  %v1756_v44 = vld [vmem:[#allocation10 + $0xb8] sm:$0xf0]  ;;  %v1751_v45 = vor.u32 %v2332_v38, %v1748_v39 }
  0x2b   :  { %464 = vmatpush.bf16.msra.mxu3 %v1767_v29  ;;  %477 = vmatpush.bf16.msrb.mxu0 %v1771_v33  ;;  %v1755_v46 = vor.u32 %v2335_v42, %v1754_v40  ;;  %v1730_v47 = vld [vmem:[#allocation10 + $0x80] sm:$0xf]  ;;  %v2330_v48 = vld [vmem:[#allocation10 + $0x8c] sm:$0xf0]  ;;  %v2328_v49 = vld [vmem:[#allocation10 + $0x84] sm:$0xf]  ;;  %v1759_v50 = vor.u32 %v2333_v43, %v1756_v44 }
  0x2c   :  { %v1732_v51 = vld [vmem:[#allocation10 + $0x90] sm:$0xf0]  ;;  %v1738_v52 = vld [vmem:[#allocation10 + $0x88] sm:$0xf]  ;;  %v2331_v53 = vld [vmem:[#allocation10 + $0x94] sm:$0xf0]  ;;  %v1731_v56 = vor.u32 %v2330_v48, %v1730_v47 }
  0x2d   :  { %v2329_v54 = vld [vmem:[#allocation10 + $0x8c] sm:$0xf]  ;;  %v1740_v55 = vld [vmem:[#allocation10 + $0x98] sm:$0xf0]  ;;  %v1735_v57 = vor.u32 %v2328_v49, %v1732_v51  ;;  %v1739_v58 = vor.u32 %v2331_v53, %v1738_v52  ;;  %v1714_v59 = vld [vmem:[#allocation10 + $0x60] sm:$0xf] }
  0x2e   :  { %236 = vmatpush.bf16.msra.mxu1 %v2308_v7  ;;  %452 = vmatpush.bf16.msra.mxu2 %v1747_v41  ;;  %v2326_v60 = vld [vmem:[#allocation10 + $0x6c] sm:$0xf0]  ;;  %v2324_v61 = vld [vmem:[#allocation10 + $0x64] sm:$0xf]  ;;  %v1743_v62 = vor.u32 %v2329_v54, %v1740_v55  ;;  %v1716_v63 = vld [vmem:[#allocation10 + $0x70] sm:$0xf0] }
  0x2f   :  { %465 = vmatpush.bf16.msra.mxu3 %v1751_v45  ;;  %478 = vmatpush.bf16.msrb.mxu0 %v1755_v46  ;;  %v1722_v0 = vld [vmem:[#allocation10 + $0x68] sm:$0xf]  ;;  %v2327_v1 = vld [vmem:[#allocation10 + $0x74] sm:$0xf0]  ;;  %v2325_v2 = vld [vmem:[#allocation10 + $0x6c] sm:$0xf]  ;;  %v1715_v4 = vor.u32 %v2326_v60, %v1714_v59  ;;  %v1719_v5 = vor.u32 %v2324_v61, %v1716_v63 }
  0x30   :  { %v1724_v3 = vld [vmem:[#allocation10 + $0x78] sm:$0xf0]  ;;  %v1723_v6 = vor.u32 %v2327_v1, %v1722_v0  ;;  %v1698_v7 = vld [vmem:[#allocation10 + $0x40] sm:$0xf]  ;;  %v1706_v12 = vld [vmem:[#allocation10 + $0x48] sm:$0xf] }
  0x31   :  { %v2323_v13 = vld [vmem:[#allocation10 + $0x54] sm:$0xf0]  ;;  %v2321_v14 = vld [vmem:[#allocation10 + $0x4c] sm:$0xf]  ;;  %v1708_v15 = vld [vmem:[#allocation10 + $0x58] sm:$0xf0] }
  0x32   :  { %237 = vmatpush.bf16.msra.mxu1 %v2307_v8  ;;  %453 = vmatpush.bf16.msra.mxu2 %v1731_v56  ;;  %v2322_v8 = vld [vmem:[#allocation10 + $0x4c] sm:$0xf0]  ;;  %v1707_v18 = vor.u32 %v2323_v13, %v1706_v12  ;;  %v2486_v19 = vld [vmem:[%s2846_s2] ss:$0 sm:$0xff]  ;;  %v1711_v20 = vor.u32 %v2321_v14, %v1708_v15  ;;  %v1682_v26 = vld [vmem:[#allocation10 + $0x20] sm:$0xf] }
  0x33   :  { %466 = vmatpush.bf16.msra.mxu3 %v1735_v57  ;;  %479 = vmatpush.bf16.msrb.mxu0 %v1739_v58  ;;  %v1699_v16 = vor.u32 %v2322_v8, %v1698_v7  ;;  %v2318_v27 = vld [vmem:[#allocation10 + $0x2c] sm:$0xf0]  ;;  %v2316_v28 = vld [vmem:[#allocation10 + $0x24] sm:$0xf]  ;;  %v1684_v30 = vld [vmem:[#allocation10 + $0x30] sm:$0xf0] }
  0x34   :  { %v1683_v29 = vor.u32 %v2318_v27, %v1682_v26  ;;  %v1690_v31 = vld [vmem:[#allocation10 + $0x28] sm:$0xf]  ;;  %v2319_v32 = vld [vmem:[#allocation10 + $0x34] sm:$0xf0]  ;;  %v1687_v33 = vor.u32 %v2316_v28, %v1684_v30  ;;  %v2317_v35 = vld [vmem:[#allocation10 + $0x2c] sm:$0xf] }
  0x35   :  { %v1691_v34 = vor.u32 %v2319_v32, %v1690_v31  ;;  %v1692_v36 = vld [vmem:[#allocation10 + $0x38] sm:$0xf0]  ;;  %v1666_v38 = vld [vmem:[#allocation10] sm:$0xf]  ;;  %v2314_v39 = vld [vmem:[#allocation10 + $0xc] sm:$0xf0] }
  0x36   :  { %238 = vmatpush.bf16.msra.mxu1 %v2306_v9  ;;  %v2320_v9 = vld [vmem:[#allocation10 + $0x44] sm:$0xf]  ;;  %454 = vmatpush.bf16.msra.mxu2 %v1715_v4  ;;  %v1667_v41 = vor.u32 %v2314_v39, %v1666_v38  ;;  %v1668_v42 = vld [vmem:[#allocation10 + $0x10] sm:$0xf0]  ;;  %v1674_v43 = vld [vmem:[#allocation10 + $0x8] sm:$0xf] }
  0x37   :  { %467 = vmatpush.bf16.msra.mxu3 %v1719_v5  ;;  %480 = vmatpush.bf16.msrb.mxu0 %v1723_v6  ;;  %v2312_v40 = vld [vmem:[#allocation10 + $0x4] sm:$0xf]  ;;  %v2315_v44 = vld [vmem:[#allocation10 + $0x14] sm:$0xf0]  ;;  %v2313_v47 = vld [vmem:[#allocation10 + $0xc] sm:$0xf] }
  0x38   :  { %v1671_v45 = vor.u32 %v2312_v40, %v1668_v42  ;;  %v1675_v46 = vor.u32 %v2315_v44, %v1674_v43  ;;  %v1676_v48 = vld [vmem:[#allocation10 + $0x18] sm:$0xf0]  ;;  %v2438_v51 = vld [vmem:[#allocation11 + $0x2ec] sm:$0xf0]  ;;  %v2290_v52 = vld [vmem:[#allocation11 + $0x3e0] sm:$0xf] }
  0x39   :  { %v1679_v49 = vor.u32 %v2313_v47, %v1676_v48  ;;  %v2470_v54 = vld [vmem:[#allocation11 + $0x3ec] sm:$0xf0]  ;;  %v2146_v55 = vld [vmem:[#allocation11 + $0x2c0] sm:$0xf] }
  0x3a   :  { %239 = vmatpush.bf16.msra.mxu1 %v2305_v10  ;;  %v1727_v10 = vor.u32 %v2325_v2, %v1724_v3  ;;  %455 = vmatpush.bf16.msra.mxu2 %v1699_v16  ;;  %v2434_v56 = vld [vmem:[#allocation11 + $0x2cc] sm:$0xf0]  ;;  %v2291_v57 = vor.u32 %v2470_v54, %v2290_v52  ;;  %v2274_v58 = vld [vmem:[#allocation11 + $0x3c0] sm:$0xf] }
  0x3b   :  { %481 = vmatpush.bf16.msrb.mxu0 %v1707_v18  ;;  %v2466_v59 = vld [vmem:[#allocation11 + $0x3cc] sm:$0xf0]  ;;  %v1906_v60 = vld [vmem:[#allocation11 + $0xe0] sm:$0xf]  ;;  %v2147_v61 = vor.u32 %v2434_v56, %v2146_v55 }
  0x3c   :  { %v2034_v63 = vld [vmem:[#allocation11 + $0x1e0] sm:$0xf]  ;;  %v2406_v0 = vld [vmem:[#allocation11 + $0x1ec] sm:$0xf0]  ;;  %v2275_v1 = vor.u32 %v2466_v59, %v2274_v58  ;;  %v2487_v58 = vld [vmem:[#allocation8] ss:$0 sm:$0xff] }
  0x3d   :  { %v2035_v3 = vor.u32 %v2406_v0, %v2034_v63  ;;  %v2130_v4 = vld [vmem:[#allocation11 + $0x2a0] sm:$0xf]  ;;  %v2430_v5 = vld [vmem:[#allocation11 + $0x2ac] sm:$0xf0] }
  0x3e   :  { %240 = vmatpush.bf16.msra.mxu1 %v2304_v11  ;;  %v1700_v11 = vld [vmem:[#allocation10 + $0x50] sm:$0xf0]  ;;  %456 = vmatpush.bf16.msra.mxu2 %v1683_v29  ;;  %v2258_v6 = vld [vmem:[#allocation11 + $0x3a0] sm:$0xf]  ;;  %v2462_v7 = vld [vmem:[#allocation11 + $0x3ac] sm:$0xf0]  ;;  %v2131_v13 = vor.u32 %v2430_v5, %v2130_v4 }
  0x3f   :  { %v1703_v17 = vor.u32 %v2320_v9, %v1700_v11  ;;  %482 = vmatpush.bf16.msrb.mxu0 %v1691_v34  ;;  %v1890_v8 = vld [vmem:[#allocation11 + $0xc0] sm:$0xf]  ;;  %v2370_v9 = vld [vmem:[#allocation11 + $0xcc] sm:$0xf0] }
  0x40   :  { %v2018_v11 = vld [vmem:[#allocation11 + $0x1c0] sm:$0xf]  ;;  %v2402_v12 = vld [vmem:[#allocation11 + $0x1cc] sm:$0xf0] }
  0x41   :  { %468 = vmatpush.bf16.msra.mxu3 %v1703_v17  ;;  %v2019_v14 = vor.u32 %v2402_v12, %v2018_v11  ;;  %v2114_v15 = vld [vmem:[#allocation11 + $0x280] sm:$0xf]  ;;  %v2426_v16 = vld [vmem:[#allocation11 + $0x28c] sm:$0xf0]  ;;  %v2259_v17 = vor.u32 %v2462_v7, %v2258_v6  ;;  %v2436_v11 = vld [vmem:[#allocation11 + $0x2e4] sm:$0xf] }
  0x42   :  { %489 = vmatpush.bf16.msrb.mxu1 %v1791_v24  ;;  %457 = vmatpush.bf16.msra.mxu2 %v1667_v41  ;;  %v1874_v18 = vld [vmem:[#allocation11 + $0xa0] sm:$0xf]  ;;  %v2115_v27 = vor.u32 %v2426_v16, %v2114_v15  ;;  %v2362_v28 = vld [vmem:[#allocation11 + $0x8c] sm:$0xf0]  ;;  %v2164_v12 = vld [vmem:[#allocation11 + $0x2f0] sm:$0xf0] }
  0x43   :  { %483 = vmatpush.bf16.msrb.mxu0 %v1675_v46  ;;  %v1858_v26 = vld [vmem:[#allocation11 + $0x80] sm:$0xf]  ;;  %v2394_v30 = vld [vmem:[#allocation11 + $0x18c] sm:$0xf0] }
  0x44   :  { %v1986_v29 = vld [vmem:[#allocation11 + $0x180] sm:$0xf]  ;;  %v2358_v40 = vld [vmem:[#allocation11 + $0x6c] sm:$0xf0] }
  0x45   :  { %469 = vmatpush.bf16.msra.mxu3 %v1687_v33  ;;  %v2098_v32 = vld [vmem:[#allocation11 + $0x260] sm:$0xf]  ;;  %v2422_v33 = vld [vmem:[#allocation11 + $0x26c] sm:$0xf0] }
  0x46   :  { %490 = vmatpush.bf16.msrb.mxu1 %v1775_v37  ;;  %v1695_v37 = vor.u32 %v2317_v35, %v1692_v36  ;;  %v2226_v34 = vld [vmem:[#allocation11 + $0x360] sm:$0xf]  ;;  %v2454_v35 = vld [vmem:[#allocation11 + $0x36c] sm:$0xf0]  ;;  %v1859_v36 = vor.u32 %v2362_v28, %v1858_v26  ;;  %v2099_v39 = vor.u32 %v2422_v33, %v2098_v32  ;;  %v1908_v26 = vld [vmem:[#allocation11 + $0xf0] sm:$0xf0] }
  0x47   :  { %v1842_v38 = vld [vmem:[#allocation11 + $0x60] sm:$0xf]  ;;  %v2390_v42 = vld [vmem:[#allocation11 + $0x16c] sm:$0xf0]  ;;  %v2227_v43 = vor.u32 %v2454_v35, %v2226_v34  ;;  %v2036_v28 = vld [vmem:[#allocation11 + $0x1f0] sm:$0xf0] }
  0x48   :  { %v1970_v41 = vld [vmem:[#allocation11 + $0x160] sm:$0xf]  ;;  %v2450_v47 = vld [vmem:[#allocation11 + $0x34c] sm:$0xf0]  ;;  %v1843_v48 = vor.u32 %v2358_v40, %v1842_v38  ;;  %v2148_v32 = vld [vmem:[#allocation11 + $0x2d0] sm:$0xf0] }
  0x49   :  { %470 = vmatpush.bf16.msra.mxu3 %v1671_v45  ;;  %v2082_v44 = vld [vmem:[#allocation11 + $0x240] sm:$0xf]  ;;  %v2418_v45 = vld [vmem:[#allocation11 + $0x24c] sm:$0xf0]  ;;  %v2464_v33 = vld [vmem:[#allocation11 + $0x3c4] sm:$0xf] }
  0x4a   :  { %491 = vmatpush.bf16.msrb.mxu1 %v1759_v50  ;;  %v2162_v50 = vld [vmem:[#allocation11 + $0x2e0] sm:$0xf]  ;;  %v2354_v52 = vld [vmem:[#allocation11 + $0x4c] sm:$0xf0]  ;;  %v2276_v34 = vld [vmem:[#allocation11 + $0x3d0] sm:$0xf0] }
  0x4b   :  { %v2163_v53 = vor.u32 %v2438_v51, %v2162_v50  ;;  %v2210_v46 = vld [vmem:[#allocation11 + $0x340] sm:$0xf]  ;;  %v2083_v51 = vor.u32 %v2418_v45, %v2082_v44  ;;  %v2386_v54 = vld [vmem:[#allocation11 + $0x14c] sm:$0xf0]  ;;  %v2368_v40 = vld [vmem:[#allocation11 + $0xc4] sm:$0xf]  ;;  %v2279_v45 = vor.u32 %v2464_v33, %v2276_v34 }
  0x4c   :  { %v1826_v50 = vld [vmem:[#allocation11 + $0x40] sm:$0xf]  ;;  %v2211_v55 = vor.u32 %v2450_v47, %v2210_v46  ;;  %v2410_v7 = vld [vmem:[#allocation11 + $0x20c] sm:$0xf0]  ;;  %v2428_v46 = vld [vmem:[#allocation11 + $0x2a4] sm:$0xf] }
  0x4d   :  { %1314 = vmatpush.bf16.msra.mxu0 %v2163_v53  ;;  %1301 = vmatpush.bf16.msrb.mxu3 %v2035_v3  ;;  %v1954_v53 = vld [vmem:[#allocation11 + $0x140] sm:$0xf]  ;;  %v2382_v3 = vld [vmem:[#allocation11 + $0x12c] sm:$0xf0]  ;;  %v2132_v47 = vld [vmem:[#allocation11 + $0x2b0] sm:$0xf0] }
  0x4e   :  { %492 = vmatpush.bf16.msrb.mxu1 %v1743_v62  ;;  %v2374_v62 = vld [vmem:[#allocation11 + $0xec] sm:$0xf0]  ;;  %v2066_v56 = vld [vmem:[#allocation11 + $0x220] sm:$0xf]  ;;  %v1828_v33 = vld [vmem:[#allocation11 + $0x50] sm:$0xf0] }
  0x4f   :  { %v1907_v2 = vor.u32 %v2374_v62, %v1906_v60  ;;  %v2194_v59 = vld [vmem:[#allocation11 + $0x320] sm:$0xf]  ;;  %v2446_v60 = vld [vmem:[#allocation11 + $0x32c] sm:$0xf0]  ;;  %v1955_v62 = vor.u32 %v2386_v54, %v1954_v53  ;;  %v1876_v53 = vld [vmem:[#allocation11 + $0xb0] sm:$0xf0] }
  0x50   :  { %v1810_v63 = vld [vmem:[#allocation11 + $0x20] sm:$0xf]  ;;  %v2195_v5 = vor.u32 %v2446_v60, %v2194_v59  ;;  %v2396_v54 = vld [vmem:[#allocation11 + $0x1a4] sm:$0xf]  ;;  %v2116_v59 = vld [vmem:[#allocation11 + $0x290] sm:$0xf0] }
  0x51   :  { %1288 = vmatpush.bf16.msrb.mxu2 %v1907_v2  ;;  %1315 = vmatpush.bf16.msra.mxu0 %v2147_v61  ;;  %v1827_v61 = vor.u32 %v2354_v52, %v1826_v50  ;;  %v1938_v2 = vld [vmem:[#allocation11 + $0x120] sm:$0xf]  ;;  %v2364_v52 = vld [vmem:[#allocation11 + $0xa4] sm:$0xf] }
  0x52   :  { %493 = vmatpush.bf16.msrb.mxu1 %v1727_v10  ;;  %v1891_v10 = vor.u32 %v2370_v9, %v1890_v8  ;;  %1302 = vmatpush.bf16.msrb.mxu3 %v2019_v14  ;;  %v2050_v6 = vld [vmem:[#allocation11 + $0x200] sm:$0xf]  ;;  %v2292_v14 = vld [vmem:[#allocation11 + $0x3f0] sm:$0xf0]  ;;  %v1939_v16 = vor.u32 %v2382_v3, %v1938_v2  ;;  %v2456_v60 = vld [vmem:[#allocation11 + $0x384] sm:$0xf] }
  0x53   :  { %v2178_v9 = vld [vmem:[#allocation11 + $0x300] sm:$0xf]  ;;  %v2392_v2 = vld [vmem:[#allocation11 + $0x184] sm:$0xf]  ;;  %v1988_v3 = vld [vmem:[#allocation11 + $0x190] sm:$0xf0] }
  0x54   :  { %v2384_v34 = vld [vmem:[#allocation11 + $0x144] sm:$0xf] }
  0x55   :  { %1289 = vmatpush.bf16.msrb.mxu2 %v1891_v10  ;;  %1316 = vmatpush.bf16.msra.mxu0 %v2131_v13  ;;  %v2442_v10 = vld [vmem:[#allocation11 + $0x30c] sm:$0xf0]  ;;  %v2468_v13 = vld [vmem:[#allocation11 + $0x3e4] sm:$0xf] }
  0x56   :  { %494 = vmatpush.bf16.msrb.mxu1 %v1711_v20  ;;  %v2002_v20 = vld [vmem:[#allocation11 + $0x1a0] sm:$0xf] }
  0x59   :  { %1317 = vmatpush.bf16.msra.mxu0 %v2115_v27  ;;  %v2404_v27 = vld [vmem:[#allocation11 + $0x1e4] sm:$0xf] }
  0x5a   :  { %495 = vmatpush.bf16.msrb.mxu1 %v1695_v37  ;;  %v1987_v37 = vor.u32 %v2394_v30, %v1986_v29  ;;  %v2167_v29 = vor.u32 %v2436_v11, %v2164_v12  ;;  %v2295_v30 = vor.u32 %v2468_v13, %v2292_v14  ;;  %v1991_v11 = vor.u32 %v2392_v2, %v1988_v3  ;;  %v2416_v14 = vld [vmem:[#allocation11 + $0x244] sm:$0xf]  ;;  %v2471_v2 = vld [vmem:[#allocation11 + $0x3f4] sm:$0xf0] }
  0x5d   :  { %1318 = vmatpush.bf16.msra.mxu0 %v2099_v39  ;;  %v2039_v39 = vor.u32 %v2404_v27, %v2036_v28  ;;  %v2068_v27 = vld [vmem:[#allocation11 + $0x230] sm:$0xf0] }
  0x5e   :  { %496 = vmatpush.bf16.msrb.mxu1 %v1679_v49  ;;  %v1971_v49 = vor.u32 %v2390_v42, %v1970_v41  ;;  %v1892_v41 = vld [vmem:[#allocation11 + $0xd0] sm:$0xf0]  ;;  %v2400_v42 = vld [vmem:[#allocation11 + $0x1c4] sm:$0xf] }
  0x5f   :  { %v1895_v50 = vor.u32 %v2368_v40, %v1892_v41  ;;  %v2440_v40 = vld [vmem:[#allocation11 + $0x304] sm:$0xf] }
  0x61   :  { %1319 = vmatpush.bf16.msra.mxu0 %v2083_v51 }
  0xa1   :  { %v159_v21 = vpop.f32.mrf.mxu0 }
  0xa2   :  { %v160_v22 = vadd.f32 %v2486_v19, %v159_v21  ;;  %v2366_v19 = vld [vmem:[#allocation11 + $0xac] sm:$0xf0]  ;;  %v2242_v21 = vld [vmem:[#allocation11 + $0x380] sm:$0xf] }
  0xa4   :  { %v163_v23 = vmax.f32 %v160_v22, 0.0  ;;  %v2458_v22 = vld [vmem:[#allocation11 + $0x38c] sm:$0xf0] }
  0xa5   :  { %v2243_v31 = vor.u32 %v2458_v22, %v2242_v21  ;;  %v2378_v21 = vld [vmem:[#allocation11 + $0x10c] sm:$0xf0]  ;;  %v2372_v22 = vld [vmem:[#allocation11 + $0xe4] sm:$0xf] }
  0xa6   :  { %v164_v24 = vpack.c.bf16 %v163_v23, %v163_v23  ;;  %v2398_v23 = vld [vmem:[#allocation11 + $0x1ac] sm:$0xf0]  ;;  %v1911_v38 = vor.u32 %v2372_v22, %v1908_v26  ;;  %v2388_v22 = vld [vmem:[#allocation11 + $0x164] sm:$0xf] }
  0xa7   :  { %v2412_v26 = vld [vmem:[#allocation11 + $0x224] sm:$0xf] }
  0xa8   :  { %241 = vmatmul.bf16.vlgmr.msra.gmra.mxu1 %v164_v24  ;;  %v1875_v24 = vor.u32 %v2366_v19, %v1874_v18  ;;  %v1794_v18 = vld [vmem:[#allocation11] sm:$0xf]  ;;  %v2346_v19 = vld [vmem:[#allocation11 + $0xc] sm:$0xf0]  ;;  %v2071_v28 = vor.u32 %v2412_v26, %v2068_v27 }
  0xa9   :  { %v161_v25 = vpop.f32.mrf.mxu0  ;;  %1327 = vmatpush.bf16.msra.mxu1 %v2291_v57  ;;  %v2414_v57 = vld [vmem:[#allocation11 + $0x22c] sm:$0xf0]  ;;  %v1795_v35 = vor.u32 %v2346_v19, %v1794_v18 }
  0xaa   :  { %v2003_v25 = vor.u32 %v2398_v23, %v2002_v20  ;;  %1290 = vmatpush.bf16.msrb.mxu2 %v1875_v24  ;;  %v2067_v0 = vor.u32 %v2414_v57, %v2066_v56  ;;  %v1922_v20 = vld [vmem:[#allocation11 + $0x100] sm:$0xf]  ;;  %v2051_v24 = vor.u32 %v2410_v7, %v2050_v6  ;;  %v2135_v56 = vor.u32 %v2428_v46, %v2132_v47  ;;  %v2420_v6 = vld [vmem:[#allocation11 + $0x264] sm:$0xf]  ;;  %v2100_v7 = vld [vmem:[#allocation11 + $0x270] sm:$0xf0] }
  0xab   :  { %v2103_v12 = vor.u32 %v2420_v6, %v2100_v7  ;;  %v2380_v46 = vld [vmem:[#allocation11 + $0x124] sm:$0xf] }
  0xac   :  { %1303 = vmatpush.bf16.msrb.mxu3 %v2003_v25  ;;  %1320 = vmatpush.bf16.msra.mxu0 %v2067_v0  ;;  %v2179_v25 = vor.u32 %v2442_v10, %v2178_v9  ;;  %v2360_v0 = vld [vmem:[#allocation11 + $0x84] sm:$0xf]  ;;  %v2228_v9 = vld [vmem:[#allocation11 + $0x370] sm:$0xf0] }
  0xad   :  { %1328 = vmatpush.bf16.msra.mxu1 %v2275_v1  ;;  %v2350_v1 = vld [vmem:[#allocation11 + $0x2c] sm:$0xf0] }
  0xae   :  { %1291 = vmatpush.bf16.msrb.mxu2 %v1859_v36  ;;  %v1811_v15 = vor.u32 %v2350_v1, %v1810_v63  ;;  %v1923_v36 = vor.u32 %v2378_v21, %v1922_v20  ;;  %v1860_v1 = vld [vmem:[#allocation11 + $0x90] sm:$0xf0]  ;;  %v2356_v20 = vld [vmem:[#allocation11 + $0x64] sm:$0xf] }
  0xaf   :  { %v1863_v10 = vor.u32 %v2360_v0, %v1860_v1  ;;  %v1844_v21 = vld [vmem:[#allocation11 + $0x70] sm:$0xf0]  ;;  %v2439_v0 = vld [vmem:[#allocation11 + $0x2f4] sm:$0xf0]  ;;  %v2298_v1 = vld [vmem:[#allocation11 + $0x3e8] sm:$0xf] }
  0xb0   :  { %1304 = vmatpush.bf16.msrb.mxu3 %v1987_v37  ;;  %1321 = vmatpush.bf16.msra.mxu0 %v2051_v24  ;;  %v1972_v24 = vld [vmem:[#allocation11 + $0x170] sm:$0xf0] }
  0xb1   :  { %1329 = vmatpush.bf16.msra.mxu1 %v2259_v17 }
  0xb2   :  { %1292 = vmatpush.bf16.msrb.mxu2 %v1843_v48  ;;  %v2460_v48 = vld [vmem:[#allocation11 + $0x3a4] sm:$0xf] }
  0xb4   :  { %1305 = vmatpush.bf16.msrb.mxu3 %v1971_v49  ;;  %v2260_v49 = vld [vmem:[#allocation11 + $0x3b0] sm:$0xf0] }
  0xb5   :  { %1330 = vmatpush.bf16.msra.mxu1 %v2243_v31  ;;  %v2432_v31 = vld [vmem:[#allocation11 + $0x2c4] sm:$0xf]  ;;  %v2263_v57 = vor.u32 %v2460_v48, %v2260_v49  ;;  %v1940_v48 = vld [vmem:[#allocation11 + $0x130] sm:$0xf0] }
  0xb6   :  { %1293 = vmatpush.bf16.msrb.mxu2 %v1827_v61  ;;  %v2151_v44 = vor.u32 %v2432_v31, %v2148_v32  ;;  %v2244_v61 = vld [vmem:[#allocation11 + $0x390] sm:$0xf0]  ;;  %v2352_v32 = vld [vmem:[#allocation11 + $0x44] sm:$0xf]  ;;  %v1943_v49 = vor.u32 %v2380_v46, %v1940_v48  ;;  %v2427_v46 = vld [vmem:[#allocation11 + $0x294] sm:$0xf0] }
  0xb7   :  { %v2459_v48 = vld [vmem:[#allocation11 + $0x394] sm:$0xf0] }
  0xb8   :  { %1306 = vmatpush.bf16.msrb.mxu3 %v1955_v62  ;;  %v1879_v62 = vor.u32 %v2364_v52, %v1876_v53  ;;  %v2376_v53 = vld [vmem:[#allocation11 + $0x104] sm:$0xf] }
  0xb9   :  { %1331 = vmatpush.bf16.msra.mxu1 %v2227_v43  ;;  %v2020_v43 = vld [vmem:[#allocation11 + $0x1d0] sm:$0xf0] }
  0xba   :  { %1294 = vmatpush.bf16.msrb.mxu2 %v1811_v15  ;;  %v2023_v51 = vor.u32 %v2400_v42, %v2020_v43  ;;  %v2084_v15 = vld [vmem:[#allocation11 + $0x250] sm:$0xf0] }
  0xbb   :  { %v2087_v18 = vor.u32 %v2416_v14, %v2084_v15  ;;  %v2180_v42 = vld [vmem:[#allocation11 + $0x310] sm:$0xf0]  ;;  %v2435_v14 = vld [vmem:[#allocation11 + $0x2d4] sm:$0xf0]  ;;  %v2282_v15 = vld [vmem:[#allocation11 + $0x3c8] sm:$0xf] }
  0xbc   :  { %1307 = vmatpush.bf16.msrb.mxu3 %v1939_v16  ;;  %v2448_v16 = vld [vmem:[#allocation11 + $0x344] sm:$0xf]  ;;  %v2183_v43 = vor.u32 %v2440_v40, %v2180_v42  ;;  %v2403_v40 = vld [vmem:[#allocation11 + $0x1d4] sm:$0xf0] }
  0xbd   :  { %1332 = vmatpush.bf16.msra.mxu1 %v2211_v55  ;;  %v2004_v55 = vld [vmem:[#allocation11 + $0x1b0] sm:$0xf0] }
  0xbe   :  { %1295 = vmatpush.bf16.msrb.mxu2 %v1795_v35  ;;  %v2007_v63 = vor.u32 %v2396_v54, %v2004_v55  ;;  %v1831_v35 = vor.u32 %v2352_v32, %v1828_v33  ;;  %v1924_v54 = vld [vmem:[#allocation11 + $0x110] sm:$0xf0]  ;;  %v2463_v32 = vld [vmem:[#allocation11 + $0x3b4] sm:$0xf0] }
  0xbf   :  { %v1927_v55 = vor.u32 %v2376_v53, %v1924_v54  ;;  %v2010_v53 = vld [vmem:[#allocation11 + $0x1a8] sm:$0xf]  ;;  %v2399_v54 = vld [vmem:[#allocation11 + $0x1b4] sm:$0xf0] }
  0xc0   :  { %1308 = vmatpush.bf16.msrb.mxu3 %v1923_v36  ;;  %v1956_v36 = vld [vmem:[#allocation11 + $0x150] sm:$0xf0] }
  0xc1   :  { %1333 = vmatpush.bf16.msra.mxu1 %v2195_v5  ;;  %v2247_v5 = vor.u32 %v2456_v60, %v2244_v61  ;;  %v2170_v61 = vld [vmem:[#allocation11 + $0x2e8] sm:$0xf] }
  0xc2   :  { %v2171_v7 = vor.u32 %v2439_v0, %v2170_v61  ;;  %v2363_v0 = vld [vmem:[#allocation11 + $0x94] sm:$0xf0] }
  0xc5   :  { %1334 = vmatpush.bf16.msra.mxu1 %v2179_v25  ;;  %v1975_v25 = vor.u32 %v2388_v22, %v1972_v24  ;;  %v2407_v22 = vld [vmem:[#allocation11 + $0x1f4] sm:$0xf0] }
 0x125   :  { %v242_v4 = vpop.f32.mrf.mxu1 }
 0x126   :  { %v243_v8 = vadd.f32 %v2487_v58, %v242_v4  ;;  %v2424_v58 = vld [vmem:[#allocation11 + $0x284] sm:$0xf] }
 0x127   :  { %v2119_v4 = vor.u32 %v2424_v58, %v2116_v59 }
 0x128   :  { %v246_v17 = vmax.f32 %v243_v8, 0.0  ;;  %v2452_v8 = vld [vmem:[#allocation11 + $0x364] sm:$0xf] }
 0x129   :  { %v2231_v13 = vor.u32 %v2452_v8, %v2228_v9  ;;  %v2299_v8 = vor.u32 %v2471_v2, %v2298_v1  ;;  %v2154_v9 = vld [vmem:[#allocation11 + $0x2c8] sm:$0xf]  ;;  %v2395_v2 = vld [vmem:[#allocation11 + $0x194] sm:$0xf0] }
 0x12a   :  { %v247_v23 = vpack.c.bf16 %v246_v17, %v246_v17  ;;  %v2212_v17 = vld [vmem:[#allocation11 + $0x350] sm:$0xf0]  ;;  %v2155_v27 = vor.u32 %v2435_v14, %v2154_v9  ;;  %v1994_v1 = vld [vmem:[#allocation11 + $0x188] sm:$0xf]  ;;  %v2359_v14 = vld [vmem:[#allocation11 + $0x74] sm:$0xf0] }
 0x12b   :  { %v2215_v19 = vor.u32 %v2448_v16, %v2212_v17  ;;  %v2467_v16 = vld [vmem:[#allocation11 + $0x3d4] sm:$0xf0] }
 0x12c   :  { %458 = vmatmul.bf16.vlgmr.msra.gmra.mxu2 %v247_v23  ;;  %471 = vmatmul.bf16.vlgmr.msra.gmra.mxu3 %v247_v23 }
 0x12d   :  { %484 = vmatmul.bf16.vlgmr.msrb.gmra.mxu0 %v247_v23  ;;  %497 = vmatmul.bf16.vlgmr.msrb.gmra.mxu1 %v247_v23  ;;  %v244_v37 = vpop.f32.mrf.mxu1  ;;  %v1847_v23 = vor.u32 %v2356_v20, %v1844_v21  ;;  %v2375_v20 = vld [vmem:[#allocation11 + $0xf4] sm:$0xf0]  ;;  %v2042_v21 = vld [vmem:[#allocation11 + $0x1e8] sm:$0xf] }
 0x12e   :  { %1366 = vmatpush.bf16.msrb.mxu0 %v2167_v29  ;;  %1379 = vmatpush.bf16.msrb.mxu1 %v2295_v30  ;;  %v2444_v29 = vld [vmem:[#allocation11 + $0x324] sm:$0xf]  ;;  %v2196_v30 = vld [vmem:[#allocation11 + $0x330] sm:$0xf0]  ;;  %v1959_v37 = vor.u32 %v2384_v34, %v1956_v36  ;;  %v2043_v36 = vor.u32 %v2407_v22, %v2042_v21  ;;  %v2202_v21 = vld [vmem:[#allocation11 + $0x328] sm:$0xf] }
 0x12f   :  { %1340 = vmatpush.bf16.msra.mxu2 %v1911_v38  ;;  %1353 = vmatpush.bf16.msra.mxu3 %v2039_v39  ;;  %v2199_v31 = vor.u32 %v2444_v29, %v2196_v30  ;;  %v2408_v38 = vld [vmem:[#allocation11 + $0x204] sm:$0xf]  ;;  %v2052_v39 = vld [vmem:[#allocation11 + $0x210] sm:$0xf0]  ;;  %v2138_v29 = vld [vmem:[#allocation11 + $0x2a8] sm:$0xf] }
 0x130   :  { %v2055_v41 = vor.u32 %v2408_v38, %v2052_v39  ;;  %v2431_v30 = vld [vmem:[#allocation11 + $0x2b4] sm:$0xf0]  ;;  %v2026_v39 = vld [vmem:[#allocation11 + $0x1c8] sm:$0xf] }
 0x131   :  { %v2371_v38 = vld [vmem:[#allocation11 + $0xd4] sm:$0xf0] }
 0x132   :  { %1367 = vmatpush.bf16.msrb.mxu0 %v2151_v44  ;;  %1380 = vmatpush.bf16.msrb.mxu1 %v2279_v45  ;;  %v2348_v44 = vld [vmem:[#allocation11 + $0x24] sm:$0xf]  ;;  %v1812_v45 = vld [vmem:[#allocation11 + $0x30] sm:$0xf0]  ;;  %v2447_v22 = vld [vmem:[#allocation11 + $0x334] sm:$0xf0] }
 0x133   :  { %1341 = vmatpush.bf16.msra.mxu2 %v1895_v50  ;;  %1354 = vmatpush.bf16.msra.mxu3 %v2023_v51  ;;  %v1815_v47 = vor.u32 %v2348_v44, %v1812_v45  ;;  %v2344_v50 = vld [vmem:[#allocation11 + $0x4] sm:$0xf]  ;;  %v1796_v51 = vld [vmem:[#allocation11 + $0x10] sm:$0xf0] }
 0x134   :  { %v1799_v52 = vor.u32 %v2344_v50, %v1796_v51  ;;  %v2027_v50 = vor.u32 %v2403_v40, %v2026_v39  ;;  %v1882_v51 = vld [vmem:[#allocation11 + $0xa8] sm:$0xf] }
 0x136   :  { %1368 = vmatpush.bf16.msrb.mxu0 %v2135_v56  ;;  %1381 = vmatpush.bf16.msrb.mxu1 %v2263_v57  ;;  %v280_v56 = vld [vmem:[%s2850_s6] sm:$0xf]  ;;  %s2717_s6 = smov [#allocation14]  }
 0x137   :  { %1342 = vmatpush.bf16.msra.mxu2 %v1879_v62  ;;  %1355 = vmatpush.bf16.msra.mxu3 %v2007_v63  ;;  %v284_v57 = vperm.slane %v280_v56, 2  ;;  %v285_v58 = vperm.slane %v280_v56, 3  ;;  %v282_v3 = vperm.slane %v280_v56, 0  ;;  %s1613_s22 = sshll.u32 %s2717_s6, 4  ;;  %s1614_s22 = int_to_ptr.vmem [resolvable:$true] %s1613_s22 }
 0x13a   :  { %1369 = vmatpush.bf16.msrb.mxu0 %v2119_v4  ;;  %1382 = vmatpush.bf16.msrb.mxu1 %v2247_v5  ;;  %v283_v4 = vperm.slane %v280_v56, 1 }
 0x13b   :  { %1343 = vmatpush.bf16.msra.mxu2 %v1863_v10  ;;  %1356 = vmatpush.bf16.msra.mxu3 %v1991_v11 }
 0x13e   :  { %1370 = vmatpush.bf16.msrb.mxu0 %v2103_v12  ;;  %1383 = vmatpush.bf16.msrb.mxu1 %v2231_v13 }
 0x13f   :  { %1344 = vmatpush.bf16.msra.mxu2 %v1847_v23  ;;  %1357 = vmatpush.bf16.msra.mxu3 %v1975_v25 }
 0x142   :  { %1371 = vmatpush.bf16.msrb.mxu0 %v2087_v18  ;;  %1384 = vmatpush.bf16.msrb.mxu1 %v2215_v19  ;;  %v1914_v19 = vld [vmem:[#allocation11 + $0xe8] sm:$0xf] }
 0x143   :  { %1345 = vmatpush.bf16.msra.mxu2 %v1831_v35  ;;  %1358 = vmatpush.bf16.msra.mxu3 %v1959_v37  ;;  %v1915_v35 = vor.u32 %v2375_v20, %v1914_v19  ;;  %v1898_v37 = vld [vmem:[#allocation11 + $0xc8] sm:$0xf]  ;;  %v2415_v20 = vld [vmem:[#allocation11 + $0x234] sm:$0xf0] }
 0x144   :  { %v2074_v19 = vld [vmem:[#allocation11 + $0x228] sm:$0xf] }
 0x146   :  { %1372 = vmatpush.bf16.msrb.mxu0 %v2071_v28  ;;  %1385 = vmatpush.bf16.msrb.mxu1 %v2199_v31  ;;  %v2283_v28 = vor.u32 %v2467_v16, %v2282_v15  ;;  %v2266_v31 = vld [vmem:[#allocation11 + $0x3a8] sm:$0xf]  ;;  %v2391_v16 = vld [vmem:[#allocation11 + $0x174] sm:$0xf0] }
 0x147   :  { %1346 = vmatpush.bf16.msra.mxu2 %v1815_v47  ;;  %1359 = vmatpush.bf16.msra.mxu3 %v1943_v49  ;;  %v2267_v42 = vor.u32 %v2463_v32, %v2266_v31  ;;  %v2250_v47 = vld [vmem:[#allocation11 + $0x388] sm:$0xf]  ;;  %v1899_v49 = vor.u32 %v2371_v38, %v1898_v37  ;;  %v2411_v32 = vld [vmem:[#allocation11 + $0x214] sm:$0xf0]  ;;  %v2437_v37 = vld [vmem:[#allocation11 + $0x2ec] sm:$0xf] }
 0x148   :  { %v2251_v56 = vor.u32 %v2459_v48, %v2250_v47  ;;  %v1978_v15 = vld [vmem:[#allocation11 + $0x168] sm:$0xf]  ;;  %v2172_v38 = vld [vmem:[#allocation11 + $0x2f8] sm:$0xf0] }
 0x149   :  { %v2058_v31 = vld [vmem:[#allocation11 + $0x208] sm:$0xf] }
 0x14a   :  { %1373 = vmatpush.bf16.msrb.mxu0 %v2055_v41  ;;  %1386 = vmatpush.bf16.msrb.mxu1 %v2183_v43  ;;  %v2139_v41 = vor.u32 %v2431_v30, %v2138_v29  ;;  %v2122_v43 = vld [vmem:[#allocation11 + $0x288] sm:$0xf]  ;;  %v2075_v29 = vor.u32 %v2415_v20, %v2074_v19  ;;  %v2203_v30 = vor.u32 %v2447_v22, %v2202_v21  ;;  %v2425_v19 = vld [vmem:[#allocation11 + $0x28c] sm:$0xf]  ;;  %v2124_v20 = vld [vmem:[#allocation11 + $0x298] sm:$0xf0] }
 0x14b   :  { %1347 = vmatpush.bf16.msra.mxu2 %v1799_v52  ;;  %1360 = vmatpush.bf16.msra.mxu3 %v1927_v55  ;;  %v2367_v52 = vld [vmem:[#allocation11 + $0xb4] sm:$0xf0]  ;;  %v2123_v55 = vor.u32 %v2427_v46, %v2122_v43  ;;  %v1818_v43 = vld [vmem:[#allocation11 + $0x28] sm:$0xf]  ;;  %v2059_v47 = vor.u32 %v2411_v32, %v2058_v31  ;;  %v2457_v21 = vld [vmem:[#allocation11 + $0x38c] sm:$0xf] }
 0x14c   :  { %v1883_v61 = vor.u32 %v2367_v52, %v1882_v51  ;;  %v2383_v46 = vld [vmem:[#allocation11 + $0x134] sm:$0xf0]  ;;  %v2433_v51 = vld [vmem:[#allocation11 + $0x2cc] sm:$0xf]  ;;  %v2156_v52 = vld [vmem:[#allocation11 + $0x2d8] sm:$0xf0] }
 0x14d   :  { %v2252_v22 = vld [vmem:[#allocation11 + $0x398] sm:$0xf0]  ;;  %v2421_v31 = vld [vmem:[#allocation11 + $0x26c] sm:$0xf] }
 0x14e   :  { %v2108_v32 = vld [vmem:[#allocation11 + $0x278] sm:$0xf0] }
 0x1aa   :  { %v485_v59 = vpop.f32.mrf.mxu0  ;;  %v498_v60 = vpop.f32.mrf.mxu1 }
 0x1ab   :  { %v486_v62 = vadd.f32 %v485_v59, %v284_v57  ;;  %v499_v63 = vadd.f32 %v498_v60, %v285_v58  ;;  %v2106_v57 = vld [vmem:[#allocation11 + $0x268] sm:$0xf]  ;;  %v2423_v58 = vld [vmem:[#allocation11 + $0x274] sm:$0xf0] }
 0x1ac   :  { %v2234_v59 = vld [vmem:[#allocation11 + $0x368] sm:$0xf]  ;;  %v2455_v60 = vld [vmem:[#allocation11 + $0x374] sm:$0xf0] }
 0x1ad   :  { %v504_v5 = vmax.f32 %v486_v62, 0.0  ;;  %v505_v6 = vmax.f32 %v499_v63, 0.0  ;;  %v2011_v62 = vor.u32 %v2399_v54, %v2010_v53  ;;  %v1866_v63 = vld [vmem:[#allocation11 + $0x88] sm:$0xf]  ;;  %v2465_v53 = vld [vmem:[#allocation11 + $0x3cc] sm:$0xf] }
 0x1ae   :  { %v1867_v9 = vor.u32 %v2363_v0, %v1866_v63  ;;  %v2405_v63 = vld [vmem:[#allocation11 + $0x1ec] sm:$0xf]  ;;  %v2044_v0 = vld [vmem:[#allocation11 + $0x1f8] sm:$0xf0] }
 0x1af   :  { %v2797_v10 = vpack.c.bf16 %v504_v5, %v504_v5  ;;  %v2799_v11 = vpack.c.bf16 %v505_v6, %v505_v6  ;;  %v459_v12 = vpop.f32.mrf.mxu2  ;;  %v472_v13 = vpop.f32.mrf.mxu3  ;;  %v2090_v5 = vld [vmem:[#allocation11 + $0x248] sm:$0xf]  ;;  %v2419_v6 = vld [vmem:[#allocation11 + $0x254] sm:$0xf0] }
 0x1b0   :  { %v460_v17 = vadd.f32 %v459_v12, %v282_v3  ;;  %v473_v18 = vadd.f32 %v472_v13, %v283_v4  ;;  %v2107_v3 = vor.u32 %v2423_v58, %v2106_v57  ;;  %v2235_v4 = vor.u32 %v2455_v60, %v2234_v59  ;;  %v1850_v13 = vld [vmem:[#allocation11 + $0x68] sm:$0xf]  ;;  %v2347_v58 = vld [vmem:[#allocation11 + $0x14] sm:$0xf0] }
 0x1b1   :  { %1322 = vmatmul.bf16.vlgmr.msra.gmra.mxu0 %v2797_v10  ;;  %1335 = vmatmul.bf16.vlgmr.msra.gmra.mxu1 %v2799_v11  ;;  %v1995_v12 = vor.u32 %v2395_v2, %v1994_v1  ;;  %v1802_v57 = vld [vmem:[#allocation11 + $0x8] sm:$0xf]  ;;  %v2379_v60 = vld [vmem:[#allocation11 + $0x114] sm:$0xf0]  ;;  %v2159_v1 = vor.u32 %v2433_v51, %v2156_v52  ;;  %v2357_v51 = vld [vmem:[#allocation11 + $0x6c] sm:$0xf] }
 0x1b2   :  { %v502_v23 = vmax.f32 %v460_v17, 0.0  ;;  %v503_v24 = vmax.f32 %v473_v18, 0.0  ;;  %1418 = vmatpush.bf16.msra.mxu0 %v2171_v7  ;;  %1431 = vmatpush.bf16.msra.mxu1 %v2299_v8  ;;  %v487_v25 = vpop.f32.mrf.mxu0  ;;  %v500_v26 = vpop.f32.mrf.mxu1  ;;  %v2218_v7 = vld [vmem:[#allocation11 + $0x348] sm:$0xf]  ;;  %v2451_v8 = vld [vmem:[#allocation11 + $0x354] sm:$0xf0]  ;;  %v2091_v17 = vor.u32 %v2419_v6, %v2090_v5 }
 0x1b3   :  { %v2219_v18 = vor.u32 %v2451_v8, %v2218_v7  ;;  %v1834_v25 = vld [vmem:[#allocation11 + $0x48] sm:$0xf]  ;;  %v2355_v26 = vld [vmem:[#allocation11 + $0x54] sm:$0xf0]  ;;  %v2140_v6 = vld [vmem:[#allocation11 + $0x2b8] sm:$0xf0] }
 0x1b4   :  { %v2803_v33 = vpack.c.bf16 %v502_v23, %v502_v23  ;;  %v2805_v34 = vpack.c.bf16 %v503_v24, %v503_v24  ;;  %v1851_v23 = vor.u32 %v2359_v14, %v1850_v13  ;;  %v1979_v24 = vor.u32 %v2391_v16, %v1978_v15  ;;  %v1930_v59 = vld [vmem:[#allocation11 + $0x108] sm:$0xf]  ;;  %v2461_v7 = vld [vmem:[#allocation11 + $0x3ac] sm:$0xf]  ;;  %v2268_v8 = vld [vmem:[#allocation11 + $0x3b8] sm:$0xf0] }
 0x1b5   :  { %v1835_v39 = vor.u32 %v2355_v26, %v1834_v25  ;;  %v1931_v5 = vor.u32 %v2379_v60, %v1930_v59  ;;  %v2369_v13 = vld [vmem:[#allocation11 + $0xcc] sm:$0xf]  ;;  %v1900_v14 = vld [vmem:[#allocation11 + $0xd8] sm:$0xf0] }
 0x1b6   :  { %1419 = vmatpush.bf16.msra.mxu0 %v2155_v27  ;;  %1432 = vmatpush.bf16.msra.mxu1 %v2283_v28  ;;  %v1962_v27 = vld [vmem:[#allocation11 + $0x148] sm:$0xf]  ;;  %v2387_v28 = vld [vmem:[#allocation11 + $0x154] sm:$0xf0]  ;;  %v2401_v15 = vld [vmem:[#allocation11 + $0x1cc] sm:$0xf] }
 0x1b7   :  { %1296 = vmatmul.bf16.vlgmr.msrb.gmra.mxu2 %v2803_v33  ;;  %1309 = vmatmul.bf16.vlgmr.msrb.gmra.mxu3 %v2805_v34  ;;  %v461_v44 = vpop.f32.mrf.mxu2  ;;  %v474_v45 = vpop.f32.mrf.mxu3  ;;  %v1963_v40 = vor.u32 %v2387_v28, %v1962_v27  ;;  %v2028_v16 = vld [vmem:[#allocation11 + $0x1d8] sm:$0xf0]  ;;  %v2365_v25 = vld [vmem:[#allocation11 + $0xac] sm:$0xf] }
 0x1b8   :  { %1392 = vmatpush.bf16.msrb.mxu2 %v1915_v35  ;;  %1405 = vmatpush.bf16.msrb.mxu3 %v2043_v36  ;;  %v2186_v35 = vld [vmem:[#allocation11 + $0x308] sm:$0xf]  ;;  %v2443_v36 = vld [vmem:[#allocation11 + $0x314] sm:$0xf0]  ;;  %v1884_v26 = vld [vmem:[#allocation11 + $0xb8] sm:$0xf0] }
 0x1b9   :  { %v2351_v44 = vld [vmem:[#allocation11 + $0x34] sm:$0xf0]  ;;  %v1946_v45 = vld [vmem:[#allocation11 + $0x128] sm:$0xf]  ;;  %v2187_v48 = vor.u32 %v2443_v36, %v2186_v35  ;;  %v2397_v27 = vld [vmem:[#allocation11 + $0x1ac] sm:$0xf] }
 0x1ba   :  { %1420 = vmatpush.bf16.msra.mxu0 %v2139_v41  ;;  %1433 = vmatpush.bf16.msra.mxu1 %v2267_v42  ;;  %v2469_v41 = vld [vmem:[#allocation11 + $0x3ec] sm:$0xf]  ;;  %v2300_v42 = vld [vmem:[#allocation11 + $0x3f8] sm:$0xf0]  ;;  %v1819_v54 = vor.u32 %v2351_v44, %v1818_v43  ;;  %v2111_v43 = vor.u32 %v2421_v31, %v2108_v32 }
 0x1bb   :  { %v2012_v28 = vld [vmem:[#allocation11 + $0x1b8] sm:$0xf0]  ;;  %v2453_v35 = vld [vmem:[#allocation11 + $0x36c] sm:$0xf] }
 0x1bc   :  { %1393 = vmatpush.bf16.msrb.mxu2 %v1899_v49  ;;  %1406 = vmatpush.bf16.msrb.mxu3 %v2027_v50  ;;  %v2175_v49 = vor.u32 %v2437_v37, %v2172_v38  ;;  %v2303_v50 = vor.u32 %v2469_v41, %v2300_v42  ;;  %v2236_v36 = vld [vmem:[#allocation11 + $0x378] sm:$0xf0]  ;;  %v1887_v37 = vor.u32 %v2365_v25, %v1884_v26  ;;  %v2393_v41 = vld [vmem:[#allocation11 + $0x18c] sm:$0xf] }
 0x1bd   :  { %v2015_v38 = vor.u32 %v2397_v27, %v2012_v28  ;;  %v1996_v42 = vld [vmem:[#allocation11 + $0x198] sm:$0xf0]  ;;  %v2239_v44 = vor.u32 %v2453_v35, %v2236_v36  ;;  %v2445_v59 = vld [vmem:[#allocation11 + $0x32c] sm:$0xf] }
 0x1be   :  { %1421 = vmatpush.bf16.msra.mxu0 %v2123_v55  ;;  %1434 = vmatpush.bf16.msra.mxu1 %v2251_v56  ;;  %v1947_v55 = vor.u32 %v2383_v46, %v1946_v45  ;;  %v2284_v56 = vld [vmem:[#allocation11 + $0x3d8] sm:$0xf0]  ;;  %v2417_v45 = vld [vmem:[#allocation11 + $0x24c] sm:$0xf] }
 0x1bf   :  { %v2287_v2 = vor.u32 %v2465_v53, %v2284_v56  ;;  %v2092_v46 = vld [vmem:[#allocation11 + $0x258] sm:$0xf0]  ;;  %v2389_v53 = vld [vmem:[#allocation11 + $0x16c] sm:$0xf] }
 0x1c0   :  { %1394 = vmatpush.bf16.msrb.mxu2 %v1883_v61  ;;  %1407 = vmatpush.bf16.msrb.mxu3 %v2011_v62  ;;  %v2373_v61 = vld [vmem:[#allocation11 + $0xec] sm:$0xf]  ;;  %v1916_v62 = vld [vmem:[#allocation11 + $0xf8] sm:$0xf0] }
 0x1c1   :  { %1374 = vmatmul.bf16.vlgmr.msrb.gmra.mxu0 %v2797_v10  ;;  %1387 = vmatmul.bf16.vlgmr.msrb.gmra.mxu1 %v2799_v11  ;;  %v1852_v52 = vld [vmem:[#allocation11 + $0x78] sm:$0xf0] }
 0x1c2   :  { %1422 = vmatpush.bf16.msra.mxu0 %v2107_v3  ;;  %1435 = vmatpush.bf16.msra.mxu1 %v2235_v4  ;;  %v2429_v3 = vld [vmem:[#allocation11 + $0x2ac] sm:$0xf]  ;;  %v1803_v4 = vor.u32 %v2347_v58, %v1802_v57  ;;  %v2076_v58 = vld [vmem:[#allocation11 + $0x238] sm:$0xf0] }
 0x1c3   :  { %v2413_v57 = vld [vmem:[#allocation11 + $0x22c] sm:$0xf]  ;;  %v2204_v60 = vld [vmem:[#allocation11 + $0x338] sm:$0xf0] }
 0x1c4   :  { %1395 = vmatpush.bf16.msrb.mxu2 %v1867_v9  ;;  %1408 = vmatpush.bf16.msrb.mxu3 %v1995_v12  ;;  %v1919_v9 = vor.u32 %v2373_v61, %v1916_v62  ;;  %v2047_v12 = vor.u32 %v2405_v63, %v2044_v0  ;;  %v1855_v61 = vor.u32 %v2357_v51, %v1852_v52  ;;  %v2353_v63 = vld [vmem:[#allocation11 + $0x4c] sm:$0xf]  ;;  %v1836_v0 = vld [vmem:[#allocation11 + $0x58] sm:$0xf0] }
 0x1c6   :  { %1423 = vmatpush.bf16.msra.mxu0 %v2091_v17  ;;  %1436 = vmatpush.bf16.msra.mxu1 %v2219_v18  ;;  %v2143_v17 = vor.u32 %v2429_v3, %v2140_v6  ;;  %v2271_v18 = vor.u32 %v2461_v7, %v2268_v8  ;;  %v2079_v3 = vor.u32 %v2413_v57, %v2076_v58  ;;  %v2060_v6 = vld [vmem:[#allocation11 + $0x218] sm:$0xf0]  ;;  %v2441_v7 = vld [vmem:[#allocation11 + $0x30c] sm:$0xf] }
 0x1c7   :  { %1348 = vmatmul.bf16.vlgmr.msra.gmra.mxu2 %v2803_v33  ;;  %1361 = vmatmul.bf16.vlgmr.msra.gmra.mxu3 %v2805_v34  ;;  %v2188_v8 = vld [vmem:[#allocation11 + $0x318] sm:$0xf0] }
 0x1c8   :  { %1396 = vmatpush.bf16.msrb.mxu2 %v1851_v23  ;;  %1409 = vmatpush.bf16.msrb.mxu3 %v1979_v24  ;;  %v1903_v23 = vor.u32 %v2369_v13, %v1900_v14  ;;  %v2031_v24 = vor.u32 %v2401_v15, %v2028_v16  ;;  %v2349_v13 = vld [vmem:[#allocation11 + $0x2c] sm:$0xf]  ;;  %v1820_v14 = vld [vmem:[#allocation11 + $0x38] sm:$0xf0] }
 0x1c9   :  { %v2381_v15 = vld [vmem:[#allocation11 + $0x12c] sm:$0xf]  ;;  %v1948_v16 = vld [vmem:[#allocation11 + $0x138] sm:$0xf0] }
 0x1ca   :  { %1424 = vmatpush.bf16.msra.mxu0 %v2075_v29  ;;  %1437 = vmatpush.bf16.msra.mxu1 %v2203_v30  ;;  %v2127_v29 = vor.u32 %v2425_v19, %v2124_v20  ;;  %v2255_v30 = vor.u32 %v2457_v21, %v2252_v22  ;;  %v1823_v19 = vor.u32 %v2349_v13, %v1820_v14  ;;  %v2345_v21 = vld [vmem:[#allocation11 + $0xc] sm:$0xf]  ;;  %v1804_v22 = vld [vmem:[#allocation11 + $0x18] sm:$0xf0] }
 0x1cb   :  { %v1951_v20 = vor.u32 %v2381_v15, %v1948_v16  ;;  %v1807_v25 = vor.u32 %v2345_v21, %v1804_v22 }
 0x1cc   :  { %1397 = vmatpush.bf16.msrb.mxu2 %v1835_v39  ;;  %1410 = vmatpush.bf16.msrb.mxu3 %v1963_v40  ;;  %v2361_v39 = vld [vmem:[#allocation11 + $0x8c] sm:$0xf]  ;;  %v1868_v40 = vld [vmem:[#allocation11 + $0x98] sm:$0xf0] }
 0x1ce   :  { %1425 = vmatpush.bf16.msra.mxu0 %v2059_v47  ;;  %1438 = vmatpush.bf16.msra.mxu1 %v2187_v48  ;;  %v2449_v47 = vld [vmem:[#allocation11 + $0x34c] sm:$0xf]  ;;  %v2220_v48 = vld [vmem:[#allocation11 + $0x358] sm:$0xf0] }
 0x1cf   :  { %v2223_v56 = vor.u32 %v2449_v47, %v2220_v48 }
 0x1d0   :  { %1398 = vmatpush.bf16.msrb.mxu2 %v1819_v54  ;;  %1411 = vmatpush.bf16.msrb.mxu3 %v1947_v55  ;;  %v1980_v54 = vld [vmem:[#allocation11 + $0x178] sm:$0xf0]  ;;  %v2095_v55 = vor.u32 %v2417_v45, %v2092_v46 }
 0x1d1   :  { %1426 = vmatmul.bf16.vlgmr.msra.gmra.mxu0 %v2797_v10  ;;  %1439 = vmatmul.bf16.vlgmr.msra.gmra.mxu1 %v2799_v11  ;;  %v1983_v62 = vor.u32 %v2389_v53, %v1980_v54 }
 0x1d2   :  { %1470 = vmatpush.bf16.msrb.mxu0 %v2175_v49  ;;  %1483 = vmatpush.bf16.msrb.mxu1 %v2303_v50  ;;  %v1871_v49 = vor.u32 %v2361_v39, %v1868_v40  ;;  %v1999_v50 = vor.u32 %v2393_v41, %v1996_v42 }
 0x1d4   :  { %1399 = vmatpush.bf16.msrb.mxu2 %v1803_v4  ;;  %1412 = vmatpush.bf16.msrb.mxu3 %v1931_v5  ;;  %v2207_v4 = vor.u32 %v2445_v59, %v2204_v60  ;;  %v2409_v5 = vld [vmem:[#allocation11 + $0x20c] sm:$0xf] }
 0x1d6   :  { %1471 = vmatpush.bf16.msrb.mxu0 %v2159_v1  ;;  %1484 = vmatpush.bf16.msrb.mxu1 %v2287_v2  ;;  %v2385_v1 = vld [vmem:[#allocation11 + $0x14c] sm:$0xf]  ;;  %v1964_v2 = vld [vmem:[#allocation11 + $0x158] sm:$0xf0] }
 0x1d7   :  { %1400 = vmatmul.bf16.vlgmr.msrb.gmra.mxu2 %v2803_v33  ;;  %1413 = vmatmul.bf16.vlgmr.msrb.gmra.mxu3 %v2805_v34 }
 0x1d8   :  { %1444 = vmatpush.bf16.msra.mxu2 %v1919_v9  ;;  %1457 = vmatpush.bf16.msra.mxu3 %v2047_v12  ;;  %v1839_v9 = vor.u32 %v2353_v63, %v1836_v0  ;;  %v1967_v12 = vor.u32 %v2385_v1, %v1964_v2 }
 0x1da   :  { %1472 = vmatpush.bf16.msrb.mxu0 %v2143_v17  ;;  %1485 = vmatpush.bf16.msrb.mxu1 %v2271_v18  ;;  %v2063_v17 = vor.u32 %v2409_v5, %v2060_v6  ;;  %v2191_v18 = vor.u32 %v2441_v7, %v2188_v8 }
 0x1dc   :  { %1445 = vmatpush.bf16.msra.mxu2 %v1903_v23  ;;  %1458 = vmatpush.bf16.msra.mxu3 %v2031_v24  ;;  %v2377_v23 = vld [vmem:[#allocation11 + $0x10c] sm:$0xf]  ;;  %v1932_v24 = vld [vmem:[#allocation11 + $0x118] sm:$0xf0] }
 0x1dd   :  { %v1935_v26 = vor.u32 %v2377_v23, %v1932_v24 }
 0x1de   :  { %1473 = vmatpush.bf16.msrb.mxu0 %v2127_v29  ;;  %1486 = vmatpush.bf16.msrb.mxu1 %v2255_v30  ;;  %v638_v29 = vld [vmem:[#allocation13] sm:$0xf] }
 0x1df   :  { %v640_v32 = vperm.slane %v638_v29, 0  ;;  %v642_v58 = vperm.slane %v638_v29, 2  ;;  %v643_v8 = vperm.slane %v638_v29, 3 }
 0x1e0   :  { %1446 = vmatpush.bf16.msra.mxu2 %v1887_v37  ;;  %1459 = vmatpush.bf16.msra.mxu3 %v2015_v38 }
 0x1e2   :  { %1474 = vmatpush.bf16.msrb.mxu0 %v2111_v43  ;;  %1487 = vmatpush.bf16.msrb.mxu1 %v2239_v44  ;;  %v641_v44 = vperm.slane %v638_v29, 1 }
 0x1e4   :  { %1447 = vmatpush.bf16.msra.mxu2 %v1871_v49  ;;  %1460 = vmatpush.bf16.msra.mxu3 %v1999_v50 }
 0x1e6   :  { %1475 = vmatpush.bf16.msrb.mxu0 %v2095_v55  ;;  %1488 = vmatpush.bf16.msrb.mxu1 %v2223_v56 }
 0x1e8   :  { %1448 = vmatpush.bf16.msra.mxu2 %v1855_v61  ;;  %1461 = vmatpush.bf16.msra.mxu3 %v1983_v62 }
 0x1ea   :  { %1476 = vmatpush.bf16.msrb.mxu0 %v2079_v3  ;;  %1489 = vmatpush.bf16.msrb.mxu1 %v2207_v4 }
 0x1ec   :  { %1449 = vmatpush.bf16.msra.mxu2 %v1839_v9  ;;  %1462 = vmatpush.bf16.msra.mxu3 %v1967_v12 }
 0x1ee   :  { %1477 = vmatpush.bf16.msrb.mxu0 %v2063_v17  ;;  %1490 = vmatpush.bf16.msrb.mxu1 %v2191_v18 }
 0x1f0   :  { %1450 = vmatpush.bf16.msra.mxu2 %v1823_v19  ;;  %1463 = vmatpush.bf16.msra.mxu3 %v1951_v20 }
 0x1f1   :  { %1478 = vmatmul.bf16.vlgmr.msrb.gmra.mxu0 %v2797_v10  ;;  %1491 = vmatmul.bf16.vlgmr.msrb.gmra.mxu1 %v2799_v11 }
 0x1f4   :  { %1451 = vmatpush.bf16.msra.mxu2 %v1807_v25  ;;  %1464 = vmatpush.bf16.msra.mxu3 %v1935_v26 }
 0x1f7   :  { %1452 = vmatmul.bf16.vlgmr.msra.gmra.mxu2 %v2803_v33  ;;  %1465 = vmatmul.bf16.vlgmr.msra.gmra.mxu3 %v2805_v34 }
 0x22e   :  { %v1323_v27 = vpop.f32.mrf.mxu0  ;;  %v1336_v28 = vpop.f32.mrf.mxu1 }
 0x236   :  { %v1325_v30 = vpop.f32.mrf.mxu0  ;;  %v1338_v31 = vpop.f32.mrf.mxu1 }
 0x23a   :  { %v1297_v35 = vpop.f32.mrf.mxu2  ;;  %v1310_v36 = vpop.f32.mrf.mxu3 }
 0x23b   :  { %v1298_v37 = vadd.f32 %v1297_v35, %v640_v32 }
 0x23d   :  { %v1311_v38 = vadd.f32 %v1310_v36, %v1298_v37 }
 0x23e   :  { %v1375_v39 = vpop.f32.mrf.mxu0  ;;  %v1388_v10 = vpop.f32.mrf.mxu1 }
 0x23f   :  { %v1324_v40 = vadd.f32 %v1323_v27, %v1311_v38 }
 0x241   :  { %v1337_v11 = vadd.f32 %v1336_v28, %v1324_v40 }
 0x242   :  { %v1299_v41 = vpop.f32.mrf.mxu2  ;;  %v1312_v42 = vpop.f32.mrf.mxu3 }
 0x243   :  { %v1497_v33 = vsel %vm1496_vm2, %v1337_v11, -inf }
 0x244   :  { %1498 = vmax.xlane.f32.xlu0 %v1497_v33 }
 0x246   :  { %v1377_v34 = vpop.f32.mrf.mxu0  ;;  %v1390_v43 = vpop.f32.mrf.mxu1 }
 0x24a   :  { %v1349_v45 = vpop.f32.mrf.mxu2  ;;  %v1362_v46 = vpop.f32.mrf.mxu3 }
 0x24b   :  { %v1350_v47 = vadd.f32 %v1349_v45, %v641_v44 }
 0x24d   :  { %v1363_v48 = vadd.f32 %v1362_v46, %v1350_v47 }
 0x24e   :  { %v1427_v49 = vpop.f32.mrf.mxu0  ;;  %v1440_v50 = vpop.f32.mrf.mxu1 }
 0x24f   :  { %v1376_v51 = vadd.f32 %v1375_v39, %v1363_v48 }
 0x251   :  { %v1389_v52 = vadd.f32 %v1388_v10, %v1376_v51 }
 0x252   :  { %v1351_v53 = vpop.f32.mrf.mxu2  ;;  %v1364_v54 = vpop.f32.mrf.mxu3 }
 0x253   :  { %v1525_v55 = vsel %vm1496_vm2, %v1389_v52, -inf }
 0x254   :  { %1526 = vmax.xlane.f32.xlu0 %v1525_v55 }
 0x256   :  { %v1429_v56 = vpop.f32.mrf.mxu0  ;;  %v1442_v57 = vpop.f32.mrf.mxu1 }
 0x25a   :  { %v1401_v59 = vpop.f32.mrf.mxu2  ;;  %v1414_v60 = vpop.f32.mrf.mxu3 }
 0x25b   :  { %v1402_v61 = vadd.f32 %v1401_v59, %v642_v58 }
 0x25d   :  { %v1415_v62 = vadd.f32 %v1414_v60, %v1402_v61 }
 0x25f   :  { %v1428_v63 = vadd.f32 %v1427_v49, %v1415_v62 }
 0x261   :  { %v1441_v0 = vadd.f32 %v1440_v50, %v1428_v63 }
 0x262   :  { %v1403_v1 = vpop.f32.mrf.mxu2  ;;  %v1416_v2 = vpop.f32.mrf.mxu3 }
 0x263   :  { %v1553_v3 = vsel %vm1496_vm2, %v1441_v0, -inf }
 0x264   :  { %1554 = vmax.xlane.f32.xlu1 %v1553_v3 }
 0x26e   :  { %v1479_v4 = vpop.f32.mrf.mxu0  ;;  %v1492_v5 = vpop.f32.mrf.mxu1 }
 0x276   :  { %v1481_v6 = vpop.f32.mrf.mxu0  ;;  %v1494_v7 = vpop.f32.mrf.mxu1 }
 0x27a   :  { %v1453_v9 = vpop.f32.mrf.mxu2  ;;  %v1466_v12 = vpop.f32.mrf.mxu3 }
 0x27b   :  { %v1454_v13 = vadd.f32 %v1453_v9, %v643_v8 }
 0x27d   :  { %v1467_v14 = vadd.f32 %v1466_v12, %v1454_v13 }
 0x27f   :  { %v1480_v15 = vadd.f32 %v1479_v4, %v1467_v14 }
 0x281   :  { %v1493_v16 = vadd.f32 %v1492_v5, %v1480_v15 }
 0x282   :  { %v1455_v17 = vpop.f32.mrf.mxu2  ;;  %v1468_v18 = vpop.f32.mrf.mxu3 }
 0x283   :  { %v1581_v19 = vsel %vm1496_vm2, %v1493_v16, -inf }
 0x284   :  { %1582 = vmax.xlane.f32.xlu1 %v1581_v19 }
 0x2b7   :  { %v1499_v20 = vpop.xlane.xlu0 %1498 }
 0x2b8   :  { %v1500_v21 = vsub.f32 %v1337_v11, %v1499_v20 }
 0x2ba   :  { %v1501_v22 = vmul.f32 1.442695, %v1500_v21 }
 0x2bc   :  { %2488 = vpow2.f32 %v1501_v22 }
 0x2c2   :  { %v2489_v23 = vpop.eup %2488 }
 0x2c3   :  { %v1503_v24 = vsel %vm1496_vm2, %v2489_v23, 0.0 }
 0x2c4   :  { %1504 = vadd.xlane.f32.xlu2 %v1503_v24 }
 0x2c7   :  { %v1527_v25 = vpop.xlane.xlu0 %1526 }
 0x2c8   :  { %v1528_v26 = vsub.f32 %v1389_v52, %v1527_v25 }
 0x2ca   :  { %v1529_v27 = vmul.f32 1.442695, %v1528_v26 }
 0x2cc   :  { %2490 = vpow2.f32 %v1529_v27 }
 0x2d2   :  { %v2491_v28 = vpop.eup %2490 }
 0x2d3   :  { %v1531_v29 = vsel %vm1496_vm2, %v2491_v28, 0.0 }
 0x2d4   :  { %1532 = vadd.xlane.f32.xlu2 %v1531_v29 }
 0x2d7   :  { %v1555_v30 = vpop.xlane.xlu1 %1554 }
 0x2d8   :  { %v1556_v31 = vsub.f32 %v1441_v0, %v1555_v30 }
 0x2da   :  { %v1557_v32 = vmul.f32 1.442695, %v1556_v31 }
 0x2dc   :  { %2492 = vpow2.f32 %v1557_v32 }
 0x2e2   :  { %v2827_v35 = vpop.eup %2492 }
 0x2e3   :  { %v1559_v36 = vsel %vm1496_vm2, %v2827_v35, 0.0 }
 0x2e4   :  { %1560 = vadd.xlane.f32.xlu0 %v1559_v36 }
 0x2f7   :  { %v1583_v37 = vpop.xlane.xlu1 %1582 }
 0x2f8   :  { %v1584_v38 = vsub.f32 %v1493_v16, %v1583_v37 }
 0x2fa   :  { %v1585_v39 = vmul.f32 1.442695, %v1584_v38 }
 0x2fc   :  { %2494 = vpow2.f32 %v1585_v39 }
 0x302   :  { %v2831_v10 = vpop.eup %2494 }
 0x303   :  { %v1587_v40 = vsel %vm1496_vm2, %v2831_v10, 0.0 }
 0x304   :  { %1588 = vadd.xlane.f32.xlu1 %v1587_v40 }
 0x337   :  { %v1505_v11 = vpop.xlane.xlu2 %1504 }
 0x338   :  { %2496 = vrcp.f32 %v1505_v11  ;;  %v1517_v34 = vand.u32 2147483648, %v1505_v11  ;;  %v1515_v44 = vand.u32 2147483647, %v1505_v11  ;;  %vm1511_vm4 = vweird.f32 %v1505_v11 }
 0x33a   :  { %v1518_v46 = vor.u32 1.1754944e-38, %v1517_v34  ;;  %vm1516_vm6 = vcmp.eq.f32.partialorder %v1515_v44, 8.507059e+37 }
 0x33e   :  { %v2497_v41 = vpop.eup %2496 }
 0x33f   :  { %v1507_v42 = vmul.f32 %v2497_v41, %v1505_v11  ;;  %vm1512_vm3 = vweird.f32 %v2497_v41 }
 0x340   :  { %vm1513_vm5 = vmor %vm1511_vm4, %vm1512_vm3 }
 0x341   :  { %v1508_v33 = vsub.f32 1.0, %v1507_v42 }
 0x343   :  { %v1509_v43 = vmul.f32 %v2497_v41, %v1508_v33 }
 0x345   :  { %v1510_v45 = vadd.f32 %v2497_v41, %v1509_v43 }
 0x347   :  { %v1514_v47 = vsel %vm1513_vm5, %v2497_v41, %v1510_v45  ;;  %v1533_v48 = vpop.xlane.xlu2 %1532 }
 0x348   :  { %v1519_v49 = vsel %vm1516_vm6, %v1518_v46, %v1514_v47  ;;  %2498 = vrcp.f32 %v1533_v48  ;;  %v1545_v55 = vand.u32 2147483648, %v1533_v48  ;;  %v1543_v57 = vand.u32 2147483647, %v1533_v48 }
 0x349   :  { %v1521_v50 = vmul.f32 %v2489_v23, %v1519_v49  ;;  %vm1539_vm9 = vweird.f32 %v1533_v48 }
 0x34a   :  { %v1546_v59 = vor.u32 1.1754944e-38, %v1545_v55  ;;  %vm1544_vm11 = vcmp.eq.f32.partialorder %v1543_v57, 8.507059e+37 }
 0x34b   :  { %v1522_v51 = vpack.c.bf16 %v1521_v50, %v1521_v50 }
 0x34d   :  { %1524 = vst.msk [vmem:[#allocation14] sm:$0x3] %vm1523_vm7, %v1522_v51 }
 0x34e   :  { %v2499_v52 = vpop.eup %2498 }
 0x34f   :  { %v1535_v53 = vmul.f32 %v2499_v52, %v1533_v48  ;;  %vm1540_vm8 = vweird.f32 %v2499_v52 }
 0x350   :  { %vm1541_vm10 = vmor %vm1539_vm9, %vm1540_vm8 }
 0x351   :  { %v1536_v54 = vsub.f32 1.0, %v1535_v53 }
 0x353   :  { %v1537_v56 = vmul.f32 %v2499_v52, %v1536_v54 }
 0x355   :  { %v1538_v58 = vadd.f32 %v2499_v52, %v1537_v56 }
 0x357   :  { %v1542_v60 = vsel %vm1541_vm10, %v2499_v52, %v1538_v58  ;;  %v1561_v62 = vpop.xlane.xlu0 %1560 }
 0x358   :  { %v1547_v61 = vsel %vm1544_vm11, %v1546_v59, %v1542_v60  ;;  %2500 = vrcp.f32 %v1561_v62  ;;  %v1573_v4 = vand.u32 2147483648, %v1561_v62  ;;  %v1571_v6 = vand.u32 2147483647, %v1561_v62 }
 0x359   :  { %v1549_v63 = vmul.f32 %v2491_v28, %v1547_v61  ;;  %vm1567_vm13 = vweird.f32 %v1561_v62 }
 0x35a   :  { %v1574_v8 = vor.u32 1.1754944e-38, %v1573_v4  ;;  %vm1572_vm15 = vcmp.eq.f32.partialorder %v1571_v6, 8.507059e+37 }
 0x35b   :  { %v1550_v0 = vpack.c.bf16 %v1549_v63, %v1549_v63 }
 0x35d   :  { %1552 = vst.msk [vmem:[#allocation14 + $0x2] sm:$0x3] %vm1523_vm7, %v1550_v0 }
 0x35e   :  { %v2501_v1 = vpop.eup %2500 }
 0x35f   :  { %v1563_v2 = vmul.f32 %v2501_v1, %v1561_v62  ;;  %vm1568_vm12 = vweird.f32 %v2501_v1 }
 0x360   :  { %vm1569_vm14 = vmor %vm1567_vm13, %vm1568_vm12 }
 0x361   :  { %v1564_v3 = vsub.f32 1.0, %v1563_v2 }
 0x363   :  { %v1565_v5 = vmul.f32 %v2501_v1, %v1564_v3 }
 0x365   :  { %v1566_v7 = vadd.f32 %v2501_v1, %v1565_v5 }
 0x367   :  { %v1570_v9 = vsel %vm1569_vm14, %v2501_v1, %v1566_v7 }
 0x368   :  { %v1575_v12 = vsel %vm1572_vm15, %v1574_v8, %v1570_v9 }
 0x369   :  { %v1577_v13 = vmul.f32 %v2827_v35, %v1575_v12 }
 0x36b   :  { %v1578_v14 = vpack.c.bf16 %v1577_v13, %v1577_v13 }
 0x36d   :  { %1580 = vst.msk [vmem:[#allocation14 + $0x4] sm:$0x3] %vm1523_vm7, %v1578_v14 }
 0x377   :  { %v1589_v15 = vpop.xlane.xlu1 %1588 }
 0x378   :  { %2502 = vrcp.f32 %v1589_v15  ;;  %v1601_v19 = vand.u32 2147483648, %v1589_v15  ;;  %v1599_v21 = vand.u32 2147483647, %v1589_v15  ;;  %vm1595_vm1 = vweird.f32 %v1589_v15 }
 0x37a   :  { %v1602_v23 = vor.u32 1.1754944e-38, %v1601_v19  ;;  %vm1600_vm3 = vcmp.eq.f32.partialorder %v1599_v21, 8.507059e+37 }
 0x37e   :  { %v2503_v16 = vpop.eup %2502 }
 0x37f   :  { %v1591_v17 = vmul.f32 %v2503_v16, %v1589_v15  ;;  %vm1596_vm0 = vweird.f32 %v2503_v16 }
 0x380   :  { %vm1597_vm2 = vmor %vm1595_vm1, %vm1596_vm0 }
 0x381   :  { %v1592_v18 = vsub.f32 1.0, %v1591_v17 }
 0x383   :  { %v1593_v20 = vmul.f32 %v2503_v16, %v1592_v18 }
 0x385   :  { %v1594_v22 = vadd.f32 %v2503_v16, %v1593_v20 }
 0x387   :  { %v1598_v24 = vsel %vm1597_vm2, %v2503_v16, %v1594_v22 }
 0x388   :  { %v1603_v25 = vsel %vm1600_vm3, %v1602_v23, %v1598_v24 }
 0x389   :  { %v1605_v26 = vmul.f32 %v2831_v10, %v1603_v25 }
 0x38b   :  { %v1606_v27 = vpack.c.bf16 %v1605_v26, %v1605_v26 }
 0x38d   :  { %1608 = vst.msk [vmem:[#allocation14 + $0x6] sm:$0x3] %vm1523_vm7, %v1606_v27 }
 0x38e   :  { %1621 = dma.vmem_to_hbm [thread:$0]  %s1614_s22, 128, %s1616_s25, [#allocation4], %s2718_s26, %s2718_s26, %s2719_s4  }
 0x38f   :  { %2704 = dma.done.wait [#allocation4], 128  }
 0x390   :  { %2705 = vsyncadd [#allocation4], 4294967168 }
 0x391   :  { %1626 = vsyncpa [#allocation3], 1 }
 0x392   :  { %1627 = vsyncpa [#allocation6], 1 }
 0x393   :  { %1628 = vsyncpa [#allocation9], 1 }
 0x394   :  { %1629 = vsyncpa [#allocation12], 1 }
 0x395   :  { %1630 = vsyncpa [#allocation4], 1 }

// kernel: tpu_custom_call.1
= control target key start
LH: loop header
LB: loop body
LE: loop exit
PB: predicated region body
PF: predicated region fallthrough
CT: control target
= control target key end

     0   :  { %14 = vsyncpa [#allocation3], 0  ;;  %s2844_s0 = inlined_call_operand.hbm [shape: f32[4,8], index: 0, kind: input, shape index: {}]   ;;  %s2845_s1 = inlined_call_operand.hbm [shape: bf16[8,128], index: 1, kind: input, shape index: {}]   ;;  %s2846_s2 = inlined_call_operand.vmem [shape: f32[1,128], index: 2, kind: input, shape index: {}]   ;;  %s2847_s3 = inlined_call_operand.hbm [shape: bf16[128,128], index: 3, kind: input, shape index: {}]   ;;  %s2848_s4 = inlined_call_operand.hbm [shape: f32[1,128], index: 4, kind: input, shape index: {}]   ;;  %s2849_s5 = inlined_call_operand.hbm [shape: bf16[128,512], index: 5, kind: input, shape index: {}]   ;;  %s2850_s6 = inlined_call_operand.vmem [shape: f32[1,512], index: 6, kind: input, shape index: {}]   ;;  %s2851_s7 = inlined_call_operand.hbm [shape: bf16[512,512], index: 7, kind: input, shape index: {}]   ;;  %s2852_s8 = inlined_call_operand.hbm [shape: f32[1,512], index: 8, kind: input, shape index: {}]   ;;  %s2853_s9 = inlined_call_operand.hbm [shape: bf16[4,4,51], index: 9, kind: output, shape index: {}]  }
   0x1   :  { %15 = vsyncpa [#allocation6], 0 }
   0x2   :  { %16 = vsyncpa [#allocation9], 0 }
   0x3   :  { %17 = vsyncpa [#allocation12], 0  ;;  %s35_s11 = sshll.u32 %s2845_s1, 4  ;;  %s36_s11 = int_to_ptr.hbm [resolvable:$true] %s35_s11 }
   0x4   :  { %18 = vsyncpa [#allocation4], 0  ;;  %s2706_s12 = smov [#allocation5]   ;;  %s61_s16 = sshll.u32 %s2848_s4, 4  ;;  %s62_s16 = int_to_ptr.hbm [resolvable:$true] %s61_s16 }
   0x5   :  { %s37_s13 = sshll.u32 %s2706_s12, 4  ;;  %s2707_s17 = smov [#allocation8]   ;;  %s38_s13 = int_to_ptr.vmem [resolvable:$true] %s37_s13 }
   0x6   :  { %40 = dma.hbm_to_vmem [thread:$0]  %s36_s11, 64, %s38_s13, [#allocation6]  }
   0x7   :  { %s63_s18 = sshll.u32 %s2707_s17, 4  ;;  %s86_s21 = sshll.u32 %s2851_s7, 4  ;;  %s64_s18 = int_to_ptr.vmem [resolvable:$true] %s63_s18  ;;  %s87_s21 = int_to_ptr.hbm [resolvable:$true] %s86_s21 }
   0x8   :  { %66 = dma.hbm_to_vmem [thread:$0]  %s62_s16, 16, %s64_s18, [#allocation9]  }
   0x9   :  { %s2708_s1 = smov [#allocation11]   ;;  %s24_s25 = sshll.u32 %s2844_s0, 4  ;;  %s25_s25 = int_to_ptr.hbm [resolvable:$true] %s24_s25 }
   0xa   :  { %s88_s22 = sshll.u32 %s2708_s1, 4  ;;  %s2709_s26 = smov 256   ;;  %s89_s22 = int_to_ptr.vmem [resolvable:$true] %s88_s22 }
   0xb   :  { %s2710_s4 = smov 16   ;;  %s2711_s27 = smov [#allocation2]  }
   0xc   :  { %94 = dma.hbm_to_vmem [thread:$0]  %s87_s21, 16384, %s89_s22, [#allocation12], %s2709_s26, %s2709_s26, %s2710_s4  }
   0xd   :  { %s26_s28 = sshll.u32 %s2711_s27, 4  ;;  %s47_s10 = sshll.u32 %s2847_s3, 4  ;;  %s27_s28 = int_to_ptr.vmem [resolvable:$true] %s26_s28  ;;  %s48_s10 = int_to_ptr.hbm [resolvable:$true] %s47_s10 }
   0xe   :  { %29 = dma.hbm_to_vmem [thread:$0]  %s25_s25, 64, %s27_s28, [#allocation3]  }
   0xf   :  { %s2712_s7 = smov [#allocation7]   ;;  %s71_s0 = sshll.u32 %s2849_s5, 4  ;;  %s72_s0 = int_to_ptr.hbm [resolvable:$true] %s71_s0 }
  0x10   :  { %s49_s11 = sshll.u32 %s2712_s7, 4  ;;  %s2713_s14 = smov 64   ;;  %s50_s11 = int_to_ptr.vmem [resolvable:$true] %s49_s11 }
  0x11   :  { %s2714_s15 = smov 4   ;;  %s2715_s16 = smov [#allocation10]  }
  0x12   :  { %55 = dma.hbm_to_vmem [thread:$0]  %s48_s10, 1024, %s50_s11, [#allocation6], %s2713_s14, %s2713_s14, %s2714_s15  }
  0x13   :  { %s73_s17 = sshll.u32 %s2715_s16, 4  ;;  %s100_s3 = sshll.u32 %s2852_s8, 4  ;;  %s74_s17 = int_to_ptr.vmem [resolvable:$true] %s73_s17  ;;  %s101_s3 = int_to_ptr.hbm [resolvable:$true] %s100_s3 }
  0x14   :  { %79 = dma.hbm_to_vmem [thread:$0]  %s72_s0, 4096, %s74_s17, [#allocation9], %s2709_s26, %s2709_s26, %s2710_s4  }
  0x15   :  { %s2716_s20 = smov [#allocation13]  }
  0x16   :  { %s102_s21 = sshll.u32 %s2716_s20, 4  ;;  %s103_s21 = int_to_ptr.vmem [resolvable:$true] %s102_s21 }
  0x17   :  { %105 = dma.hbm_to_vmem [thread:$0]  %s101_s3, 64, %s103_s21, [#allocation12]  }
  0x18   :  { %2696 = dma.done.wait [#allocation3], 64  }
  0x19   :  { %2697 = vsyncadd [#allocation3], 4294967232 }
  0x1a   :  { %2698 = dma.done.wait [#allocation6], 1088  }
  0x1b   :  { %2699 = vsyncadd [#allocation6], 4294966208 }
  0x1c   :  { %2700 = dma.done.wait [#allocation9], 4112  }
  0x1d   :  { %2701 = vsyncadd [#allocation9], 4294963184 }
  0x1e   :  { %2702 = dma.done.wait [#allocation12], 16448  }
  0x1f   :  { %2703 = vsyncadd [#allocation12], 4294950848  ;;  %vm146_vm0 = vcmask 1043456   ;;  %v137_v0 = vld [vmem:[#allocation5] sm:$0xf]  ;;  %vm142_vm1 = vcmask 64512  }
  0x20   :  { %v135_v1 = vld [vmem:[#allocation2] sm:$0xf]  ;;  %v148_v3 = vsel %vm146_vm0, %v137_v0, 0  ;;  %v2310_v5 = vld [vmem:[#allocation7 + $0x30] sm:$0xff]  ;;  %v2309_v6 = vld [vmem:[#allocation7 + $0x28] sm:$0xff]  ;;  %vm1496_vm2 = vcmask 412672  }
  0x21   :  { %v2311_v2 = vld [vmem:[#allocation7 + $0x38] sm:$0xff]  ;;  %v136_v4 = vpack.c.bf16 %v135_v1, %v135_v1  ;;  %157 = vmatpush.bf16.msra.mxu0 %v148_v3  ;;  %v2308_v7 = vld [vmem:[#allocation7 + $0x20] sm:$0xff]  ;;  %v2306_v9 = vld [vmem:[#allocation7 + $0x10] sm:$0xff]  ;;  %vm1523_vm7 = vcmask 410624   ;;  %s1615_s25 = sshll.u32 %s2853_s9, 4  ;;  %s2718_s26 = smov 32   ;;  %s1616_s25 = int_to_ptr.hbm [resolvable:$true] %s1615_s25 }
  0x22   :  { %233 = vmatpush.bf16.msra.mxu1 %v2311_v2  ;;  %v2307_v8 = vld [vmem:[#allocation7 + $0x18] sm:$0xff]  ;;  %v2305_v10 = vld [vmem:[#allocation7 + $0x8] sm:$0xff]  ;;  %v2304_v11 = vld [vmem:[#allocation7] sm:$0xff]  ;;  %s2719_s4 = smov 2  }
  0x23   :  { %v1778_v12 = vld [vmem:[#allocation10 + $0xe0] sm:$0xf]  ;;  %v2342_v13 = vld [vmem:[#allocation10 + $0xec] sm:$0xf0]  ;;  %v2340_v14 = vld [vmem:[#allocation10 + $0xe4] sm:$0xf] }
  0x24   :  { %1631 = vmatmul.msk.bf16.vlgmr.msra.gmra.mxu0 %vm142_vm1, %v136_v4  ;;  %v1779_v15 = vor.u32 %v2342_v13, %v1778_v12  ;;  %v1780_v16 = vld [vmem:[#allocation10 + $0xf0] sm:$0xf0]  ;;  %v1786_v17 = vld [vmem:[#allocation10 + $0xe8] sm:$0xf]  ;;  %v2343_v18 = vld [vmem:[#allocation10 + $0xf4] sm:$0xf0] }
  0x25   :  { %v1783_v19 = vor.u32 %v2340_v14, %v1780_v16  ;;  %v1787_v20 = vor.u32 %v2343_v18, %v1786_v17  ;;  %v2341_v21 = vld [vmem:[#allocation10 + $0xec] sm:$0xf]  ;;  %v1788_v22 = vld [vmem:[#allocation10 + $0xf8] sm:$0xf0]  ;;  %v1762_v23 = vld [vmem:[#allocation10 + $0xc0] sm:$0xf] }
  0x26   :  { %234 = vmatpush.bf16.msra.mxu1 %v2310_v5  ;;  %450 = vmatpush.bf16.msra.mxu2 %v1779_v15  ;;  %v1791_v24 = vor.u32 %v2341_v21, %v1788_v22  ;;  %v2338_v25 = vld [vmem:[#allocation10 + $0xcc] sm:$0xf0]  ;;  %v2336_v26 = vld [vmem:[#allocation10 + $0xc4] sm:$0xf]  ;;  %v1764_v27 = vld [vmem:[#allocation10 + $0xd0] sm:$0xf0] }
  0x27   :  { %463 = vmatpush.bf16.msra.mxu3 %v1783_v19  ;;  %476 = vmatpush.bf16.msrb.mxu0 %v1787_v20  ;;  %v1763_v28 = vor.u32 %v2338_v25, %v1762_v23  ;;  %v1767_v29 = vor.u32 %v2336_v26, %v1764_v27  ;;  %v1770_v30 = vld [vmem:[#allocation10 + $0xc8] sm:$0xf]  ;;  %v2339_v31 = vld [vmem:[#allocation10 + $0xd4] sm:$0xf0]  ;;  %v2337_v32 = vld [vmem:[#allocation10 + $0xcc] sm:$0xf] }
  0x28   :  { %v1771_v33 = vor.u32 %v2339_v31, %v1770_v30  ;;  %v1772_v34 = vld [vmem:[#allocation10 + $0xd8] sm:$0xf0]  ;;  %v1746_v35 = vld [vmem:[#allocation10 + $0xa0] sm:$0xf]  ;;  %v2334_v36 = vld [vmem:[#allocation10 + $0xac] sm:$0xf0] }
  0x29   :  { %v1775_v37 = vor.u32 %v2337_v32, %v1772_v34  ;;  %v2332_v38 = vld [vmem:[#allocation10 + $0xa4] sm:$0xf]  ;;  %v1748_v39 = vld [vmem:[#allocation10 + $0xb0] sm:$0xf0]  ;;  %v1754_v40 = vld [vmem:[#allocation10 + $0xa8] sm:$0xf]  ;;  %v1747_v41 = vor.u32 %v2334_v36, %v1746_v35 }
  0x2a   :  { %235 = vmatpush.bf16.msra.mxu1 %v2309_v6  ;;  %451 = vmatpush.bf16.msra.mxu2 %v1763_v28  ;;  %v2335_v42 = vld [vmem:[#allocation10 + $0xb4] sm:$0xf0]  ;;  %v2333_v43 = vld [vmem:[#allocation10 + $0xac] sm:$0xf]  ;;  %v1756_v44 = vld [vmem:[#allocation10 + $0xb8] sm:$0xf0]  ;;  %v1751_v45 = vor.u32 %v2332_v38, %v1748_v39 }
  0x2b   :  { %464 = vmatpush.bf16.msra.mxu3 %v1767_v29  ;;  %477 = vmatpush.bf16.msrb.mxu0 %v1771_v33  ;;  %v1755_v46 = vor.u32 %v2335_v42, %v1754_v40  ;;  %v1730_v47 = vld [vmem:[#allocation10 + $0x80] sm:$0xf]  ;;  %v2330_v48 = vld [vmem:[#allocation10 + $0x8c] sm:$0xf0]  ;;  %v2328_v49 = vld [vmem:[#allocation10 + $0x84] sm:$0xf]  ;;  %v1759_v50 = vor.u32 %v2333_v43, %v1756_v44 }
  0x2c   :  { %v1732_v51 = vld [vmem:[#allocation10 + $0x90] sm:$0xf0]  ;;  %v1738_v52 = vld [vmem:[#allocation10 + $0x88] sm:$0xf]  ;;  %v2331_v53 = vld [vmem:[#allocation10 + $0x94] sm:$0xf0]  ;;  %v1731_v56 = vor.u32 %v2330_v48, %v1730_v47 }
  0x2d   :  { %v2329_v54 = vld [vmem:[#allocation10 + $0x8c] sm:$0xf]  ;;  %v1740_v55 = vld [vmem:[#allocation10 + $0x98] sm:$0xf0]  ;;  %v1735_v57 = vor.u32 %v2328_v49, %v1732_v51  ;;  %v1739_v58 = vor.u32 %v2331_v53, %v1738_v52  ;;  %v1714_v59 = vld [vmem:[#allocation10 + $0x60] sm:$0xf] }
  0x2e   :  { %236 = vmatpush.bf16.msra.mxu1 %v2308_v7  ;;  %452 = vmatpush.bf16.msra.mxu2 %v1747_v41  ;;  %v2326_v60 = vld [vmem:[#allocation10 + $0x6c] sm:$0xf0]  ;;  %v2324_v61 = vld [vmem:[#allocation10 + $0x64] sm:$0xf]  ;;  %v1743_v62 = vor.u32 %v2329_v54, %v1740_v55  ;;  %v1716_v63 = vld [vmem:[#allocation10 + $0x70] sm:$0xf0] }
  0x2f   :  { %465 = vmatpush.bf16.msra.mxu3 %v1751_v45  ;;  %478 = vmatpush.bf16.msrb.mxu0 %v1755_v46  ;;  %v1722_v0 = vld [vmem:[#allocation10 + $0x68] sm:$0xf]  ;;  %v2327_v1 = vld [vmem:[#allocation10 + $0x74] sm:$0xf0]  ;;  %v2325_v2 = vld [vmem:[#allocation10 + $0x6c] sm:$0xf]  ;;  %v1715_v4 = vor.u32 %v2326_v60, %v1714_v59  ;;  %v1719_v5 = vor.u32 %v2324_v61, %v1716_v63 }
  0x30   :  { %v1724_v3 = vld [vmem:[#allocation10 + $0x78] sm:$0xf0]  ;;  %v1723_v6 = vor.u32 %v2327_v1, %v1722_v0  ;;  %v1698_v7 = vld [vmem:[#allocation10 + $0x40] sm:$0xf]  ;;  %v1706_v12 = vld [vmem:[#allocation10 + $0x48] sm:$0xf] }
  0x31   :  { %v2323_v13 = vld [vmem:[#allocation10 + $0x54] sm:$0xf0]  ;;  %v2321_v14 = vld [vmem:[#allocation10 + $0x4c] sm:$0xf]  ;;  %v1708_v15 = vld [vmem:[#allocation10 + $0x58] sm:$0xf0] }
  0x32   :  { %237 = vmatpush.bf16.msra.mxu1 %v2307_v8  ;;  %453 = vmatpush.bf16.msra.mxu2 %v1731_v56  ;;  %v2322_v8 = vld [vmem:[#allocation10 + $0x4c] sm:$0xf0]  ;;  %v1707_v18 = vor.u32 %v2323_v13, %v1706_v12  ;;  %v2486_v19 = vld [vmem:[%s2846_s2] ss:$0 sm:$0xff]  ;;  %v1711_v20 = vor.u32 %v2321_v14, %v1708_v15  ;;  %v1682_v26 = vld [vmem:[#allocation10 + $0x20] sm:$0xf] }
  0x33   :  { %466 = vmatpush.bf16.msra.mxu3 %v1735_v57  ;;  %479 = vmatpush.bf16.msrb.mxu0 %v1739_v58  ;;  %v1699_v16 = vor.u32 %v2322_v8, %v1698_v7  ;;  %v2318_v27 = vld [vmem:[#allocation10 + $0x2c] sm:$0xf0]  ;;  %v2316_v28 = vld [vmem:[#allocation10 + $0x24] sm:$0xf]  ;;  %v1684_v30 = vld [vmem:[#allocation10 + $0x30] sm:$0xf0] }
  0x34   :  { %v1683_v29 = vor.u32 %v2318_v27, %v1682_v26  ;;  %v1690_v31 = vld [vmem:[#allocation10 + $0x28] sm:$0xf]  ;;  %v2319_v32 = vld [vmem:[#allocation10 + $0x34] sm:$0xf0]  ;;  %v1687_v33 = vor.u32 %v2316_v28, %v1684_v30  ;;  %v2317_v35 = vld [vmem:[#allocation10 + $0x2c] sm:$0xf] }
  0x35   :  { %v1691_v34 = vor.u32 %v2319_v32, %v1690_v31  ;;  %v1692_v36 = vld [vmem:[#allocation10 + $0x38] sm:$0xf0]  ;;  %v1666_v38 = vld [vmem:[#allocation10] sm:$0xf]  ;;  %v2314_v39 = vld [vmem:[#allocation10 + $0xc] sm:$0xf0] }
  0x36   :  { %238 = vmatpush.bf16.msra.mxu1 %v2306_v9  ;;  %v2320_v9 = vld [vmem:[#allocation10 + $0x44] sm:$0xf]  ;;  %454 = vmatpush.bf16.msra.mxu2 %v1715_v4  ;;  %v1667_v41 = vor.u32 %v2314_v39, %v1666_v38  ;;  %v1668_v42 = vld [vmem:[#allocation10 + $0x10] sm:$0xf0]  ;;  %v1674_v43 = vld [vmem:[#allocation10 + $0x8] sm:$0xf] }
  0x37   :  { %467 = vmatpush.bf16.msra.mxu3 %v1719_v5  ;;  %480 = vmatpush.bf16.msrb.mxu0 %v1723_v6  ;;  %v2312_v40 = vld [vmem:[#allocation10 + $0x4] sm:$0xf]  ;;  %v2315_v44 = vld [vmem:[#allocation10 + $0x14] sm:$0xf0]  ;;  %v2313_v47 = vld [vmem:[#allocation10 + $0xc] sm:$0xf] }
  0x38   :  { %v1671_v45 = vor.u32 %v2312_v40, %v1668_v42  ;;  %v1675_v46 = vor.u32 %v2315_v44, %v1674_v43  ;;  %v1676_v48 = vld [vmem:[#allocation10 + $0x18] sm:$0xf0]  ;;  %v2438_v51 = vld [vmem:[#allocation11 + $0x2ec] sm:$0xf0]  ;;  %v2290_v52 = vld [vmem:[#allocation11 + $0x3e0] sm:$0xf] }
  0x39   :  { %v1679_v49 = vor.u32 %v2313_v47, %v1676_v48  ;;  %v2470_v54 = vld [vmem:[#allocation11 + $0x3ec] sm:$0xf0]  ;;  %v2146_v55 = vld [vmem:[#allocation11 + $0x2c0] sm:$0xf] }
  0x3a   :  { %239 = vmatpush.bf16.msra.mxu1 %v2305_v10  ;;  %v1727_v10 = vor.u32 %v2325_v2, %v1724_v3  ;;  %455 = vmatpush.bf16.msra.mxu2 %v1699_v16  ;;  %v2434_v56 = vld [vmem:[#allocation11 + $0x2cc] sm:$0xf0]  ;;  %v2291_v57 = vor.u32 %v2470_v54, %v2290_v52  ;;  %v2274_v58 = vld [vmem:[#allocation11 + $0x3c0] sm:$0xf] }
  0x3b   :  { %481 = vmatpush.bf16.msrb.mxu0 %v1707_v18  ;;  %v2466_v59 = vld [vmem:[#allocation11 + $0x3cc] sm:$0xf0]  ;;  %v1906_v60 = vld [vmem:[#allocation11 + $0xe0] sm:$0xf]  ;;  %v2147_v61 = vor.u32 %v2434_v56, %v2146_v55 }
  0x3c   :  { %v2034_v63 = vld [vmem:[#allocation11 + $0x1e0] sm:$0xf]  ;;  %v2406_v0 = vld [vmem:[#allocation11 + $0x1ec] sm:$0xf0]  ;;  %v2275_v1 = vor.u32 %v2466_v59, %v2274_v58  ;;  %v2487_v58 = vld [vmem:[#allocation8] ss:$0 sm:$0xff] }
  0x3d   :  { %v2035_v3 = vor.u32 %v2406_v0, %v2034_v63  ;;  %v2130_v4 = vld [vmem:[#allocation11 + $0x2a0] sm:$0xf]  ;;  %v2430_v5 = vld [vmem:[#allocation11 + $0x2ac] sm:$0xf0] }
  0x3e   :  { %240 = vmatpush.bf16.msra.mxu1 %v2304_v11  ;;  %v1700_v11 = vld [vmem:[#allocation10 + $0x50] sm:$0xf0]  ;;  %456 = vmatpush.bf16.msra.mxu2 %v1683_v29  ;;  %v2258_v6 = vld [vmem:[#allocation11 + $0x3a0] sm:$0xf]  ;;  %v2462_v7 = vld [vmem:[#allocation11 + $0x3ac] sm:$0xf0]  ;;  %v2131_v13 = vor.u32 %v2430_v5, %v2130_v4 }
  0x3f   :  { %v1703_v17 = vor.u32 %v2320_v9, %v1700_v11  ;;  %482 = vmatpush.bf16.msrb.mxu0 %v1691_v34  ;;  %v1890_v8 = vld [vmem:[#allocation11 + $0xc0] sm:$0xf]  ;;  %v2370_v9 = vld [vmem:[#allocation11 + $0xcc] sm:$0xf0] }
  0x40   :  { %v2018_v11 = vld [vmem:[#allocation11 + $0x1c0] sm:$0xf]  ;;  %v2402_v12 = vld [vmem:[#allocation11 + $0x1cc] sm:$0xf0] }
  0x41   :  { %468 = vmatpush.bf16.msra.mxu3 %v1703_v17  ;;  %v2019_v14 = vor.u32 %v2402_v12, %v2018_v11  ;;  %v2114_v15 = vld [vmem:[#allocation11 + $0x280] sm:$0xf]  ;;  %v2426_v16 = vld [vmem:[#allocation11 + $0x28c] sm:$0xf0]  ;;  %v2259_v17 = vor.u32 %v2462_v7, %v2258_v6  ;;  %v2436_v11 = vld [vmem:[#allocation11 + $0x2e4] sm:$0xf] }
  0x42   :  { %489 = vmatpush.bf16.msrb.mxu1 %v1791_v24  ;;  %457 = vmatpush.bf16.msra.mxu2 %v1667_v41  ;;  %v1874_v18 = vld [vmem:[#allocation11 + $0xa0] sm:$0xf]  ;;  %v2115_v27 = vor.u32 %v2426_v16, %v2114_v15  ;;  %v2362_v28 = vld [vmem:[#allocation11 + $0x8c] sm:$0xf0]  ;;  %v2164_v12 = vld [vmem:[#allocation11 + $0x2f0] sm:$0xf0] }
  0x43   :  { %483 = vmatpush.bf16.msrb.mxu0 %v1675_v46  ;;  %v1858_v26 = vld [vmem:[#allocation11 + $0x80] sm:$0xf]  ;;  %v2394_v30 = vld [vmem:[#allocation11 + $0x18c] sm:$0xf0] }
  0x44   :  { %v1986_v29 = vld [vmem:[#allocation11 + $0x180] sm:$0xf]  ;;  %v2358_v40 = vld [vmem:[#allocation11 + $0x6c] sm:$0xf0] }
  0x45   :  { %469 = vmatpush.bf16.msra.mxu3 %v1687_v33  ;;  %v2098_v32 = vld [vmem:[#allocation11 + $0x260] sm:$0xf]  ;;  %v2422_v33 = vld [vmem:[#allocation11 + $0x26c] sm:$0xf0] }
  0x46   :  { %490 = vmatpush.bf16.msrb.mxu1 %v1775_v37  ;;  %v1695_v37 = vor.u32 %v2317_v35, %v1692_v36  ;;  %v2226_v34 = vld [vmem:[#allocation11 + $0x360] sm:$0xf]  ;;  %v2454_v35 = vld [vmem:[#allocation11 + $0x36c] sm:$0xf0]  ;;  %v1859_v36 = vor.u32 %v2362_v28, %v1858_v26  ;;  %v2099_v39 = vor.u32 %v2422_v33, %v2098_v32  ;;  %v1908_v26 = vld [vmem:[#allocation11 + $0xf0] sm:$0xf0] }
  0x47   :  { %v1842_v38 = vld [vmem:[#allocation11 + $0x60] sm:$0xf]  ;;  %v2390_v42 = vld [vmem:[#allocation11 + $0x16c] sm:$0xf0]  ;;  %v2227_v43 = vor.u32 %v2454_v35, %v2226_v34  ;;  %v2036_v28 = vld [vmem:[#allocation11 + $0x1f0] sm:$0xf0] }
  0x48   :  { %v1970_v41 = vld [vmem:[#allocation11 + $0x160] sm:$0xf]  ;;  %v2450_v47 = vld [vmem:[#allocation11 + $0x34c] sm:$0xf0]  ;;  %v1843_v48 = vor.u32 %v2358_v40, %v1842_v38  ;;  %v2148_v32 = vld [vmem:[#allocation11 + $0x2d0] sm:$0xf0] }
  0x49   :  { %470 = vmatpush.bf16.msra.mxu3 %v1671_v45  ;;  %v2082_v44 = vld [vmem:[#allocation11 + $0x240] sm:$0xf]  ;;  %v2418_v45 = vld [vmem:[#allocation11 + $0x24c] sm:$0xf0]  ;;  %v2464_v33 = vld [vmem:[#allocation11 + $0x3c4] sm:$0xf] }
  0x4a   :  { %491 = vmatpush.bf16.msrb.mxu1 %v1759_v50  ;;  %v2162_v50 = vld [vmem:[#allocation11 + $0x2e0] sm:$0xf]  ;;  %v2354_v52 = vld [vmem:[#allocation11 + $0x4c] sm:$0xf0]  ;;  %v2276_v34 = vld [vmem:[#allocation11 + $0x3d0] sm:$0xf0] }
  0x4b   :  { %v2163_v53 = vor.u32 %v2438_v51, %v2162_v50  ;;  %v2210_v46 = vld [vmem:[#allocation11 + $0x340] sm:$0xf]  ;;  %v2083_v51 = vor.u32 %v2418_v45, %v2082_v44  ;;  %v2386_v54 = vld [vmem:[#allocation11 + $0x14c] sm:$0xf0]  ;;  %v2368_v40 = vld [vmem:[#allocation11 + $0xc4] sm:$0xf]  ;;  %v2279_v45 = vor.u32 %v2464_v33, %v2276_v34 }
  0x4c   :  { %v1826_v50 = vld [vmem:[#allocation11 + $0x40] sm:$0xf]  ;;  %v2211_v55 = vor.u32 %v2450_v47, %v2210_v46  ;;  %v2410_v7 = vld [vmem:[#allocation11 + $0x20c] sm:$0xf0]  ;;  %v2428_v46 = vld [vmem:[#allocation11 + $0x2a4] sm:$0xf] }
  0x4d   :  { %1314 = vmatpush.bf16.msra.mxu0 %v2163_v53  ;;  %1301 = vmatpush.bf16.msrb.mxu3 %v2035_v3  ;;  %v1954_v53 = vld [vmem:[#allocation11 + $0x140] sm:$0xf]  ;;  %v2382_v3 = vld [vmem:[#allocation11 + $0x12c] sm:$0xf0]  ;;  %v2132_v47 = vld [vmem:[#allocation11 + $0x2b0] sm:$0xf0] }
  0x4e   :  { %492 = vmatpush.bf16.msrb.mxu1 %v1743_v62  ;;  %v2374_v62 = vld [vmem:[#allocation11 + $0xec] sm:$0xf0]  ;;  %v2066_v56 = vld [vmem:[#allocation11 + $0x220] sm:$0xf]  ;;  %v1828_v33 = vld [vmem:[#allocation11 + $0x50] sm:$0xf0] }
  0x4f   :  { %v1907_v2 = vor.u32 %v2374_v62, %v1906_v60  ;;  %v2194_v59 = vld [vmem:[#allocation11 + $0x320] sm:$0xf]  ;;  %v2446_v60 = vld [vmem:[#allocation11 + $0x32c] sm:$0xf0]  ;;  %v1955_v62 = vor.u32 %v2386_v54, %v1954_v53  ;;  %v1876_v53 = vld [vmem:[#allocation11 + $0xb0] sm:$0xf0] }
  0x50   :  { %v1810_v63 = vld [vmem:[#allocation11 + $0x20] sm:$0xf]  ;;  %v2195_v5 = vor.u32 %v2446_v60, %v2194_v59  ;;  %v2396_v54 = vld [vmem:[#allocation11 + $0x1a4] sm:$0xf]  ;;  %v2116_v59 = vld [vmem:[#allocation11 + $0x290] sm:$0xf0] }
  0x51   :  { %1288 = vmatpush.bf16.msrb.mxu2 %v1907_v2  ;;  %1315 = vmatpush.bf16.msra.mxu0 %v2147_v61  ;;  %v1827_v61 = vor.u32 %v2354_v52, %v1826_v50  ;;  %v1938_v2 = vld [vmem:[#allocation11 + $0x120] sm:$0xf]  ;;  %v2364_v52 = vld [vmem:[#allocation11 + $0xa4] sm:$0xf] }
  0x52   :  { %493 = vmatpush.bf16.msrb.mxu1 %v1727_v10  ;;  %v1891_v10 = vor.u32 %v2370_v9, %v1890_v8  ;;  %1302 = vmatpush.bf16.msrb.mxu3 %v2019_v14  ;;  %v2050_v6 = vld [vmem:[#allocation11 + $0x200] sm:$0xf]  ;;  %v2292_v14 = vld [vmem:[#allocation11 + $0x3f0] sm:$0xf0]  ;;  %v1939_v16 = vor.u32 %v2382_v3, %v1938_v2  ;;  %v2456_v60 = vld [vmem:[#allocation11 + $0x384] sm:$0xf] }
  0x53   :  { %v2178_v9 = vld [vmem:[#allocation11 + $0x300] sm:$0xf]  ;;  %v2392_v2 = vld [vmem:[#allocation11 + $0x184] sm:$0xf]  ;;  %v1988_v3 = vld [vmem:[#allocation11 + $0x190] sm:$0xf0] }
  0x54   :  { %v2384_v34 = vld [vmem:[#allocation11 + $0x144] sm:$0xf] }
  0x55   :  { %1289 = vmatpush.bf16.msrb.mxu2 %v1891_v10  ;;  %1316 = vmatpush.bf16.msra.mxu0 %v2131_v13  ;;  %v2442_v10 = vld [vmem:[#allocation11 + $0x30c] sm:$0xf0]  ;;  %v2468_v13 = vld [vmem:[#allocation11 + $0x3e4] sm:$0xf] }
  0x56   :  { %494 = vmatpush.bf16.msrb.mxu1 %v1711_v20  ;;  %v2002_v20 = vld [vmem:[#allocation11 + $0x1a0] sm:$0xf] }
  0x59   :  { %1317 = vmatpush.bf16.msra.mxu0 %v2115_v27  ;;  %v2404_v27 = vld [vmem:[#allocation11 + $0x1e4] sm:$0xf] }
  0x5a   :  { %495 = vmatpush.bf16.msrb.mxu1 %v1695_v37  ;;  %v1987_v37 = vor.u32 %v2394_v30, %v1986_v29  ;;  %v2167_v29 = vor.u32 %v2436_v11, %v2164_v12  ;;  %v2295_v30 = vor.u32 %v2468_v13, %v2292_v14  ;;  %v1991_v11 = vor.u32 %v2392_v2, %v1988_v3  ;;  %v2416_v14 = vld [vmem:[#allocation11 + $0x244] sm:$0xf]  ;;  %v2471_v2 = vld [vmem:[#allocation11 + $0x3f4] sm:$0xf0] }
  0x5d   :  { %1318 = vmatpush.bf16.msra.mxu0 %v2099_v39  ;;  %v2039_v39 = vor.u32 %v2404_v27, %v2036_v28  ;;  %v2068_v27 = vld [vmem:[#allocation11 + $0x230] sm:$0xf0] }
  0x5e   :  { %496 = vmatpush.bf16.msrb.mxu1 %v1679_v49  ;;  %v1971_v49 = vor.u32 %v2390_v42, %v1970_v41  ;;  %v1892_v41 = vld [vmem:[#allocation11 + $0xd0] sm:$0xf0]  ;;  %v2400_v42 = vld [vmem:[#allocation11 + $0x1c4] sm:$0xf] }
  0x5f   :  { %v1895_v50 = vor.u32 %v2368_v40, %v1892_v41  ;;  %v2440_v40 = vld [vmem:[#allocation11 + $0x304] sm:$0xf] }
  0x61   :  { %1319 = vmatpush.bf16.msra.mxu0 %v2083_v51 }
  0xa1   :  { %v159_v21 = vpop.f32.mrf.mxu0 }
  0xa2   :  { %v160_v22 = vadd.f32 %v2486_v19, %v159_v21  ;;  %v2366_v19 = vld [vmem:[#allocation11 + $0xac] sm:$0xf0]  ;;  %v2242_v21 = vld [vmem:[#allocation11 + $0x380] sm:$0xf] }
  0xa4   :  { %v163_v23 = vmax.f32 %v160_v22, 0.0  ;;  %v2458_v22 = vld [vmem:[#allocation11 + $0x38c] sm:$0xf0] }
  0xa5   :  { %v2243_v31 = vor.u32 %v2458_v22, %v2242_v21  ;;  %v2378_v21 = vld [vmem:[#allocation11 + $0x10c] sm:$0xf0]  ;;  %v2372_v22 = vld [vmem:[#allocation11 + $0xe4] sm:$0xf] }
  0xa6   :  { %v164_v24 = vpack.c.bf16 %v163_v23, %v163_v23  ;;  %v2398_v23 = vld [vmem:[#allocation11 + $0x1ac] sm:$0xf0]  ;;  %v1911_v38 = vor.u32 %v2372_v22, %v1908_v26  ;;  %v2388_v22 = vld [vmem:[#allocation11 + $0x164] sm:$0xf] }
  0xa7   :  { %v2412_v26 = vld [vmem:[#allocation11 + $0x224] sm:$0xf] }
  0xa8   :  { %241 = vmatmul.bf16.vlgmr.msra.gmra.mxu1 %v164_v24  ;;  %v1875_v24 = vor.u32 %v2366_v19, %v1874_v18  ;;  %v1794_v18 = vld [vmem:[#allocation11] sm:$0xf]  ;;  %v2346_v19 = vld [vmem:[#allocation11 + $0xc] sm:$0xf0]  ;;  %v2071_v28 = vor.u32 %v2412_v26, %v2068_v27 }
  0xa9   :  { %v161_v25 = vpop.f32.mrf.mxu0  ;;  %1327 = vmatpush.bf16.msra.mxu1 %v2291_v57  ;;  %v2414_v57 = vld [vmem:[#allocation11 + $0x22c] sm:$0xf0]  ;;  %v1795_v35 = vor.u32 %v2346_v19, %v1794_v18 }
  0xaa   :  { %v2003_v25 = vor.u32 %v2398_v23, %v2002_v20  ;;  %1290 = vmatpush.bf16.msrb.mxu2 %v1875_v24  ;;  %v2067_v0 = vor.u32 %v2414_v57, %v2066_v56  ;;  %v1922_v20 = vld [vmem:[#allocation11 + $0x100] sm:$0xf]  ;;  %v2051_v24 = vor.u32 %v2410_v7, %v2050_v6  ;;  %v2135_v56 = vor.u32 %v2428_v46, %v2132_v47  ;;  %v2420_v6 = vld [vmem:[#allocation11 + $0x264] sm:$0xf]  ;;  %v2100_v7 = vld [vmem:[#allocation11 + $0x270] sm:$0xf0] }
  0xab   :  { %v2103_v12 = vor.u32 %v2420_v6, %v2100_v7  ;;  %v2380_v46 = vld [vmem:[#allocation11 + $0x124] sm:$0xf] }
  0xac   :  { %1303 = vmatpush.bf16.msrb.mxu3 %v2003_v25  ;;  %1320 = vmatpush.bf16.msra.mxu0 %v2067_v0  ;;  %v2179_v25 = vor.u32 %v2442_v10, %v2178_v9  ;;  %v2360_v0 = vld [vmem:[#allocation11 + $0x84] sm:$0xf]  ;;  %v2228_v9 = vld [vmem:[#allocation11 + $0x370] sm:$0xf0] }
  0xad   :  { %1328 = vmatpush.bf16.msra.mxu1 %v2275_v1  ;;  %v2350_v1 = vld [vmem:[#allocation11 + $0x2c] sm:$0xf0] }
  0xae   :  { %1291 = vmatpush.bf16.msrb.mxu2 %v1859_v36  ;;  %v1811_v15 = vor.u32 %v2350_v1, %v1810_v63  ;;  %v1923_v36 = vor.u32 %v2378_v21, %v1922_v20  ;;  %v1860_v1 = vld [vmem:[#allocation11 + $0x90] sm:$0xf0]  ;;  %v2356_v20 = vld [vmem:[#allocation11 + $0x64] sm:$0xf] }
  0xaf   :  { %v1863_v10 = vor.u32 %v2360_v0, %v1860_v1  ;;  %v1844_v21 = vld [vmem:[#allocation11 + $0x70] sm:$0xf0]  ;;  %v2439_v0 = vld [vmem:[#allocation11 + $0x2f4] sm:$0xf0]  ;;  %v2298_v1 = vld [vmem:[#allocation11 + $0x3e8] sm:$0xf] }
  0xb0   :  { %1304 = vmatpush.bf16.msrb.mxu3 %v1987_v37  ;;  %1321 = vmatpush.bf16.msra.mxu0 %v2051_v24  ;;  %v1972_v24 = vld [vmem:[#allocation11 + $0x170] sm:$0xf0] }
  0xb1   :  { %1329 = vmatpush.bf16.msra.mxu1 %v2259_v17 }
  0xb2   :  { %1292 = vmatpush.bf16.msrb.mxu2 %v1843_v48  ;;  %v2460_v48 = vld [vmem:[#allocation11 + $0x3a4] sm:$0xf] }
  0xb4   :  { %1305 = vmatpush.bf16.msrb.mxu3 %v1971_v49  ;;  %v2260_v49 = vld [vmem:[#allocation11 + $0x3b0] sm:$0xf0] }
  0xb5   :  { %1330 = vmatpush.bf16.msra.mxu1 %v2243_v31  ;;  %v2432_v31 = vld [vmem:[#allocation11 + $0x2c4] sm:$0xf]  ;;  %v2263_v57 = vor.u32 %v2460_v48, %v2260_v49  ;;  %v1940_v48 = vld [vmem:[#allocation11 + $0x130] sm:$0xf0] }
  0xb6   :  { %1293 = vmatpush.bf16.msrb.mxu2 %v1827_v61  ;;  %v2151_v44 = vor.u32 %v2432_v31, %v2148_v32  ;;  %v2244_v61 = vld [vmem:[#allocation11 + $0x390] sm:$0xf0]  ;;  %v2352_v32 = vld [vmem:[#allocation11 + $0x44] sm:$0xf]  ;;  %v1943_v49 = vor.u32 %v2380_v46, %v1940_v48  ;;  %v2427_v46 = vld [vmem:[#allocation11 + $0x294] sm:$0xf0] }
  0xb7   :  { %v2459_v48 = vld [vmem:[#allocation11 + $0x394] sm:$0xf0] }
  0xb8   :  { %1306 = vmatpush.bf16.msrb.mxu3 %v1955_v62  ;;  %v1879_v62 = vor.u32 %v2364_v52, %v1876_v53  ;;  %v2376_v53 = vld [vmem:[#allocation11 + $0x104] sm:$0xf] }
  0xb9   :  { %1331 = vmatpush.bf16.msra.mxu1 %v2227_v43  ;;  %v2020_v43 = vld [vmem:[#allocation11 + $0x1d0] sm:$0xf0] }
  0xba   :  { %1294 = vmatpush.bf16.msrb.mxu2 %v1811_v15  ;;  %v2023_v51 = vor.u32 %v2400_v42, %v2020_v43  ;;  %v2084_v15 = vld [vmem:[#allocation11 + $0x250] sm:$0xf0] }
  0xbb   :  { %v2087_v18 = vor.u32 %v2416_v14, %v2084_v15  ;;  %v2180_v42 = vld [vmem:[#allocation11 + $0x310] sm:$0xf0]  ;;  %v2435_v14 = vld [vmem:[#allocation11 + $0x2d4] sm:$0xf0]  ;;  %v2282_v15 = vld [vmem:[#allocation11 + $0x3c8] sm:$0xf] }
  0xbc   :  { %1307 = vmatpush.bf16.msrb.mxu3 %v1939_v16  ;;  %v2448_v16 = vld [vmem:[#allocation11 + $0x344] sm:$0xf]  ;;  %v2183_v43 = vor.u32 %v2440_v40, %v2180_v42  ;;  %v2403_v40 = vld [vmem:[#allocation11 + $0x1d4] sm:$0xf0] }
  0xbd   :  { %1332 = vmatpush.bf16.msra.mxu1 %v2211_v55  ;;  %v2004_v55 = vld [vmem:[#allocation11 + $0x1b0] sm:$0xf0] }
  0xbe   :  { %1295 = vmatpush.bf16.msrb.mxu2 %v1795_v35  ;;  %v2007_v63 = vor.u32 %v2396_v54, %v2004_v55  ;;  %v1831_v35 = vor.u32 %v2352_v32, %v1828_v33  ;;  %v1924_v54 = vld [vmem:[#allocation11 + $0x110] sm:$0xf0]  ;;  %v2463_v32 = vld [vmem:[#allocation11 + $0x3b4] sm:$0xf0] }
  0xbf   :  { %v1927_v55 = vor.u32 %v2376_v53, %v1924_v54  ;;  %v2010_v53 = vld [vmem:[#allocation11 + $0x1a8] sm:$0xf]  ;;  %v2399_v54 = vld [vmem:[#allocation11 + $0x1b4] sm:$0xf0] }
  0xc0   :  { %1308 = vmatpush.bf16.msrb.mxu3 %v1923_v36  ;;  %v1956_v36 = vld [vmem:[#allocation11 + $0x150] sm:$0xf0] }
  0xc1   :  { %1333 = vmatpush.bf16.msra.mxu1 %v2195_v5  ;;  %v2247_v5 = vor.u32 %v2456_v60, %v2244_v61  ;;  %v2170_v61 = vld [vmem:[#allocation11 + $0x2e8] sm:$0xf] }
  0xc2   :  { %v2171_v7 = vor.u32 %v2439_v0, %v2170_v61  ;;  %v2363_v0 = vld [vmem:[#allocation11 + $0x94] sm:$0xf0] }
  0xc5   :  { %1334 = vmatpush.bf16.msra.mxu1 %v2179_v25  ;;  %v1975_v25 = vor.u32 %v2388_v22, %v1972_v24  ;;  %v2407_v22 = vld [vmem:[#allocation11 + $0x1f4] sm:$0xf0] }
 0x125   :  { %v242_v4 = vpop.f32.mrf.mxu1 }
 0x126   :  { %v243_v8 = vadd.f32 %v2487_v58, %v242_v4  ;;  %v2424_v58 = vld [vmem:[#allocation11 + $0x284] sm:$0xf] }
 0x127   :  { %v2119_v4 = vor.u32 %v2424_v58, %v2116_v59 }
 0x128   :  { %v246_v17 = vmax.f32 %v243_v8, 0.0  ;;  %v2452_v8 = vld [vmem:[#allocation11 + $0x364] sm:$0xf] }
 0x129   :  { %v2231_v13 = vor.u32 %v2452_v8, %v2228_v9  ;;  %v2299_v8 = vor.u32 %v2471_v2, %v2298_v1  ;;  %v2154_v9 = vld [vmem:[#allocation11 + $0x2c8] sm:$0xf]  ;;  %v2395_v2 = vld [vmem:[#allocation11 + $0x194] sm:$0xf0] }
 0x12a   :  { %v247_v23 = vpack.c.bf16 %v246_v17, %v246_v17  ;;  %v2212_v17 = vld [vmem:[#allocation11 + $0x350] sm:$0xf0]  ;;  %v2155_v27 = vor.u32 %v2435_v14, %v2154_v9  ;;  %v1994_v1 = vld [vmem:[#allocation11 + $0x188] sm:$0xf]  ;;  %v2359_v14 = vld [vmem:[#allocation11 + $0x74] sm:$0xf0] }
 0x12b   :  { %v2215_v19 = vor.u32 %v2448_v16, %v2212_v17  ;;  %v2467_v16 = vld [vmem:[#allocation11 + $0x3d4] sm:$0xf0] }
 0x12c   :  { %458 = vmatmul.bf16.vlgmr.msra.gmra.mxu2 %v247_v23  ;;  %471 = vmatmul.bf16.vlgmr.msra.gmra.mxu3 %v247_v23 }
 0x12d   :  { %484 = vmatmul.bf16.vlgmr.msrb.gmra.mxu0 %v247_v23  ;;  %497 = vmatmul.bf16.vlgmr.msrb.gmra.mxu1 %v247_v23  ;;  %v244_v37 = vpop.f32.mrf.mxu1  ;;  %v1847_v23 = vor.u32 %v2356_v20, %v1844_v21  ;;  %v2375_v20 = vld [vmem:[#allocation11 + $0xf4] sm:$0xf0]  ;;  %v2042_v21 = vld [vmem:[#allocation11 + $0x1e8] sm:$0xf] }
 0x12e   :  { %1366 = vmatpush.bf16.msrb.mxu0 %v2167_v29  ;;  %1379 = vmatpush.bf16.msrb.mxu1 %v2295_v30  ;;  %v2444_v29 = vld [vmem:[#allocation11 + $0x324] sm:$0xf]  ;;  %v2196_v30 = vld [vmem:[#allocation11 + $0x330] sm:$0xf0]  ;;  %v1959_v37 = vor.u32 %v2384_v34, %v1956_v36  ;;  %v2043_v36 = vor.u32 %v2407_v22, %v2042_v21  ;;  %v2202_v21 = vld [vmem:[#allocation11 + $0x328] sm:$0xf] }
 0x12f   :  { %1340 = vmatpush.bf16.msra.mxu2 %v1911_v38  ;;  %1353 = vmatpush.bf16.msra.mxu3 %v2039_v39  ;;  %v2199_v31 = vor.u32 %v2444_v29, %v2196_v30  ;;  %v2408_v38 = vld [vmem:[#allocation11 + $0x204] sm:$0xf]  ;;  %v2052_v39 = vld [vmem:[#allocation11 + $0x210] sm:$0xf0]  ;;  %v2138_v29 = vld [vmem:[#allocation11 + $0x2a8] sm:$0xf] }
 0x130   :  { %v2055_v41 = vor.u32 %v2408_v38, %v2052_v39  ;;  %v2431_v30 = vld [vmem:[#allocation11 + $0x2b4] sm:$0xf0]  ;;  %v2026_v39 = vld [vmem:[#allocation11 + $0x1c8] sm:$0xf] }
 0x131   :  { %v2371_v38 = vld [vmem:[#allocation11 + $0xd4] sm:$0xf0] }
 0x132   :  { %1367 = vmatpush.bf16.msrb.mxu0 %v2151_v44  ;;  %1380 = vmatpush.bf16.msrb.mxu1 %v2279_v45  ;;  %v2348_v44 = vld [vmem:[#allocation11 + $0x24] sm:$0xf]  ;;  %v1812_v45 = vld [vmem:[#allocation11 + $0x30] sm:$0xf0]  ;;  %v2447_v22 = vld [vmem:[#allocation11 + $0x334] sm:$0xf0] }
 0x133   :  { %1341 = vmatpush.bf16.msra.mxu2 %v1895_v50  ;;  %1354 = vmatpush.bf16.msra.mxu3 %v2023_v51  ;;  %v1815_v47 = vor.u32 %v2348_v44, %v1812_v45  ;;  %v2344_v50 = vld [vmem:[#allocation11 + $0x4] sm:$0xf]  ;;  %v1796_v51 = vld [vmem:[#allocation11 + $0x10] sm:$0xf0] }
 0x134   :  { %v1799_v52 = vor.u32 %v2344_v50, %v1796_v51  ;;  %v2027_v50 = vor.u32 %v2403_v40, %v2026_v39  ;;  %v1882_v51 = vld [vmem:[#allocation11 + $0xa8] sm:$0xf] }
 0x136   :  { %1368 = vmatpush.bf16.msrb.mxu0 %v2135_v56  ;;  %1381 = vmatpush.bf16.msrb.mxu1 %v2263_v57  ;;  %v280_v56 = vld [vmem:[%s2850_s6] sm:$0xf]  ;;  %s2717_s6 = smov [#allocation14]  }
 0x137   :  { %1342 = vmatpush.bf16.msra.mxu2 %v1879_v62  ;;  %1355 = vmatpush.bf16.msra.mxu3 %v2007_v63  ;;  %v284_v57 = vperm.slane %v280_v56, 2  ;;  %v285_v58 = vperm.slane %v280_v56, 3  ;;  %v282_v3 = vperm.slane %v280_v56, 0  ;;  %s1613_s22 = sshll.u32 %s2717_s6, 4  ;;  %s1614_s22 = int_to_ptr.vmem [resolvable:$true] %s1613_s22 }
 0x13a   :  { %1369 = vmatpush.bf16.msrb.mxu0 %v2119_v4  ;;  %1382 = vmatpush.bf16.msrb.mxu1 %v2247_v5  ;;  %v283_v4 = vperm.slane %v280_v56, 1 }
 0x13b   :  { %1343 = vmatpush.bf16.msra.mxu2 %v1863_v10  ;;  %1356 = vmatpush.bf16.msra.mxu3 %v1991_v11 }
 0x13e   :  { %1370 = vmatpush.bf16.msrb.mxu0 %v2103_v12  ;;  %1383 = vmatpush.bf16.msrb.mxu1 %v2231_v13 }
 0x13f   :  { %1344 = vmatpush.bf16.msra.mxu2 %v1847_v23  ;;  %1357 = vmatpush.bf16.msra.mxu3 %v1975_v25 }
 0x142   :  { %1371 = vmatpush.bf16.msrb.mxu0 %v2087_v18  ;;  %1384 = vmatpush.bf16.msrb.mxu1 %v2215_v19  ;;  %v1914_v19 = vld [vmem:[#allocation11 + $0xe8] sm:$0xf] }
 0x143   :  { %1345 = vmatpush.bf16.msra.mxu2 %v1831_v35  ;;  %1358 = vmatpush.bf16.msra.mxu3 %v1959_v37  ;;  %v1915_v35 = vor.u32 %v2375_v20, %v1914_v19  ;;  %v1898_v37 = vld [vmem:[#allocation11 + $0xc8] sm:$0xf]  ;;  %v2415_v20 = vld [vmem:[#allocation11 + $0x234] sm:$0xf0] }
 0x144   :  { %v2074_v19 = vld [vmem:[#allocation11 + $0x228] sm:$0xf] }
 0x146   :  { %1372 = vmatpush.bf16.msrb.mxu0 %v2071_v28  ;;  %1385 = vmatpush.bf16.msrb.mxu1 %v2199_v31  ;;  %v2283_v28 = vor.u32 %v2467_v16, %v2282_v15  ;;  %v2266_v31 = vld [vmem:[#allocation11 + $0x3a8] sm:$0xf]  ;;  %v2391_v16 = vld [vmem:[#allocation11 + $0x174] sm:$0xf0] }
 0x147   :  { %1346 = vmatpush.bf16.msra.mxu2 %v1815_v47  ;;  %1359 = vmatpush.bf16.msra.mxu3 %v1943_v49  ;;  %v2267_v42 = vor.u32 %v2463_v32, %v2266_v31  ;;  %v2250_v47 = vld [vmem:[#allocation11 + $0x388] sm:$0xf]  ;;  %v1899_v49 = vor.u32 %v2371_v38, %v1898_v37  ;;  %v2411_v32 = vld [vmem:[#allocation11 + $0x214] sm:$0xf0]  ;;  %v2437_v37 = vld [vmem:[#allocation11 + $0x2ec] sm:$0xf] }
 0x148   :  { %v2251_v56 = vor.u32 %v2459_v48, %v2250_v47  ;;  %v1978_v15 = vld [vmem:[#allocation11 + $0x168] sm:$0xf]  ;;  %v2172_v38 = vld [vmem:[#allocation11 + $0x2f8] sm:$0xf0] }
 0x149   :  { %v2058_v31 = vld [vmem:[#allocation11 + $0x208] sm:$0xf] }
 0x14a   :  { %1373 = vmatpush.bf16.msrb.mxu0 %v2055_v41  ;;  %1386 = vmatpush.bf16.msrb.mxu1 %v2183_v43  ;;  %v2139_v41 = vor.u32 %v2431_v30, %v2138_v29  ;;  %v2122_v43 = vld [vmem:[#allocation11 + $0x288] sm:$0xf]  ;;  %v2075_v29 = vor.u32 %v2415_v20, %v2074_v19  ;;  %v2203_v30 = vor.u32 %v2447_v22, %v2202_v21  ;;  %v2425_v19 = vld [vmem:[#allocation11 + $0x28c] sm:$0xf]  ;;  %v2124_v20 = vld [vmem:[#allocation11 + $0x298] sm:$0xf0] }
 0x14b   :  { %1347 = vmatpush.bf16.msra.mxu2 %v1799_v52  ;;  %1360 = vmatpush.bf16.msra.mxu3 %v1927_v55  ;;  %v2367_v52 = vld [vmem:[#allocation11 + $0xb4] sm:$0xf0]  ;;  %v2123_v55 = vor.u32 %v2427_v46, %v2122_v43  ;;  %v1818_v43 = vld [vmem:[#allocation11 + $0x28] sm:$0xf]  ;;  %v2059_v47 = vor.u32 %v2411_v32, %v2058_v31  ;;  %v2457_v21 = vld [vmem:[#allocation11 + $0x38c] sm:$0xf] }
 0x14c   :  { %v1883_v61 = vor.u32 %v2367_v52, %v1882_v51  ;;  %v2383_v46 = vld [vmem:[#allocation11 + $0x134] sm:$0xf0]  ;;  %v2433_v51 = vld [vmem:[#allocation11 + $0x2cc] sm:$0xf]  ;;  %v2156_v52 = vld [vmem:[#allocation11 + $0x2d8] sm:$0xf0] }
 0x14d   :  { %v2252_v22 = vld [vmem:[#allocation11 + $0x398] sm:$0xf0]  ;;  %v2421_v31 = vld [vmem:[#allocation11 + $0x26c] sm:$0xf] }
 0x14e   :  { %v2108_v32 = vld [vmem:[#allocation11 + $0x278] sm:$0xf0] }
 0x1aa   :  { %v485_v59 = vpop.f32.mrf.mxu0  ;;  %v498_v60 = vpop.f32.mrf.mxu1 }
 0x1ab   :  { %v486_v62 = vadd.f32 %v485_v59, %v284_v57  ;;  %v499_v63 = vadd.f32 %v498_v60, %v285_v58  ;;  %v2106_v57 = vld [vmem:[#allocation11 + $0x268] sm:$0xf]  ;;  %v2423_v58 = vld [vmem:[#allocation11 + $0x274] sm:$0xf0] }
 0x1ac   :  { %v2234_v59 = vld [vmem:[#allocation11 + $0x368] sm:$0xf]  ;;  %v2455_v60 = vld [vmem:[#allocation11 + $0x374] sm:$0xf0] }
 0x1ad   :  { %v504_v5 = vmax.f32 %v486_v62, 0.0  ;;  %v505_v6 = vmax.f32 %v499_v63, 0.0  ;;  %v2011_v62 = vor.u32 %v2399_v54, %v2010_v53  ;;  %v1866_v63 = vld [vmem:[#allocation11 + $0x88] sm:$0xf]  ;;  %v2465_v53 = vld [vmem:[#allocation11 + $0x3cc] sm:$0xf] }
 0x1ae   :  { %v1867_v9 = vor.u32 %v2363_v0, %v1866_v63  ;;  %v2405_v63 = vld [vmem:[#allocation11 + $0x1ec] sm:$0xf]  ;;  %v2044_v0 = vld [vmem:[#allocation11 + $0x1f8] sm:$0xf0] }
 0x1af   :  { %v2797_v10 = vpack.c.bf16 %v504_v5, %v504_v5  ;;  %v2799_v11 = vpack.c.bf16 %v505_v6, %v505_v6  ;;  %v459_v12 = vpop.f32.mrf.mxu2  ;;  %v472_v13 = vpop.f32.mrf.mxu3  ;;  %v2090_v5 = vld [vmem:[#allocation11 + $0x248] sm:$0xf]  ;;  %v2419_v6 = vld [vmem:[#allocation11 + $0x254] sm:$0xf0] }
 0x1b0   :  { %v460_v17 = vadd.f32 %v459_v12, %v282_v3  ;;  %v473_v18 = vadd.f32 %v472_v13, %v283_v4  ;;  %v2107_v3 = vor.u32 %v2423_v58, %v2106_v57  ;;  %v2235_v4 = vor.u32 %v2455_v60, %v2234_v59  ;;  %v1850_v13 = vld [vmem:[#allocation11 + $0x68] sm:$0xf]  ;;  %v2347_v58 = vld [vmem:[#allocation11 + $0x14] sm:$0xf0] }
 0x1b1   :  { %1322 = vmatmul.bf16.vlgmr.msra.gmra.mxu0 %v2797_v10  ;;  %1335 = vmatmul.bf16.vlgmr.msra.gmra.mxu1 %v2799_v11  ;;  %v1995_v12 = vor.u32 %v2395_v2, %v1994_v1  ;;  %v1802_v57 = vld [vmem:[#allocation11 + $0x8] sm:$0xf]  ;;  %v2379_v60 = vld [vmem:[#allocation11 + $0x114] sm:$0xf0]  ;;  %v2159_v1 = vor.u32 %v2433_v51, %v2156_v52  ;;  %v2357_v51 = vld [vmem:[#allocation11 + $0x6c] sm:$0xf] }
 0x1b2   :  { %v502_v23 = vmax.f32 %v460_v17, 0.0  ;;  %v503_v24 = vmax.f32 %v473_v18, 0.0  ;;  %1418 = vmatpush.bf16.msra.mxu0 %v2171_v7  ;;  %1431 = vmatpush.bf16.msra.mxu1 %v2299_v8  ;;  %v487_v25 = vpop.f32.mrf.mxu0  ;;  %v500_v26 = vpop.f32.mrf.mxu1  ;;  %v2218_v7 = vld [vmem:[#allocation11 + $0x348] sm:$0xf]  ;;  %v2451_v8 = vld [vmem:[#allocation11 + $0x354] sm:$0xf0]  ;;  %v2091_v17 = vor.u32 %v2419_v6, %v2090_v5 }
 0x1b3   :  { %v2219_v18 = vor.u32 %v2451_v8, %v2218_v7  ;;  %v1834_v25 = vld [vmem:[#allocation11 + $0x48] sm:$0xf]  ;;  %v2355_v26 = vld [vmem:[#allocation11 + $0x54] sm:$0xf0]  ;;  %v2140_v6 = vld [vmem:[#allocation11 + $0x2b8] sm:$0xf0] }
 0x1b4   :  { %v2803_v33 = vpack.c.bf16 %v502_v23, %v502_v23  ;;  %v2805_v34 = vpack.c.bf16 %v503_v24, %v503_v24  ;;  %v1851_v23 = vor.u32 %v2359_v14, %v1850_v13  ;;  %v1979_v24 = vor.u32 %v2391_v16, %v1978_v15  ;;  %v1930_v59 = vld [vmem:[#allocation11 + $0x108] sm:$0xf]  ;;  %v2461_v7 = vld [vmem:[#allocation11 + $0x3ac] sm:$0xf]  ;;  %v2268_v8 = vld [vmem:[#allocation11 + $0x3b8] sm:$0xf0] }
 0x1b5   :  { %v1835_v39 = vor.u32 %v2355_v26, %v1834_v25  ;;  %v1931_v5 = vor.u32 %v2379_v60, %v1930_v59  ;;  %v2369_v13 = vld [vmem:[#allocation11 + $0xcc] sm:$0xf]  ;;  %v1900_v14 = vld [vmem:[#allocation11 + $0xd8] sm:$0xf0] }
 0x1b6   :  { %1419 = vmatpush.bf16.msra.mxu0 %v2155_v27  ;;  %1432 = vmatpush.bf16.msra.mxu1 %v2283_v28  ;;  %v1962_v27 = vld [vmem:[#allocation11 + $0x148] sm:$0xf]  ;;  %v2387_v28 = vld [vmem:[#allocation11 + $0x154] sm:$0xf0]  ;;  %v2401_v15 = vld [vmem:[#allocation11 + $0x1cc] sm:$0xf] }
 0x1b7   :  { %1296 = vmatmul.bf16.vlgmr.msrb.gmra.mxu2 %v2803_v33  ;;  %1309 = vmatmul.bf16.vlgmr.msrb.gmra.mxu3 %v2805_v34  ;;  %v461_v44 = vpop.f32.mrf.mxu2  ;;  %v474_v45 = vpop.f32.mrf.mxu3  ;;  %v1963_v40 = vor.u32 %v2387_v28, %v1962_v27  ;;  %v2028_v16 = vld [vmem:[#allocation11 + $0x1d8] sm:$0xf0]  ;;  %v2365_v25 = vld [vmem:[#allocation11 + $0xac] sm:$0xf] }
 0x1b8   :  { %1392 = vmatpush.bf16.msrb.mxu2 %v1915_v35  ;;  %1405 = vmatpush.bf16.msrb.mxu3 %v2043_v36  ;;  %v2186_v35 = vld [vmem:[#allocation11 + $0x308] sm:$0xf]  ;;  %v2443_v36 = vld [vmem:[#allocation11 + $0x314] sm:$0xf0]  ;;  %v1884_v26 = vld [vmem:[#allocation11 + $0xb8] sm:$0xf0] }
 0x1b9   :  { %v2351_v44 = vld [vmem:[#allocation11 + $0x34] sm:$0xf0]  ;;  %v1946_v45 = vld [vmem:[#allocation11 + $0x128] sm:$0xf]  ;;  %v2187_v48 = vor.u32 %v2443_v36, %v2186_v35  ;;  %v2397_v27 = vld [vmem:[#allocation11 + $0x1ac] sm:$0xf] }
 0x1ba   :  { %1420 = vmatpush.bf16.msra.mxu0 %v2139_v41  ;;  %1433 = vmatpush.bf16.msra.mxu1 %v2267_v42  ;;  %v2469_v41 = vld [vmem:[#allocation11 + $0x3ec] sm:$0xf]  ;;  %v2300_v42 = vld [vmem:[#allocation11 + $0x3f8] sm:$0xf0]  ;;  %v1819_v54 = vor.u32 %v2351_v44, %v1818_v43  ;;  %v2111_v43 = vor.u32 %v2421_v31, %v2108_v32 }
 0x1bb   :  { %v2012_v28 = vld [vmem:[#allocation11 + $0x1b8] sm:$0xf0]  ;;  %v2453_v35 = vld [vmem:[#allocation11 + $0x36c] sm:$0xf] }
 0x1bc   :  { %1393 = vmatpush.bf16.msrb.mxu2 %v1899_v49  ;;  %1406 = vmatpush.bf16.msrb.mxu3 %v2027_v50  ;;  %v2175_v49 = vor.u32 %v2437_v37, %v2172_v38  ;;  %v2303_v50 = vor.u32 %v2469_v41, %v2300_v42  ;;  %v2236_v36 = vld [vmem:[#allocation11 + $0x378] sm:$0xf0]  ;;  %v1887_v37 = vor.u32 %v2365_v25, %v1884_v26  ;;  %v2393_v41 = vld [vmem:[#allocation11 + $0x18c] sm:$0xf] }
 0x1bd   :  { %v2015_v38 = vor.u32 %v2397_v27, %v2012_v28  ;;  %v1996_v42 = vld [vmem:[#allocation11 + $0x198] sm:$0xf0]  ;;  %v2239_v44 = vor.u32 %v2453_v35, %v2236_v36  ;;  %v2445_v59 = vld [vmem:[#allocation11 + $0x32c] sm:$0xf] }
 0x1be   :  { %1421 = vmatpush.bf16.msra.mxu0 %v2123_v55  ;;  %1434 = vmatpush.bf16.msra.mxu1 %v2251_v56  ;;  %v1947_v55 = vor.u32 %v2383_v46, %v1946_v45  ;;  %v2284_v56 = vld [vmem:[#allocation11 + $0x3d8] sm:$0xf0]  ;;  %v2417_v45 = vld [vmem:[#allocation11 + $0x24c] sm:$0xf] }
 0x1bf   :  { %v2287_v2 = vor.u32 %v2465_v53, %v2284_v56  ;;  %v2092_v46 = vld [vmem:[#allocation11 + $0x258] sm:$0xf0]  ;;  %v2389_v53 = vld [vmem:[#allocation11 + $0x16c] sm:$0xf] }
 0x1c0   :  { %1394 = vmatpush.bf16.msrb.mxu2 %v1883_v61  ;;  %1407 = vmatpush.bf16.msrb.mxu3 %v2011_v62  ;;  %v2373_v61 = vld [vmem:[#allocation11 + $0xec] sm:$0xf]  ;;  %v1916_v62 = vld [vmem:[#allocation11 + $0xf8] sm:$0xf0] }
 0x1c1   :  { %1374 = vmatmul.bf16.vlgmr.msrb.gmra.mxu0 %v2797_v10  ;;  %1387 = vmatmul.bf16.vlgmr.msrb.gmra.mxu1 %v2799_v11  ;;  %v1852_v52 = vld [vmem:[#allocation11 + $0x78] sm:$0xf0] }
 0x1c2   :  { %1422 = vmatpush.bf16.msra.mxu0 %v2107_v3  ;;  %1435 = vmatpush.bf16.msra.mxu1 %v2235_v4  ;;  %v2429_v3 = vld [vmem:[#allocation11 + $0x2ac] sm:$0xf]  ;;  %v1803_v4 = vor.u32 %v2347_v58, %v1802_v57  ;;  %v2076_v58 = vld [vmem:[#allocation11 + $0x238] sm:$0xf0] }
 0x1c3   :  { %v2413_v57 = vld [vmem:[#allocation11 + $0x22c] sm:$0xf]  ;;  %v2204_v60 = vld [vmem:[#allocation11 + $0x338] sm:$0xf0] }
 0x1c4   :  { %1395 = vmatpush.bf16.msrb.mxu2 %v1867_v9  ;;  %1408 = vmatpush.bf16.msrb.mxu3 %v1995_v12  ;;  %v1919_v9 = vor.u32 %v2373_v61, %v1916_v62  ;;  %v2047_v12 = vor.u32 %v2405_v63, %v2044_v0  ;;  %v1855_v61 = vor.u32 %v2357_v51, %v1852_v52  ;;  %v2353_v63 = vld [vmem:[#allocation11 + $0x4c] sm:$0xf]  ;;  %v1836_v0 = vld [vmem:[#allocation11 + $0x58] sm:$0xf0] }
 0x1c6   :  { %1423 = vmatpush.bf16.msra.mxu0 %v2091_v17  ;;  %1436 = vmatpush.bf16.msra.mxu1 %v2219_v18  ;;  %v2143_v17 = vor.u32 %v2429_v3, %v2140_v6  ;;  %v2271_v18 = vor.u32 %v2461_v7, %v2268_v8  ;;  %v2079_v3 = vor.u32 %v2413_v57, %v2076_v58  ;;  %v2060_v6 = vld [vmem:[#allocation11 + $0x218] sm:$0xf0]  ;;  %v2441_v7 = vld [vmem:[#allocation11 + $0x30c] sm:$0xf] }
 0x1c7   :  { %1348 = vmatmul.bf16.vlgmr.msra.gmra.mxu2 %v2803_v33  ;;  %1361 = vmatmul.bf16.vlgmr.msra.gmra.mxu3 %v2805_v34  ;;  %v2188_v8 = vld [vmem:[#allocation11 + $0x318] sm:$0xf0] }
 0x1c8   :  { %1396 = vmatpush.bf16.msrb.mxu2 %v1851_v23  ;;  %1409 = vmatpush.bf16.msrb.mxu3 %v1979_v24  ;;  %v1903_v23 = vor.u32 %v2369_v13, %v1900_v14  ;;  %v2031_v24 = vor.u32 %v2401_v15, %v2028_v16  ;;  %v2349_v13 = vld [vmem:[#allocation11 + $0x2c] sm:$0xf]  ;;  %v1820_v14 = vld [vmem:[#allocation11 + $0x38] sm:$0xf0] }
 0x1c9   :  { %v2381_v15 = vld [vmem:[#allocation11 + $0x12c] sm:$0xf]  ;;  %v1948_v16 = vld [vmem:[#allocation11 + $0x138] sm:$0xf0] }
 0x1ca   :  { %1424 = vmatpush.bf16.msra.mxu0 %v2075_v29  ;;  %1437 = vmatpush.bf16.msra.mxu1 %v2203_v30  ;;  %v2127_v29 = vor.u32 %v2425_v19, %v2124_v20  ;;  %v2255_v30 = vor.u32 %v2457_v21, %v2252_v22  ;;  %v1823_v19 = vor.u32 %v2349_v13, %v1820_v14  ;;  %v2345_v21 = vld [vmem:[#allocation11 + $0xc] sm:$0xf]  ;;  %v1804_v22 = vld [vmem:[#allocation11 + $0x18] sm:$0xf0] }
 0x1cb   :  { %v1951_v20 = vor.u32 %v2381_v15, %v1948_v16  ;;  %v1807_v25 = vor.u32 %v2345_v21, %v1804_v22 }
 0x1cc   :  { %1397 = vmatpush.bf16.msrb.mxu2 %v1835_v39  ;;  %1410 = vmatpush.bf16.msrb.mxu3 %v1963_v40  ;;  %v2361_v39 = vld [vmem:[#allocation11 + $0x8c] sm:$0xf]  ;;  %v1868_v40 = vld [vmem:[#allocation11 + $0x98] sm:$0xf0] }
 0x1ce   :  { %1425 = vmatpush.bf16.msra.mxu0 %v2059_v47  ;;  %1438 = vmatpush.bf16.msra.mxu1 %v2187_v48  ;;  %v2449_v47 = vld [vmem:[#allocation11 + $0x34c] sm:$0xf]  ;;  %v2220_v48 = vld [vmem:[#allocation11 + $0x358] sm:$0xf0] }
 0x1cf   :  { %v2223_v56 = vor.u32 %v2449_v47, %v2220_v48 }
 0x1d0   :  { %1398 = vmatpush.bf16.msrb.mxu2 %v1819_v54  ;;  %1411 = vmatpush.bf16.msrb.mxu3 %v1947_v55  ;;  %v1980_v54 = vld [vmem:[#allocation11 + $0x178] sm:$0xf0]  ;;  %v2095_v55 = vor.u32 %v2417_v45, %v2092_v46 }
 0x1d1   :  { %1426 = vmatmul.bf16.vlgmr.msra.gmra.mxu0 %v2797_v10  ;;  %1439 = vmatmul.bf16.vlgmr.msra.gmra.mxu1 %v2799_v11  ;;  %v1983_v62 = vor.u32 %v2389_v53, %v1980_v54 }
 0x1d2   :  { %1470 = vmatpush.bf16.msrb.mxu0 %v2175_v49  ;;  %1483 = vmatpush.bf16.msrb.mxu1 %v2303_v50  ;;  %v1871_v49 = vor.u32 %v2361_v39, %v1868_v40  ;;  %v1999_v50 = vor.u32 %v2393_v41, %v1996_v42 }
 0x1d4   :  { %1399 = vmatpush.bf16.msrb.mxu2 %v1803_v4  ;;  %1412 = vmatpush.bf16.msrb.mxu3 %v1931_v5  ;;  %v2207_v4 = vor.u32 %v2445_v59, %v2204_v60  ;;  %v2409_v5 = vld [vmem:[#allocation11 + $0x20c] sm:$0xf] }
 0x1d6   :  { %1471 = vmatpush.bf16.msrb.mxu0 %v2159_v1  ;;  %1484 = vmatpush.bf16.msrb.mxu1 %v2287_v2  ;;  %v2385_v1 = vld [vmem:[#allocation11 + $0x14c] sm:$0xf]  ;;  %v1964_v2 = vld [vmem:[#allocation11 + $0x158] sm:$0xf0] }
 0x1d7   :  { %1400 = vmatmul.bf16.vlgmr.msrb.gmra.mxu2 %v2803_v33  ;;  %1413 = vmatmul.bf16.vlgmr.msrb.gmra.mxu3 %v2805_v34 }
 0x1d8   :  { %1444 = vmatpush.bf16.msra.mxu2 %v1919_v9  ;;  %1457 = vmatpush.bf16.msra.mxu3 %v2047_v12  ;;  %v1839_v9 = vor.u32 %v2353_v63, %v1836_v0  ;;  %v1967_v12 = vor.u32 %v2385_v1, %v1964_v2 }
 0x1da   :  { %1472 = vmatpush.bf16.msrb.mxu0 %v2143_v17  ;;  %1485 = vmatpush.bf16.msrb.mxu1 %v2271_v18  ;;  %v2063_v17 = vor.u32 %v2409_v5, %v2060_v6  ;;  %v2191_v18 = vor.u32 %v2441_v7, %v2188_v8 }
 0x1dc   :  { %1445 = vmatpush.bf16.msra.mxu2 %v1903_v23  ;;  %1458 = vmatpush.bf16.msra.mxu3 %v2031_v24  ;;  %v2377_v23 = vld [vmem:[#allocation11 + $0x10c] sm:$0xf]  ;;  %v1932_v24 = vld [vmem:[#allocation11 + $0x118] sm:$0xf0] }
 0x1dd   :  { %v1935_v26 = vor.u32 %v2377_v23, %v1932_v24 }
 0x1de   :  { %1473 = vmatpush.bf16.msrb.mxu0 %v2127_v29  ;;  %1486 = vmatpush.bf16.msrb.mxu1 %v2255_v30  ;;  %v638_v29 = vld [vmem:[#allocation13] sm:$0xf] }
 0x1df   :  { %v640_v32 = vperm.slane %v638_v29, 0  ;;  %v642_v58 = vperm.slane %v638_v29, 2  ;;  %v643_v8 = vperm.slane %v638_v29, 3 }
 0x1e0   :  { %1446 = vmatpush.bf16.msra.mxu2 %v1887_v37  ;;  %1459 = vmatpush.bf16.msra.mxu3 %v2015_v38 }
 0x1e2   :  { %1474 = vmatpush.bf16.msrb.mxu0 %v2111_v43  ;;  %1487 = vmatpush.bf16.msrb.mxu1 %v2239_v44  ;;  %v641_v44 = vperm.slane %v638_v29, 1 }
 0x1e4   :  { %1447 = vmatpush.bf16.msra.mxu2 %v1871_v49  ;;  %1460 = vmatpush.bf16.msra.mxu3 %v1999_v50 }
 0x1e6   :  { %1475 = vmatpush.bf16.msrb.mxu0 %v2095_v55  ;;  %1488 = vmatpush.bf16.msrb.mxu1 %v2223_v56 }
 0x1e8   :  { %1448 = vmatpush.bf16.msra.mxu2 %v1855_v61  ;;  %1461 = vmatpush.bf16.msra.mxu3 %v1983_v62 }
 0x1ea   :  { %1476 = vmatpush.bf16.msrb.mxu0 %v2079_v3  ;;  %1489 = vmatpush.bf16.msrb.mxu1 %v2207_v4 }
 0x1ec   :  { %1449 = vmatpush.bf16.msra.mxu2 %v1839_v9  ;;  %1462 = vmatpush.bf16.msra.mxu3 %v1967_v12 }
 0x1ee   :  { %1477 = vmatpush.bf16.msrb.mxu0 %v2063_v17  ;;  %1490 = vmatpush.bf16.msrb.mxu1 %v2191_v18 }
 0x1f0   :  { %1450 = vmatpush.bf16.msra.mxu2 %v1823_v19  ;;  %1463 = vmatpush.bf16.msra.mxu3 %v1951_v20 }
 0x1f1   :  { %1478 = vmatmul.bf16.vlgmr.msrb.gmra.mxu0 %v2797_v10  ;;  %1491 = vmatmul.bf16.vlgmr.msrb.gmra.mxu1 %v2799_v11 }
 0x1f4   :  { %1451 = vmatpush.bf16.msra.mxu2 %v1807_v25  ;;  %1464 = vmatpush.bf16.msra.mxu3 %v1935_v26 }
 0x1f7   :  { %1452 = vmatmul.bf16.vlgmr.msra.gmra.mxu2 %v2803_v33  ;;  %1465 = vmatmul.bf16.vlgmr.msra.gmra.mxu3 %v2805_v34 }
 0x22e   :  { %v1323_v27 = vpop.f32.mrf.mxu0  ;;  %v1336_v28 = vpop.f32.mrf.mxu1 }
 0x236   :  { %v1325_v30 = vpop.f32.mrf.mxu0  ;;  %v1338_v31 = vpop.f32.mrf.mxu1 }
 0x23a   :  { %v1297_v35 = vpop.f32.mrf.mxu2  ;;  %v1310_v36 = vpop.f32.mrf.mxu3 }
 0x23b   :  { %v1298_v37 = vadd.f32 %v1297_v35, %v640_v32 }
 0x23d   :  { %v1311_v38 = vadd.f32 %v1310_v36, %v1298_v37 }
 0x23e   :  { %v1375_v39 = vpop.f32.mrf.mxu0  ;;  %v1388_v10 = vpop.f32.mrf.mxu1 }
 0x23f   :  { %v1324_v40 = vadd.f32 %v1323_v27, %v1311_v38 }
 0x241   :  { %v1337_v11 = vadd.f32 %v1336_v28, %v1324_v40 }
 0x242   :  { %v1299_v41 = vpop.f32.mrf.mxu2  ;;  %v1312_v42 = vpop.f32.mrf.mxu3 }
 0x243   :  { %v1497_v33 = vsel %vm1496_vm2, %v1337_v11, -inf }
 0x244   :  { %1498 = vmax.xlane.f32.xlu0 %v1497_v33 }
 0x246   :  { %v1377_v34 = vpop.f32.mrf.mxu0  ;;  %v1390_v43 = vpop.f32.mrf.mxu1 }
 0x24a   :  { %v1349_v45 = vpop.f32.mrf.mxu2  ;;  %v1362_v46 = vpop.f32.mrf.mxu3 }
 0x24b   :  { %v1350_v47 = vadd.f32 %v1349_v45, %v641_v44 }
 0x24d   :  { %v1363_v48 = vadd.f32 %v1362_v46, %v1350_v47 }
 0x24e   :  { %v1427_v49 = vpop.f32.mrf.mxu0  ;;  %v1440_v50 = vpop.f32.mrf.mxu1 }
 0x24f   :  { %v1376_v51 = vadd.f32 %v1375_v39, %v1363_v48 }
 0x251   :  { %v1389_v52 = vadd.f32 %v1388_v10, %v1376_v51 }
 0x252   :  { %v1351_v53 = vpop.f32.mrf.mxu2  ;;  %v1364_v54 = vpop.f32.mrf.mxu3 }
 0x253   :  { %v1525_v55 = vsel %vm1496_vm2, %v1389_v52, -inf }
 0x254   :  { %1526 = vmax.xlane.f32.xlu0 %v1525_v55 }
 0x256   :  { %v1429_v56 = vpop.f32.mrf.mxu0  ;;  %v1442_v57 = vpop.f32.mrf.mxu1 }
 0x25a   :  { %v1401_v59 = vpop.f32.mrf.mxu2  ;;  %v1414_v60 = vpop.f32.mrf.mxu3 }
 0x25b   :  { %v1402_v61 = vadd.f32 %v1401_v59, %v642_v58 }
 0x25d   :  { %v1415_v62 = vadd.f32 %v1414_v60, %v1402_v61 }
 0x25f   :  { %v1428_v63 = vadd.f32 %v1427_v49, %v1415_v62 }
 0x261   :  { %v1441_v0 = vadd.f32 %v1440_v50, %v1428_v63 }
 0x262   :  { %v1403_v1 = vpop.f32.mrf.mxu2  ;;  %v1416_v2 = vpop.f32.mrf.mxu3 }
 0x263   :  { %v1553_v3 = vsel %vm1496_vm2, %v1441_v0, -inf }
 0x264   :  { %1554 = vmax.xlane.f32.xlu1 %v1553_v3 }
 0x26e   :  { %v1479_v4 = vpop.f32.mrf.mxu0  ;;  %v1492_v5 = vpop.f32.mrf.mxu1 }
 0x276   :  { %v1481_v6 = vpop.f32.mrf.mxu0  ;;  %v1494_v7 = vpop.f32.mrf.mxu1 }
 0x27a   :  { %v1453_v9 = vpop.f32.mrf.mxu2  ;;  %v1466_v12 = vpop.f32.mrf.mxu3 }
 0x27b   :  { %v1454_v13 = vadd.f32 %v1453_v9, %v643_v8 }
 0x27d   :  { %v1467_v14 = vadd.f32 %v1466_v12, %v1454_v13 }
 0x27f   :  { %v1480_v15 = vadd.f32 %v1479_v4, %v1467_v14 }
 0x281   :  { %v1493_v16 = vadd.f32 %v1492_v5, %v1480_v15 }
 0x282   :  { %v1455_v17 = vpop.f32.mrf.mxu2  ;;  %v1468_v18 = vpop.f32.mrf.mxu3 }
 0x283   :  { %v1581_v19 = vsel %vm1496_vm2, %v1493_v16, -inf }
 0x284   :  { %1582 = vmax.xlane.f32.xlu1 %v1581_v19 }
 0x2b7   :  { %v1499_v20 = vpop.xlane.xlu0 %1498 }
 0x2b8   :  { %v1500_v21 = vsub.f32 %v1337_v11, %v1499_v20 }
 0x2ba   :  { %v1501_v22 = vmul.f32 1.442695, %v1500_v21 }
 0x2bc   :  { %2488 = vpow2.f32 %v1501_v22 }
 0x2c2   :  { %v2489_v23 = vpop.eup %2488 }
 0x2c3   :  { %v1503_v24 = vsel %vm1496_vm2, %v2489_v23, 0.0 }
 0x2c4   :  { %1504 = vadd.xlane.f32.xlu2 %v1503_v24 }
 0x2c7   :  { %v1527_v25 = vpop.xlane.xlu0 %1526 }
 0x2c8   :  { %v1528_v26 = vsub.f32 %v1389_v52, %v1527_v25 }
 0x2ca   :  { %v1529_v27 = vmul.f32 1.442695, %v1528_v26 }
 0x2cc   :  { %2490 = vpow2.f32 %v1529_v27 }
 0x2d2   :  { %v2491_v28 = vpop.eup %2490 }
 0x2d3   :  { %v1531_v29 = vsel %vm1496_vm2, %v2491_v28, 0.0 }
 0x2d4   :  { %1532 = vadd.xlane.f32.xlu2 %v1531_v29 }
 0x2d7   :  { %v1555_v30 = vpop.xlane.xlu1 %1554 }
 0x2d8   :  { %v1556_v31 = vsub.f32 %v1441_v0, %v1555_v30 }
 0x2da   :  { %v1557_v32 = vmul.f32 1.442695, %v1556_v31 }
 0x2dc   :  { %2492 = vpow2.f32 %v1557_v32 }
 0x2e2   :  { %v2827_v35 = vpop.eup %2492 }
 0x2e3   :  { %v1559_v36 = vsel %vm1496_vm2, %v2827_v35, 0.0 }
 0x2e4   :  { %1560 = vadd.xlane.f32.xlu0 %v1559_v36 }
 0x2f7   :  { %v1583_v37 = vpop.xlane.xlu1 %1582 }
 0x2f8   :  { %v1584_v38 = vsub.f32 %v1493_v16, %v1583_v37 }
 0x2fa   :  { %v1585_v39 = vmul.f32 1.442695, %v1584_v38 }
 0x2fc   :  { %2494 = vpow2.f32 %v1585_v39 }
 0x302   :  { %v2831_v10 = vpop.eup %2494 }
 0x303   :  { %v1587_v40 = vsel %vm1496_vm2, %v2831_v10, 0.0 }
 0x304   :  { %1588 = vadd.xlane.f32.xlu1 %v1587_v40 }
 0x337   :  { %v1505_v11 = vpop.xlane.xlu2 %1504 }
 0x338   :  { %2496 = vrcp.f32 %v1505_v11  ;;  %v1517_v34 = vand.u32 2147483648, %v1505_v11  ;;  %v1515_v44 = vand.u32 2147483647, %v1505_v11  ;;  %vm1511_vm4 = vweird.f32 %v1505_v11 }
 0x33a   :  { %v1518_v46 = vor.u32 1.1754944e-38, %v1517_v34  ;;  %vm1516_vm6 = vcmp.eq.f32.partialorder %v1515_v44, 8.507059e+37 }
 0x33e   :  { %v2497_v41 = vpop.eup %2496 }
 0x33f   :  { %v1507_v42 = vmul.f32 %v2497_v41, %v1505_v11  ;;  %vm1512_vm3 = vweird.f32 %v2497_v41 }
 0x340   :  { %vm1513_vm5 = vmor %vm1511_vm4, %vm1512_vm3 }
 0x341   :  { %v1508_v33 = vsub.f32 1.0, %v1507_v42 }
 0x343   :  { %v1509_v43 = vmul.f32 %v2497_v41, %v1508_v33 }
 0x345   :  { %v1510_v45 = vadd.f32 %v2497_v41, %v1509_v43 }
 0x347   :  { %v1514_v47 = vsel %vm1513_vm5, %v2497_v41, %v1510_v45  ;;  %v1533_v48 = vpop.xlane.xlu2 %1532 }
 0x348   :  { %v1519_v49 = vsel %vm1516_vm6, %v1518_v46, %v1514_v47  ;;  %2498 = vrcp.f32 %v1533_v48  ;;  %v1545_v55 = vand.u32 2147483648, %v1533_v48  ;;  %v1543_v57 = vand.u32 2147483647, %v1533_v48 }
 0x349   :  { %v1521_v50 = vmul.f32 %v2489_v23, %v1519_v49  ;;  %vm1539_vm9 = vweird.f32 %v1533_v48 }
 0x34a   :  { %v1546_v59 = vor.u32 1.1754944e-38, %v1545_v55  ;;  %vm1544_vm11 = vcmp.eq.f32.partialorder %v1543_v57, 8.507059e+37 }
 0x34b   :  { %v1522_v51 = vpack.c.bf16 %v1521_v50, %v1521_v50 }
 0x34d   :  { %1524 = vst.msk [vmem:[#allocation14] sm:$0x3] %vm1523_vm7, %v1522_v51 }
 0x34e   :  { %v2499_v52 = vpop.eup %2498 }
 0x34f   :  { %v1535_v53 = vmul.f32 %v2499_v52, %v1533_v48  ;;  %vm1540_vm8 = vweird.f32 %v2499_v52 }
 0x350   :  { %vm1541_vm10 = vmor %vm1539_vm9, %vm1540_vm8 }
 0x351   :  { %v1536_v54 = vsub.f32 1.0, %v1535_v53 }
 0x353   :  { %v1537_v56 = vmul.f32 %v2499_v52, %v1536_v54 }
 0x355   :  { %v1538_v58 = vadd.f32 %v2499_v52, %v1537_v56 }
 0x357   :  { %v1542_v60 = vsel %vm1541_vm10, %v2499_v52, %v1538_v58  ;;  %v1561_v62 = vpop.xlane.xlu0 %1560 }
 0x358   :  { %v1547_v61 = vsel %vm1544_vm11, %v1546_v59, %v1542_v60  ;;  %2500 = vrcp.f32 %v1561_v62  ;;  %v1573_v4 = vand.u32 2147483648, %v1561_v62  ;;  %v1571_v6 = vand.u32 2147483647, %v1561_v62 }
 0x359   :  { %v1549_v63 = vmul.f32 %v2491_v28, %v1547_v61  ;;  %vm1567_vm13 = vweird.f32 %v1561_v62 }
 0x35a   :  { %v1574_v8 = vor.u32 1.1754944e-38, %v1573_v4  ;;  %vm1572_vm15 = vcmp.eq.f32.partialorder %v1571_v6, 8.507059e+37 }
 0x35b   :  { %v1550_v0 = vpack.c.bf16 %v1549_v63, %v1549_v63 }
 0x35d   :  { %1552 = vst.msk [vmem:[#allocation14 + $0x2] sm:$0x3] %vm1523_vm7, %v1550_v0 }
 0x35e   :  { %v2501_v1 = vpop.eup %2500 }
 0x35f   :  { %v1563_v2 = vmul.f32 %v2501_v1, %v1561_v62  ;;  %vm1568_vm12 = vweird.f32 %v2501_v1 }
 0x360   :  { %vm1569_vm14 = vmor %vm1567_vm13, %vm1568_vm12 }
 0x361   :  { %v1564_v3 = vsub.f32 1.0, %v1563_v2 }
 0x363   :  { %v1565_v5 = vmul.f32 %v2501_v1, %v1564_v3 }
 0x365   :  { %v1566_v7 = vadd.f32 %v2501_v1, %v1565_v5 }
 0x367   :  { %v1570_v9 = vsel %vm1569_vm14, %v2501_v1, %v1566_v7 }
 0x368   :  { %v1575_v12 = vsel %vm1572_vm15, %v1574_v8, %v1570_v9 }
 0x369   :  { %v1577_v13 = vmul.f32 %v2827_v35, %v1575_v12 }
 0x36b   :  { %v1578_v14 = vpack.c.bf16 %v1577_v13, %v1577_v13 }
 0x36d   :  { %1580 = vst.msk [vmem:[#allocation14 + $0x4] sm:$0x3] %vm1523_vm7, %v1578_v14 }
 0x377   :  { %v1589_v15 = vpop.xlane.xlu1 %1588 }
 0x378   :  { %2502 = vrcp.f32 %v1589_v15  ;;  %v1601_v19 = vand.u32 2147483648, %v1589_v15  ;;  %v1599_v21 = vand.u32 2147483647, %v1589_v15  ;;  %vm1595_vm1 = vweird.f32 %v1589_v15 }
 0x37a   :  { %v1602_v23 = vor.u32 1.1754944e-38, %v1601_v19  ;;  %vm1600_vm3 = vcmp.eq.f32.partialorder %v1599_v21, 8.507059e+37 }
 0x37e   :  { %v2503_v16 = vpop.eup %2502 }
 0x37f   :  { %v1591_v17 = vmul.f32 %v2503_v16, %v1589_v15  ;;  %vm1596_vm0 = vweird.f32 %v2503_v16 }
 0x380   :  { %vm1597_vm2 = vmor %vm1595_vm1, %vm1596_vm0 }
 0x381   :  { %v1592_v18 = vsub.f32 1.0, %v1591_v17 }
 0x383   :  { %v1593_v20 = vmul.f32 %v2503_v16, %v1592_v18 }
 0x385   :  { %v1594_v22 = vadd.f32 %v2503_v16, %v1593_v20 }
 0x387   :  { %v1598_v24 = vsel %vm1597_vm2, %v2503_v16, %v1594_v22 }
 0x388   :  { %v1603_v25 = vsel %vm1600_vm3, %v1602_v23, %v1598_v24 }
 0x389   :  { %v1605_v26 = vmul.f32 %v2831_v10, %v1603_v25 }
 0x38b   :  { %v1606_v27 = vpack.c.bf16 %v1605_v26, %v1605_v26 }
 0x38d   :  { %1608 = vst.msk [vmem:[#allocation14 + $0x6] sm:$0x3] %vm1523_vm7, %v1606_v27 }
 0x38e   :  { %1621 = dma.vmem_to_hbm [thread:$0]  %s1614_s22, 128, %s1616_s25, [#allocation4], %s2718_s26, %s2718_s26, %s2719_s4  }
 0x38f   :  { %2704 = dma.done.wait [#allocation4], 128  }
 0x390   :  { %2705 = vsyncadd [#allocation4], 4294967168 }
 0x391   :  { %1626 = vsyncpa [#allocation3], 1 }
 0x392   :  { %1627 = vsyncpa [#allocation6], 1 }
 0x393   :  { %1628 = vsyncpa [#allocation9], 1 }
 0x394   :  { %1629 = vsyncpa [#allocation12], 1 }
 0x395   :  { %1630 = vsyncpa [#allocation4], 1 }

</bundles_post_ra>
